<compile_context>
chip_gen: v6e
topology: v6e:2x2x1
jax: 0.10.0
libtpu: 0.0.40
codegen_flags: <defaults>
</compile_context>

<pallas_src>
import functools

import jax
import jax.numpy as jnp
from jax import lax
from jax.experimental import pallas as pl
from jax.experimental.pallas import tpu as pltpu

IN_FEATURES = 512     # fixed by the module: nn.Linear(512, num_hidden_states)
NUM_GROUPS = 32       # fixed by the module: GroupNorm32(32, out_channels)
EPS = 1e-5            # nn.GroupNorm default


# ---------------------------------------------------------------------------
# Hardware probes (best effort; everything falls back to safe defaults).
# ---------------------------------------------------------------------------

def _tensorcores_per_chip():
    """v7x has 2 TensorCores per chip; v5e/v6e have 1 (safe default)."""
    try:
        kind = jax.devices()[0].device_kind.lower()
        if "v7" in kind or "7x" in kind:
            return 2
    except Exception:
        pass
    return 1


def _vmem_capacity_bytes():
    try:
        cap = getattr(pltpu.get_tpu_info(), "vmem_capacity_bytes", None)
        if cap:
            return int(cap)
    except Exception:
        pass
    return 64 << 20   # conservative: v7x per-TensorCore VMEM


@functools.lru_cache(maxsize=None)
def _buffered1_supported():
    """Probe whether BlockSpec(..., pipeline_mode=pl.Buffered(1)) (single-buffered
    grid-invariant operands) compiles and runs correctly on this install."""
    try:
        def probe(a_ref, w_ref, g_ref, o_ref):
            o_ref[...] = a_ref[...] + w_ref[...] + g_ref[0]

        f = pl.pallas_call(
            probe,
            out_shape=jax.ShapeDtypeStruct((16, 128), jnp.float32),
            grid=(2,),
            in_specs=[
                pl.BlockSpec((8, 128), lambda i: (i, 0)),
                pl.BlockSpec((8, 128), lambda i: (0, 0),
                             pipeline_mode=pl.Buffered(1)),
                pl.BlockSpec((2, 1, 128), lambda i: (0, 0, 0),
                             pipeline_mode=pl.Buffered(1)),
            ],
            out_specs=pl.BlockSpec((8, 128), lambda i: (i, 0)),
            compiler_params=pltpu.CompilerParams(
                dimension_semantics=("parallel",)),
        )
        r = f(jnp.ones((16, 128), jnp.float32),
              jnp.ones((8, 128), jnp.float32),
              jnp.ones((2, 1, 128), jnp.float32))
        return bool(jnp.allclose(jax.block_until_ready(r), 3.0))
    except Exception:
        return False


def _invariant_spec(shape):
    """BlockSpec for a grid-invariant operand.  Its index_map is constant, so
    double buffering only wastes VMEM -> single-buffer when supported."""
    ndim = len(shape)
    index_map = lambda i: (0,) * ndim
    if _buffered1_supported():
        return pl.BlockSpec(shape, index_map, pipeline_mode=pl.Buffered(1))
    return pl.BlockSpec(shape, index_map)


# ---------------------------------------------------------------------------
# Kernel bodies.
# ---------------------------------------------------------------------------

def _gn_linear_silu_residual(h, w, gamma, beta, bias, gmat, gmat_t, inv_gs, eps):
    """One ResMlpBlock: GroupNorm32 -> Linear -> SiLU -> residual.

    GroupNorm stats are f32 and use a centered two-pass formulation through
    one-hot matmuls (per-group sums, then sums of centered squares), avoiding
    the E[x^2]-E[x]^2 cancellation and any sublane-concatenate copies."""
    mean = jnp.dot(h, gmat, preferred_element_type=jnp.float32) * inv_gs        # (tb, G)
    mean_b = jnp.dot(mean, gmat_t, preferred_element_type=jnp.float32)          # (tb, H)
    d = h - mean_b
    var = jnp.dot(d * d, gmat, preferred_element_type=jnp.float32) * inv_gs     # (tb, G)
    inv_b = jnp.dot(lax.rsqrt(var + eps), gmat_t,
                    preferred_element_type=jnp.float32)                          # (tb, H)
    hn = d * (inv_b * gamma) + beta                                              # fused GN affine
    y = jnp.dot(hn.astype(jnp.bfloat16), w,
                preferred_element_type=jnp.float32) + bias                       # bf16 MXU, f32 acc
    y = y * jax.nn.sigmoid(y)                                                    # SiLU (sigmoid -> EUP)
    return h + y                                                                 # in_ch == out_ch


def resmlp_resident_kernel(x_ref, w1_ref, b1_ref, gmat_ref, gmat_t_ref,
                           gammas_ref, betas_ref, wbs_ref, bbs_ref, wo_ref, bo_ref,
                           o_ref, *, num_layers, hidden, num_groups, eps):
    """All weights resident in VMEM (fits the budget)."""
    inv_gs = float(num_groups) / float(hidden)      # 1 / group_size
    gmat = gmat_ref[...]
    gmat_t = gmat_t_ref[...]

    # fc1 + SiLU (x already bf16; f32 accumulation)
    h = jnp.dot(x_ref[...], w1_ref[...], preferred_element_type=jnp.float32) + b1_ref[...]
    h = h * jax.nn.sigmoid(h)

    def body(l, h):
        return _gn_linear_silu_residual(h, wbs_ref[l], gammas_ref[l], betas_ref[l],
                                        bbs_ref[l], gmat, gmat_t, inv_gs, eps)

    # fori_loop bounds live ranges; unroll short chains for LLO scheduler visibility.
    h = lax.fori_loop(0, num_layers, body, h, unroll=(num_layers <= 4))

    o_ref[...] = (jnp.dot(h.astype(jnp.bfloat16), wo_ref[...],
                          preferred_element_type=jnp.float32) + bo_ref[...]
                  ).astype(o_ref.dtype)


def resmlp_stream_kernel(x_ref, w1_ref, b1_ref, gmat_ref, gmat_t_ref,
                         gammas_ref, betas_ref, wbs_hbm, bbs_ref, wo_ref, bo_ref,
                         o_ref, wbuf_ref, sem_ref, *, num_layers, hidden, num_groups, eps):
    """Per-layer (H, H) weights stay in HBM and are streamed through a manual
    2-deep double buffer; layer l+1's DMA is hidden behind layer l's matmul."""
    inv_gs = float(num_groups) / float(hidden)
    gmat = gmat_ref[...]
    gmat_t = gmat_t_ref[...]

    # Prime slot 0 with layer-0 weights; the DMA overlaps the fc1 matmul.
    pltpu.make_async_copy(wbs_hbm.at[0], wbuf_ref.at[0], sem_ref.at[0]).start()

    h = jnp.dot(x_ref[...], w1_ref[...], preferred_element_type=jnp.float32) + b1_ref[...]
    h = h * jax.nn.sigmoid(h)

    def body(l, h):
        slot = l & 1
        # Prefetch the next layer's weights into the other slot (already consumed).
        @pl.when(l + 1 < num_layers)
        def _():
            pltpu.make_async_copy(wbs_hbm.at[l + 1], wbuf_ref.at[1 - slot],
                                  sem_ref.at[1 - slot]).start()
        # Wait for this layer's weights, then compute.
        pltpu.make_async_copy(wbs_hbm.at[l], wbuf_ref.at[slot], sem_ref.at[slot]).wait()
        return _gn_linear_silu_residual(h, wbuf_ref[slot], gammas_ref[l], betas_ref[l],
                                        bbs_ref[l], gmat, gmat_t, inv_gs, eps)

    h = lax.fori_loop(0, num_layers, body, h, unroll=(num_layers <= 4))

    o_ref[...] = (jnp.dot(h.astype(jnp.bfloat16), wo_ref[...],
                          preferred_element_type=jnp.float32) + bo_ref[...]
                  ).astype(o_ref.dtype)


# ---------------------------------------------------------------------------
# Host-side planning and wrapper.
# ---------------------------------------------------------------------------

def _pick_tb(batch, ncores):
    """Batch-tile selection.

    * 1 TensorCore per chip (v5e/v6e): one big tile (grid=1) -- splitting only
      halves MXU M-occupancy per step and adds ~0.35 us grid-step overhead.
    * 2 TensorCores (v7x): keep grid >= 2 so both cores get work under
      dimension_semantics=("parallel",).
    Whenever grid > 1 the tile is a multiple of 8 (sublane-aligned)."""
    if ncores >= 2:
        if batch <= 128:
            half = batch // 2
            if batch % 2 == 0 and half % 8 == 0:
                return half
            return batch
        for tb in (256, 128, 64, 32, 16, 8):   # largest tb that still gives grid >= 2
            if batch % tb == 0 and batch // tb >= 2:
                return tb
        return batch
    if batch <= 256:
        return batch
    for tb in (256, 128, 64, 32, 16, 8):
        if batch % tb == 0:
            return tb
    return batch


def _group_onehots(hidden, num_groups):
    gs = hidden // num_groups
    g_of_c = jnp.arange(hidden, dtype=jnp.int32) // gs
    gmat = (g_of_c[:, None] == jnp.arange(num_groups, dtype=jnp.int32)[None, :])
    gmat = gmat.astype(jnp.float32)                 # (H, G)
    return gmat, jnp.transpose(gmat)                # (H, G), (G, H)


def _vmem_plan(tb, hidden, num_layers, weight_mult):
    """Estimated VMEM bytes for the resident-weights and streaming designs."""
    bf2, f4 = 2, 4
    w1_b = IN_FEATURES * hidden * bf2
    wo_b = hidden * hidden * bf2
    wbs_b = num_layers * hidden * hidden * bf2
    small_b = ((2 + 3 * num_layers) * hidden + 2 * hidden * NUM_GROUPS) * f4
    act_b = 2 * tb * (IN_FEATURES * bf2 + hidden * f4)       # pipelined x / out tiles
    tmp_b = 8 * tb * hidden * f4 + hidden * hidden * bf2      # f32 temps + staged layer weight
    fixed = 4 << 20                                           # compiler-internal scratch
    resident = weight_mult * (w1_b + wo_b + wbs_b) + 2 * small_b + act_b + tmp_b + fixed
    streaming = (weight_mult * (w1_b + wo_b) + 2 * hidden * hidden * bf2
                 + 2 * small_b + act_b + tmp_b + fixed)
    return resident, streaming


def resmlp_forward(x, params, *, num_layers, hidden, tb=None, stream_weights=None):
    """ResMlp forward as one Pallas kernel.  params = (w1, b1, gammas, betas,
    wbs, bbs, wo, bo); all weight matrices are stored (in_features, out_features)."""
    w1, b1, gammas, betas, wbs, bbs, wo, bo = params
    batch = x.shape[0]
    assert x.shape[1] == IN_FEATURES
    assert num_layers >= 1
    assert hidden % NUM_GROUPS == 0, "GroupNorm32 needs hidden % 32 == 0"
    # (hidden that is a multiple of 128 keeps every tile lane-dense / unmasked.)

    ncores = _tensorcores_per_chip()
    if tb is None:
        tb = _pick_tb(batch, ncores)
    assert batch % tb == 0

    if x.dtype != jnp.bfloat16:
        x = x.astype(jnp.bfloat16)      # halve the only batch-streamed HBM->VMEM DMA

    gmat, gmat_t = _group_onehots(hidden, NUM_GROUPS)

    weight_mult = 1 if _buffered1_supported() else 2     # single vs double buffered weights
    budget = int(0.85 * _vmem_capacity_bytes())
    resident_est, stream_est = _vmem_plan(tb, hidden, num_layers, weight_mult)
    if stream_weights is None:
        stream_weights = resident_est > budget
    est = stream_est if stream_weights else resident_est
    vmem_limit = int(min(max(est, 24 << 20), budget))
    # TODO(synk): for configs where even w1/wo plus one streamed layer exceed the
    #             budget, also stream w1/wo with the same make_async_copy pattern.

    kern_kwargs = dict(num_layers=num_layers, hidden=hidden,
                       num_groups=NUM_GROUPS, eps=EPS)
    if stream_weights:
        kernel = functools.partial(resmlp_stream_kernel, **kern_kwargs)
        wbs_spec = pl.BlockSpec(memory_space=pl.ANY)     # stays in HBM; streamed per layer
        scratch = [pltpu.VMEM((2, hidden, hidden), jnp.bfloat16),
                   pltpu.SemaphoreType.DMA((2,))]
    else:
        kernel = functools.partial(resmlp_resident_kernel, **kern_kwargs)
        wbs_spec = _invariant_spec((num_layers, hidden, hidden))
        scratch = []

    inv = _invariant_spec
    in_specs = [
        pl.BlockSpec((tb, IN_FEATURES), lambda i: (i, 0)),   # x tile (bf16)
        inv((IN_FEATURES, hidden)),                          # w1 (in, out), bf16
        inv((1, hidden)),                                    # b1
        inv((hidden, NUM_GROUPS)),                           # GN one-hot (H, G)
        inv((NUM_GROUPS, hidden)),                           # GN one-hot (G, H)
        inv((num_layers, 1, hidden)),                        # GN gammas
        inv((num_layers, 1, hidden)),                        # GN betas
        wbs_spec,                                            # block weights (L, H, H), bf16
        inv((num_layers, 1, hidden)),                        # block biases
        inv((hidden, hidden)),                               # out weight (in, out), bf16
        inv((1, hidden)),                                    # out bias
    ]

    return pl.pallas_call(
        kernel,
        out_shape=jax.ShapeDtypeStruct((batch, hidden), jnp.float32),
        grid=(batch // tb,),
        in_specs=in_specs,
        out_specs=pl.BlockSpec((tb, hidden), lambda i: (i, 0)),
        scratch_shapes=scratch,
        compiler_params=pltpu.CompilerParams(
            dimension_semantics=("parallel",),
            vmem_limit_bytes=vmem_limit),
    )(x, w1, b1, gmat, gmat_t, gammas, betas, wbs, bbs, wo, bo)


# ---------------------------------------------------------------------------
# Parameters and pure-JAX reference.
# ---------------------------------------------------------------------------

def make_params(key, num_layers, hidden):
    """Weights stored as bf16 (MXU inputs); biases / GN affine params in f32."""
    ks = jax.random.split(key, 6)
    w1 = (0.02 * jax.random.normal(ks[0], (IN_FEATURES, hidden), jnp.float32)).astype(jnp.bfloat16)
    b1 = 0.02 * jax.random.normal(ks[1], (1, hidden), jnp.float32)
    gammas = jnp.ones((num_layers, 1, hidden), jnp.float32)          # torch GN default affine
    betas = jnp.zeros((num_layers, 1, hidden), jnp.float32)
    wbs = (0.02 * jax.random.normal(ks[2], (num_layers, hidden, hidden), jnp.float32)).astype(jnp.bfloat16)
    bbs = 0.02 * jax.random.normal(ks[3], (num_layers, 1, hidden), jnp.float32)
    wo = (0.02 * jax.random.normal(ks[4], (hidden, hidden), jnp.float32)).astype(jnp.bfloat16)
    bo = 0.02 * jax.random.normal(ks[5], (1, hidden), jnp.float32)
    return (w1, b1, gammas, betas, wbs, bbs, wo, bo)


def ref_forward(x, params, *, num_layers, hidden):
    """Pure-JAX reference mirroring the PyTorch module (bf16 matmul inputs with
    f32 accumulation to match the kernel's MXU precision; exact f32 GroupNorm)."""
    w1, b1, gammas, betas, wbs, bbs, wo, bo = params
    bf = jnp.bfloat16
    h = jnp.dot(x.astype(bf), w1, preferred_element_type=jnp.float32) + b1
    h = h * jax.nn.sigmoid(h)
    for l in range(num_layers):
        hg = h.reshape(-1, NUM_GROUPS, hidden // NUM_GROUPS)
        mean = hg.mean(-1, keepdims=True)
        var = hg.var(-1, keepdims=True)                       # biased, like torch GN
        hn = ((hg - mean) / jnp.sqrt(var + EPS)).reshape(-1, hidden)
        hn = hn * gammas[l, 0] + betas[l, 0]
        y = jnp.dot(hn.astype(bf), wbs[l], preferred_element_type=jnp.float32) + bbs[l, 0]
        y = y * jax.nn.sigmoid(y)
        h = h + y
    return jnp.dot(h.astype(bf), wo, preferred_element_type=jnp.float32) + bo


if __name__ == "__main__":
    num_layers = 3
    hidden = 256          # num_hidden_states: multiple of 32 (GroupNorm) and of 128 (lane-dense)
    batch = 64

    key = jax.random.PRNGKey(0)
    kx, kp = jax.random.split(key)
    x = jax.random.normal(kx, (batch, IN_FEATURES), jnp.float32)
    params = make_params(kp, num_layers, hidden)

    expected = ref_forward(x, params, num_layers=num_layers, hidden=hidden)

    # Resident-weights path (weights fit comfortably in VMEM at these shapes).
    out = jax.block_until_ready(
        resmlp_forward(x, params, num_layers=num_layers, hidden=hidden))
    assert out.shape == (batch, hidden)
    assert jnp.allclose(out, expected, rtol=5e-3, atol=5e-3), \
        "resident-path mismatch vs pure-JAX reference"

    # Weight-streaming path (chosen automatically when L*H*H weights exceed the
    # VMEM budget, e.g. on v7x's 64 MiB/TC) -- exercised here explicitly.
    out_s = jax.block_until_ready(
        resmlp_forward(x, params, num_layers=num_layers, hidden=hidden,
                       stream_weights=True))
    assert jnp.allclose(out_s, expected, rtol=5e-3, atol=5e-3), \
        "streaming-path mismatch vs pure-JAX reference"

    print("KERNEL_OK")
</pallas_src>

<mosaic_0001>
module attributes {stable_mosaic.version = 11 : i64} {
  func.func @probe(%arg0: i32, %arg1: memref<8x128xf32, #tpu.memory_space<vmem>>, %arg2: memref<8x128xf32, #tpu.memory_space<vmem>>, %arg3: memref<2x1x128xf32, #tpu.memory_space<vmem>>, %arg4: memref<8x128xf32, #tpu.memory_space<vmem>>) attributes {dimension_semantics = [#tpu.dimension_semantics<parallel>], iteration_bounds = array<i64: 2>, scalar_prefetch = 0 : i64, scratch_operands = 0 : i64, tpu.core_type = #tpu.core_type<tc>, window_params = [{transform_indices = @transform_0, window_bounds = array<i64: 8, 128>}, {pipeline_mode = #tpu.pipeline_mode<synchronous>, transform_indices = @transform_1, window_bounds = array<i64: 8, 128>}, {pipeline_mode = #tpu.pipeline_mode<synchronous>, transform_indices = @transform_2, window_bounds = array<i64: 2, 1, 128>}, {transform_indices = @transform_3, window_bounds = array<i64: 8, 128>}]} {
    %c0 = arith.constant 0 : index
    %c0_0 = arith.constant 0 : index
    %0 = vector.load %arg1[%c0, %c0_0] : memref<8x128xf32, #tpu.memory_space<vmem>>, vector<8x128xf32>
    %c0_1 = arith.constant 0 : index
    %c0_2 = arith.constant 0 : index
    %1 = vector.load %arg2[%c0_1, %c0_2] : memref<8x128xf32, #tpu.memory_space<vmem>>, vector<8x128xf32>
    %2 = arith.addf %0, %1 : vector<8x128xf32>
    %c0_3 = arith.constant 0 : index
    %c0_4 = arith.constant 0 : index
    %c0_5 = arith.constant 0 : index
    %3 = vector.load %arg3[%c0_3, %c0_4, %c0_5] : memref<2x1x128xf32, #tpu.memory_space<vmem>>, vector<1x1x128xf32>
    %4 = vector.shape_cast %3 : vector<1x1x128xf32> to vector<1x128xf32>
    %5 = vector.broadcast %4 : vector<1x128xf32> to vector<8x128xf32>
    %6 = arith.addf %2, %5 : vector<8x128xf32>
    %c0_6 = arith.constant 0 : index
    %c0_7 = arith.constant 0 : index
    %7 = vector.load %arg4[%c0_6, %c0_7] : memref<8x128xf32, #tpu.memory_space<vmem>>, vector<8x128xf32>
    tpu.vector_store %arg4[%c0_6, %c0_7], %6 {strides = array<i32>} : memref<8x128xf32, #tpu.memory_space<vmem>>, vector<8x128xf32>,
    return
  }
  func.func @transform_0(%arg0: i32) -> (i32, i32) {
    %c0_i32 = arith.constant 0 : i32
    %c0_i32_0 = arith.constant 0 : i32
    return %arg0, %c0_i32 : i32, i32
  }
  func.func @transform_1(%arg0: i32) -> (i32, i32) {
    %c0_i32 = arith.constant 0 : i32
    %c0_i32_0 = arith.constant 0 : i32
    %c0_i32_1 = arith.constant 0 : i32
    return %c0_i32, %c0_i32_0 : i32, i32
  }
  func.func @transform_2(%arg0: i32) -> (i32, i32, i32) {
    %c0_i32 = arith.constant 0 : i32
    %c0_i32_0 = arith.constant 0 : i32
    %c0_i32_1 = arith.constant 0 : i32
    %c0_i32_2 = arith.constant 0 : i32
    return %c0_i32, %c0_i32_0, %c0_i32_1 : i32, i32, i32
  }
  func.func @transform_3(%arg0: i32) -> (i32, i32) {
    %c0_i32 = arith.constant 0 : i32
    %c0_i32_0 = arith.constant 0 : i32
    return %arg0, %c0_i32 : i32, i32
  }
}

module attributes {stable_mosaic.version = 11 : i64} {
  func.func @resmlp_resident_kernel(%arg0: i32, %arg1: memref<64x512xbf16, #tpu.memory_space<vmem>>, %arg2: memref<512x256xbf16, #tpu.memory_space<vmem>>, %arg3: memref<1x256xf32, #tpu.memory_space<vmem>>, %arg4: memref<256x32xf32, #tpu.memory_space<vmem>>, %arg5: memref<32x256xf32, #tpu.memory_space<vmem>>, %arg6: memref<3x1x256xf32, #tpu.memory_space<vmem>>, %arg7: memref<3x1x256xf32, #tpu.memory_space<vmem>>, %arg8: memref<3x256x256xbf16, #tpu.memory_space<vmem>>, %arg9: memref<3x1x256xf32, #tpu.memory_space<vmem>>, %arg10: memref<256x256xbf16, #tpu.memory_space<vmem>>, %arg11: memref<1x256xf32, #tpu.memory_space<vmem>>, %arg12: memref<64x256xf32, #tpu.memory_space<vmem>>) attributes {dimension_semantics = [#tpu.dimension_semantics<parallel>], iteration_bounds = array<i64: 1>, scalar_prefetch = 0 : i64, scratch_operands = 0 : i64, tpu.core_type = #tpu.core_type<tc>, window_params = [{transform_indices = @transform_0, window_bounds = array<i64: 64, 512>}, {pipeline_mode = #tpu.pipeline_mode<synchronous>, transform_indices = @transform_1, window_bounds = array<i64: 512, 256>}, {pipeline_mode = #tpu.pipeline_mode<synchronous>, transform_indices = @transform_2, window_bounds = array<i64: 1, 256>}, {pipeline_mode = #tpu.pipeline_mode<synchronous>, transform_indices = @transform_3, window_bounds = array<i64: 256, 32>}, {pipeline_mode = #tpu.pipeline_mode<synchronous>, transform_indices = @transform_4, window_bounds = array<i64: 32, 256>}, {pipeline_mode = #tpu.pipeline_mode<synchronous>, transform_indices = @transform_5, window_bounds = array<i64: 3, 1, 256>}, {pipeline_mode = #tpu.pipeline_mode<synchronous>, transform_indices = @transform_6, window_bounds = array<i64: 3, 1, 256>}, {pipeline_mode = #tpu.pipeline_mode<synchronous>, transform_indices = @transform_7, window_bounds = array<i64: 3, 256, 256>}, {pipeline_mode = #tpu.pipeline_mode<synchronous>, transform_indices = @transform_8, window_bounds = array<i64: 3, 1, 256>}, {pipeline_mode = #tpu.pipeline_mode<synchronous>, transform_indices = @transform_9, window_bounds = array<i64: 256, 256>}, {pipeline_mode = #tpu.pipeline_mode<synchronous>, transform_indices = @transform_10, window_bounds = array<i64: 1, 256>}, {transform_indices = @transform_11, window_bounds = array<i64: 64, 256>}]} {
    %c0 = arith.constant 0 : index
    %c0_0 = arith.constant 0 : index
    %0 = vector.load %arg4[%c0, %c0_0] : memref<256x32xf32, #tpu.memory_space<vmem>>, vector<256x32xf32>
    %c0_1 = arith.constant 0 : index
    %c0_2 = arith.constant 0 : index
    %1 = vector.load %arg5[%c0_1, %c0_2] : memref<32x256xf32, #tpu.memory_space<vmem>>, vector<32x256xf32>
    %c0_3 = arith.constant 0 : index
    %c0_4 = arith.constant 0 : index
    %2 = vector.load %arg1[%c0_3, %c0_4] : memref<64x512xbf16, #tpu.memory_space<vmem>>, vector<64x512xbf16>
    %c0_5 = arith.constant 0 : index
    %c0_6 = arith.constant 0 : index
    %3 = vector.load %arg2[%c0_5, %c0_6] : memref<512x256xbf16, #tpu.memory_space<vmem>>, vector<512x256xbf16>
    %cst = arith.constant dense<0.000000e+00> : vector<64x256xf32>
    %4 = tpu.matmul %2, %3, %cst {dimension_numbers = #tpu.dot_dimension_numbers<[1], [0], [0], [1], [0, 0, 1, 1], [], []>} : vector<64x512xbf16>, vector<512x256xbf16>, vector<64x256xf32> -> vector<64x256xf32>
    %c0_7 = arith.constant 0 : index
    %c0_8 = arith.constant 0 : index
    %5 = vector.load %arg3[%c0_7, %c0_8] : memref<1x256xf32, #tpu.memory_space<vmem>>, vector<1x256xf32>
    %6 = vector.broadcast %5 : vector<1x256xf32> to vector<64x256xf32>
    %7 = arith.addf %4, %6 : vector<64x256xf32>
    %8 = arith.negf %7 : vector<64x256xf32>
    %9 = math.exp %8 : vector<64x256xf32>
    %cst_9 = arith.constant 1.000000e+00 : f32
    %10 = vector.broadcast %cst_9 : f32 to vector<64x256xf32>
    %11 = arith.addf %10, %9 : vector<64x256xf32>
    %12 = arith.divf %10, %11 : vector<64x256xf32>
    %13 = arith.mulf %7, %12 : vector<64x256xf32>
    %c0_i32 = arith.constant 0 : i32
    %14 = arith.index_cast %c0_i32 : i32 to index
    %c0_10 = arith.constant 0 : index
    %c0_11 = arith.constant 0 : index
    %15 = vector.load %arg8[%14, %c0_10, %c0_11] : memref<3x256x256xbf16, #tpu.memory_space<vmem>>, vector<1x256x256xbf16>
    %16 = vector.shape_cast %15 : vector<1x256x256xbf16> to vector<256x256xbf16>
    %17 = arith.index_cast %c0_i32 : i32 to index
    %c0_12 = arith.constant 0 : index
    %c0_13 = arith.constant 0 : index
    %18 = vector.load %arg6[%17, %c0_12, %c0_13] : memref<3x1x256xf32, #tpu.memory_space<vmem>>, vector<1x1x256xf32>
    %19 = vector.shape_cast %18 : vector<1x1x256xf32> to vector<1x256xf32>
    %20 = arith.index_cast %c0_i32 : i32 to index
    %c0_14 = arith.constant 0 : index
    %c0_15 = arith.constant 0 : index
    %21 = vector.load %arg7[%20, %c0_14, %c0_15] : memref<3x1x256xf32, #tpu.memory_space<vmem>>, vector<1x1x256xf32>
    %22 = vector.shape_cast %21 : vector<1x1x256xf32> to vector<1x256xf32>
    %23 = arith.index_cast %c0_i32 : i32 to index
    %c0_16 = arith.constant 0 : index
    %c0_17 = arith.constant 0 : index
    %24 = vector.load %arg9[%23, %c0_16, %c0_17] : memref<3x1x256xf32, #tpu.memory_space<vmem>>, vector<1x1x256xf32>
    %25 = vector.shape_cast %24 : vector<1x1x256xf32> to vector<1x256xf32>
    %cst_18 = arith.constant dense<0.000000e+00> : vector<64x32xf32>
    %26 = tpu.matmul %13, %0, %cst_18 {dimension_numbers = #tpu.dot_dimension_numbers<[1], [0], [0], [1], [0, 0, 1, 1], [], []>} : vector<64x256xf32>, vector<256x32xf32>, vector<64x32xf32> -> vector<64x32xf32>
    %cst_19 = arith.constant 1.250000e-01 : f32
    %27 = vector.broadcast %cst_19 : f32 to vector<64x32xf32>
    %28 = arith.mulf %26, %27 : vector<64x32xf32>
    %cst_20 = arith.constant dense<0.000000e+00> : vector<64x256xf32>
    %29 = tpu.matmul %28, %1, %cst_20 {dimension_numbers = #tpu.dot_dimension_numbers<[1], [0], [0], [1], [0, 0, 1, 1], [], []>} : vector<64x32xf32>, vector<32x256xf32>, vector<64x256xf32> -> vector<64x256xf32>
    %30 = arith.subf %13, %29 : vector<64x256xf32>
    %31 = arith.mulf %30, %30 : vector<64x256xf32>
    %cst_21 = arith.constant dense<0.000000e+00> : vector<64x32xf32>
    %32 = tpu.matmul %31, %0, %cst_21 {dimension_numbers = #tpu.dot_dimension_numbers<[1], [0], [0], [1], [0, 0, 1, 1], [], []>} : vector<64x256xf32>, vector<256x32xf32>, vector<64x32xf32> -> vector<64x32xf32>
    %cst_22 = arith.constant 1.250000e-01 : f32
    %33 = vector.broadcast %cst_22 : f32 to vector<64x32xf32>
    %34 = arith.mulf %32, %33 : vector<64x32xf32>
    %cst_23 = arith.constant 9.99999974E-6 : f32
    %35 = vector.broadcast %cst_23 : f32 to vector<64x32xf32>
    %36 = arith.addf %34, %35 : vector<64x32xf32>
    %37 = math.rsqrt %36 : vector<64x32xf32>
    %cst_24 = arith.constant dense<0.000000e+00> : vector<64x256xf32>
    %38 = tpu.matmul %37, %1, %cst_24 {dimension_numbers = #tpu.dot_dimension_numbers<[1], [0], [0], [1], [0, 0, 1, 1], [], []>} : vector<64x32xf32>, vector<32x256xf32>, vector<64x256xf32> -> vector<64x256xf32>
    %39 = vector.broadcast %19 : vector<1x256xf32> to vector<64x256xf32>
    %40 = arith.mulf %38, %39 : vector<64x256xf32>
    %41 = arith.mulf %30, %40 : vector<64x256xf32>
    %42 = vector.broadcast %22 : vector<1x256xf32> to vector<64x256xf32>
    %43 = arith.addf %41, %42 : vector<64x256xf32>
    %44 = arith.truncf %43 : vector<64x256xf32> to vector<64x256xbf16>
    %cst_25 = arith.constant dense<0.000000e+00> : vector<64x256xf32>
    %45 = tpu.matmul %44, %16, %cst_25 {dimension_numbers = #tpu.dot_dimension_numbers<[1], [0], [0], [1], [0, 0, 1, 1], [], []>} : vector<64x256xbf16>, vector<256x256xbf16>, vector<64x256xf32> -> vector<64x256xf32>
    %46 = vector.broadcast %25 : vector<1x256xf32> to vector<64x256xf32>
    %47 = arith.addf %45, %46 : vector<64x256xf32>
    %48 = arith.negf %47 : vector<64x256xf32>
    %49 = math.exp %48 : vector<64x256xf32>
    %cst_26 = arith.constant 1.000000e+00 : f32
    %50 = vector.broadcast %cst_26 : f32 to vector<64x256xf32>
    %51 = arith.addf %50, %49 : vector<64x256xf32>
    %52 = arith.divf %50, %51 : vector<64x256xf32>
    %53 = arith.mulf %47, %52 : vector<64x256xf32>
    %54 = arith.addf %13, %53 : vector<64x256xf32>
    %c1_i32 = arith.constant 1 : i32
    %55 = arith.index_cast %c1_i32 : i32 to index
    %c0_27 = arith.constant 0 : index
    %c0_28 = arith.constant 0 : index
    %56 = vector.load %arg8[%55, %c0_27, %c0_28] : memref<3x256x256xbf16, #tpu.memory_space<vmem>>, vector<1x256x256xbf16>
    %57 = vector.shape_cast %56 : vector<1x256x256xbf16> to vector<256x256xbf16>
    %58 = arith.index_cast %c1_i32 : i32 to index
    %c0_29 = arith.constant 0 : index
    %c0_30 = arith.constant 0 : index
    %59 = vector.load %arg6[%58, %c0_29, %c0_30] : memref<3x1x256xf32, #tpu.memory_space<vmem>>, vector<1x1x256xf32>
    %60 = vector.shape_cast %59 : vector<1x1x256xf32> to vector<1x256xf32>
    %61 = arith.index_cast %c1_i32 : i32 to index
    %c0_31 = arith.constant 0 : index
    %c0_32 = arith.constant 0 : index
    %62 = vector.load %arg7[%61, %c0_31, %c0_32] : memref<3x1x256xf32, #tpu.memory_space<vmem>>, vector<1x1x256xf32>
    %63 = vector.shape_cast %62 : vector<1x1x256xf32> to vector<1x256xf32>
    %64 = arith.index_cast %c1_i32 : i32 to index
    %c0_33 = arith.constant 0 : index
    %c0_34 = arith.constant 0 : index
    %65 = vector.load %arg9[%64, %c0_33, %c0_34] : memref<3x1x256xf32, #tpu.memory_space<vmem>>, vector<1x1x256xf32>
    %66 = vector.shape_cast %65 : vector<1x1x256xf32> to vector<1x256xf32>
    %cst_35 = arith.constant dense<0.000000e+00> : vector<64x32xf32>
    %67 = tpu.matmul %54, %0, %cst_35 {dimension_numbers = #tpu.dot_dimension_numbers<[1], [0], [0], [1], [0, 0, 1, 1], [], []>} : vector<64x256xf32>, vector<256x32xf32>, vector<64x32xf32> -> vector<64x32xf32>
    %cst_36 = arith.constant 1.250000e-01 : f32
    %68 = vector.broadcast %cst_36 : f32 to vector<64x32xf32>
    %69 = arith.mulf %67, %68 : vector<64x32xf32>
    %cst_37 = arith.constant dense<0.000000e+00> : vector<64x256xf32>
    %70 = tpu.matmul %69, %1, %cst_37 {dimension_numbers = #tpu.dot_dimension_numbers<[1], [0], [0], [1], [0, 0, 1, 1], [], []>} : vector<64x32xf32>, vector<32x256xf32>, vector<64x256xf32> -> vector<64x256xf32>
    %71 = arith.subf %54, %70 : vector<64x256xf32>
    %72 = arith.mulf %71, %71 : vector<64x256xf32>
    %cst_38 = arith.constant dense<0.000000e+00> : vector<64x32xf32>
    %73 = tpu.matmul %72, %0, %cst_38 {dimension_numbers = #tpu.dot_dimension_numbers<[1], [0], [0], [1], [0, 0, 1, 1], [], []>} : vector<64x256xf32>, vector<256x32xf32>, vector<64x32xf32> -> vector<64x32xf32>
    %cst_39 = arith.constant 1.250000e-01 : f32
    %74 = vector.broadcast %cst_39 : f32 to vector<64x32xf32>
    %75 = arith.mulf %73, %74 : vector<64x32xf32>
    %cst_40 = arith.constant 9.99999974E-6 : f32
    %76 = vector.broadcast %cst_40 : f32 to vector<64x32xf32>
    %77 = arith.addf %75, %76 : vector<64x32xf32>
    %78 = math.rsqrt %77 : vector<64x32xf32>
    %cst_41 = arith.constant dense<0.000000e+00> : vector<64x256xf32>
    %79 = tpu.matmul %78, %1, %cst_41 {dimension_numbers = #tpu.dot_dimension_numbers<[1], [0], [0], [1], [0, 0, 1, 1], [], []>} : vector<64x32xf32>, vector<32x256xf32>, vector<64x256xf32> -> vector<64x256xf32>
    %80 = vector.broadcast %60 : vector<1x256xf32> to vector<64x256xf32>
    %81 = arith.mulf %79, %80 : vector<64x256xf32>
    %82 = arith.mulf %71, %81 : vector<64x256xf32>
    %83 = vector.broadcast %63 : vector<1x256xf32> to vector<64x256xf32>
    %84 = arith.addf %82, %83 : vector<64x256xf32>
    %85 = arith.truncf %84 : vector<64x256xf32> to vector<64x256xbf16>
    %cst_42 = arith.constant dense<0.000000e+00> : vector<64x256xf32>
    %86 = tpu.matmul %85, %57, %cst_42 {dimension_numbers = #tpu.dot_dimension_numbers<[1], [0], [0], [1], [0, 0, 1, 1], [], []>} : vector<64x256xbf16>, vector<256x256xbf16>, vector<64x256xf32> -> vector<64x256xf32>
    %87 = vector.broadcast %66 : vector<1x256xf32> to vector<64x256xf32>
    %88 = arith.addf %86, %87 : vector<64x256xf32>
    %89 = arith.negf %88 : vector<64x256xf32>
    %90 = math.exp %89 : vector<64x256xf32>
    %cst_43 = arith.constant 1.000000e+00 : f32
    %91 = vector.broadcast %cst_43 : f32 to vector<64x256xf32>
    %92 = arith.addf %91, %90 : vector<64x256xf32>
    %93 = arith.divf %91, %92 : vector<64x256xf32>
    %94 = arith.mulf %88, %93 : vector<64x256xf32>
    %95 = arith.addf %54, %94 : vector<64x256xf32>
    %c2_i32 = arith.constant 2 : i32
    %96 = arith.index_cast %c2_i32 : i32 to index
    %c0_44 = arith.constant 0 : index
    %c0_45 = arith.constant 0 : index
    %97 = vector.load %arg8[%96, %c0_44, %c0_45] : memref<3x256x256xbf16, #tpu.memory_space<vmem>>, vector<1x256x256xbf16>
    %98 = vector.shape_cast %97 : vector<1x256x256xbf16> to vector<256x256xbf16>
    %99 = arith.index_cast %c2_i32 : i32 to index
    %c0_46 = arith.constant 0 : index
    %c0_47 = arith.constant 0 : index
    %100 = vector.load %arg6[%99, %c0_46, %c0_47] : memref<3x1x256xf32, #tpu.memory_space<vmem>>, vector<1x1x256xf32>
    %101 = vector.shape_cast %100 : vector<1x1x256xf32> to vector<1x256xf32>
    %102 = arith.index_cast %c2_i32 : i32 to index
    %c0_48 = arith.constant 0 : index
    %c0_49 = arith.constant 0 : index
    %103 = vector.load %arg7[%102, %c0_48, %c0_49] : memref<3x1x256xf32, #tpu.memory_space<vmem>>, vector<1x1x256xf32>
    %104 = vector.shape_cast %103 : vector<1x1x256xf32> to vector<1x256xf32>
    %105 = arith.index_cast %c2_i32 : i32 to index
    %c0_50 = arith.constant 0 : index
    %c0_51 = arith.constant 0 : index
    %106 = vector.load %arg9[%105, %c0_50, %c0_51] : memref<3x1x256xf32, #tpu.memory_space<vmem>>, vector<1x1x256xf32>
    %107 = vector.shape_cast %106 : vector<1x1x256xf32> to vector<1x256xf32>
    %cst_52 = arith.constant dense<0.000000e+00> : vector<64x32xf32>
    %108 = tpu.matmul %95, %0, %cst_52 {dimension_numbers = #tpu.dot_dimension_numbers<[1], [0], [0], [1], [0, 0, 1, 1], [], []>} : vector<64x256xf32>, vector<256x32xf32>, vector<64x32xf32> -> vector<64x32xf32>
    %cst_53 = arith.constant 1.250000e-01 : f32
    %109 = vector.broadcast %cst_53 : f32 to vector<64x32xf32>
    %110 = arith.mulf %108, %109 : vector<64x32xf32>
    %cst_54 = arith.constant dense<0.000000e+00> : vector<64x256xf32>
    %111 = tpu.matmul %110, %1, %cst_54 {dimension_numbers = #tpu.dot_dimension_numbers<[1], [0], [0], [1], [0, 0, 1, 1], [], []>} : vector<64x32xf32>, vector<32x256xf32>, vector<64x256xf32> -> vector<64x256xf32>
    %112 = arith.subf %95, %111 : vector<64x256xf32>
    %113 = arith.mulf %112, %112 : vector<64x256xf32>
    %cst_55 = arith.constant dense<0.000000e+00> : vector<64x32xf32>
    %114 = tpu.matmul %113, %0, %cst_55 {dimension_numbers = #tpu.dot_dimension_numbers<[1], [0], [0], [1], [0, 0, 1, 1], [], []>} : vector<64x256xf32>, vector<256x32xf32>, vector<64x32xf32> -> vector<64x32xf32>
    %cst_56 = arith.constant 1.250000e-01 : f32
    %115 = vector.broadcast %cst_56 : f32 to vector<64x32xf32>
    %116 = arith.mulf %114, %115 : vector<64x32xf32>
    %cst_57 = arith.constant 9.99999974E-6 : f32
    %117 = vector.broadcast %cst_57 : f32 to vector<64x32xf32>
    %118 = arith.addf %116, %117 : vector<64x32xf32>
    %119 = math.rsqrt %118 : vector<64x32xf32>
    %cst_58 = arith.constant dense<0.000000e+00> : vector<64x256xf32>
    %120 = tpu.matmul %119, %1, %cst_58 {dimension_numbers = #tpu.dot_dimension_numbers<[1], [0], [0], [1], [0, 0, 1, 1], [], []>} : vector<64x32xf32>, vector<32x256xf32>, vector<64x256xf32> -> vector<64x256xf32>
    %121 = vector.broadcast %101 : vector<1x256xf32> to vector<64x256xf32>
    %122 = arith.mulf %120, %121 : vector<64x256xf32>
    %123 = arith.mulf %112, %122 : vector<64x256xf32>
    %124 = vector.broadcast %104 : vector<1x256xf32> to vector<64x256xf32>
    %125 = arith.addf %123, %124 : vector<64x256xf32>
    %126 = arith.truncf %125 : vector<64x256xf32> to vector<64x256xbf16>
    %cst_59 = arith.constant dense<0.000000e+00> : vector<64x256xf32>
    %127 = tpu.matmul %126, %98, %cst_59 {dimension_numbers = #tpu.dot_dimension_numbers<[1], [0], [0], [1], [0, 0, 1, 1], [], []>} : vector<64x256xbf16>, vector<256x256xbf16>, vector<64x256xf32> -> vector<64x256xf32>
    %128 = vector.broadcast %107 : vector<1x256xf32> to vector<64x256xf32>
    %129 = arith.addf %127, %128 : vector<64x256xf32>
    %130 = arith.negf %129 : vector<64x256xf32>
    %131 = math.exp %130 : vector<64x256xf32>
    %cst_60 = arith.constant 1.000000e+00 : f32
    %132 = vector.broadcast %cst_60 : f32 to vector<64x256xf32>
    %133 = arith.addf %132, %131 : vector<64x256xf32>
    %134 = arith.divf %132, %133 : vector<64x256xf32>
    %135 = arith.mulf %129, %134 : vector<64x256xf32>
    %136 = arith.addf %95, %135 : vector<64x256xf32>
    %c3_i32 = arith.constant 3 : i32
    %137 = arith.truncf %136 : vector<64x256xf32> to vector<64x256xbf16>
    %c0_61 = arith.constant 0 : index
    %c0_62 = arith.constant 0 : index
    %138 = vector.load %arg10[%c0_61, %c0_62] : memref<256x256xbf16, #tpu.memory_space<vmem>>, vector<256x256xbf16>
    %cst_63 = arith.constant dense<0.000000e+00> : vector<64x256xf32>
    %139 = tpu.matmul %137, %138, %cst_63 {dimension_numbers = #tpu.dot_dimension_numbers<[1], [0], [0], [1], [0, 0, 1, 1], [], []>} : vector<64x256xbf16>, vector<256x256xbf16>, vector<64x256xf32> -> vector<64x256xf32>
    %c0_64 = arith.constant 0 : index
    %c0_65 = arith.constant 0 : index
    %140 = vector.load %arg11[%c0_64, %c0_65] : memref<1x256xf32, #tpu.memory_space<vmem>>, vector<1x256xf32>
    %141 = vector.broadcast %140 : vector<1x256xf32> to vector<64x256xf32>
    %142 = arith.addf %139, %141 : vector<64x256xf32>
    %c0_66 = arith.constant 0 : index
    %c0_67 = arith.constant 0 : index
    %143 = vector.load %arg12[%c0_66, %c0_67] : memref<64x256xf32, #tpu.memory_space<vmem>>, vector<64x256xf32>
    tpu.vector_store %arg12[%c0_66, %c0_67], %142 {strides = array<i32>} : memref<64x256xf32, #tpu.memory_space<vmem>>, vector<64x256xf32>,
    return
  }
  func.func @transform_0(%arg0: i32) -> (i32, i32) {
    %c0_i32 = arith.constant 0 : i32
    %c0_i32_0 = arith.constant 0 : i32
    return %arg0, %c0_i32 : i32, i32
  }
  func.func @transform_1(%arg0: i32) -> (i32, i32) {
    %c0_i32 = arith.constant 0 : i32
    %c0_i32_0 = arith.constant 0 : i32
    %c0_i32_1 = arith.constant 0 : i32
    return %c0_i32, %c0_i32_0 : i32, i32
  }
  func.func @transform_2(%arg0: i32) -> (i32, i32) {
    %c0_i32 = arith.constant 0 : i32
    %c0_i32_0 = arith.constant 0 : i32
    %c0_i32_1 = arith.constant 0 : i32
    return %c0_i32, %c0_i32_0 : i32, i32
  }
  func.func @transform_3(%arg0: i32) -> (i32, i32) {
    %c0_i32 = arith.constant 0 : i32
    %c0_i32_0 = arith.constant 0 : i32
    %c0_i32_1 = arith.constant 0 : i32
    return %c0_i32, %c0_i32_0 : i32, i32
  }
  func.func @transform_4(%arg0: i32) -> (i32, i32) {
    %c0_i32 = arith.constant 0 : i32
    %c0_i32_0 = arith.constant 0 : i32
    %c0_i32_1 = arith.constant 0 : i32
    return %c0_i32, %c0_i32_0 : i32, i32
  }
  func.func @transform_5(%arg0: i32) -> (i32, i32, i32) {
    %c0_i32 = arith.constant 0 : i32
    %c0_i32_0 = arith.constant 0 : i32
    %c0_i32_1 = arith.constant 0 : i32
    %c0_i32_2 = arith.constant 0 : i32
    return %c0_i32, %c0_i32_0, %c0_i32_1 : i32, i32, i32
  }
  func.func @transform_6(%arg0: i32) -> (i32, i32, i32) {
    %c0_i32 = arith.constant 0 : i32
    %c0_i32_0 = arith.constant 0 : i32
    %c0_i32_1 = arith.constant 0 : i32
    %c0_i32_2 = arith.constant 0 : i32
    return %c0_i32, %c0_i32_0, %c0_i32_1 : i32, i32, i32
  }
  func.func @transform_7(%arg0: i32) -> (i32, i32, i32) {
    %c0_i32 = arith.constant 0 : i32
    %c0_i32_0 = arith.constant 0 : i32
    %c0_i32_1 = arith.constant 0 : i32
    %c0_i32_2 = arith.constant 0 : i32
    return %c0_i32, %c0_i32_0, %c0_i32_1 : i32, i32, i32
  }
  func.func @transform_8(%arg0: i32) -> (i32, i32, i32) {
    %c0_i32 = arith.constant 0 : i32
    %c0_i32_0 = arith.constant 0 : i32
    %c0_i32_1 = arith.constant 0 : i32
    %c0_i32_2 = arith.constant 0 : i32
    return %c0_i32, %c0_i32_0, %c0_i32_1 : i32, i32, i32
  }
  func.func @transform_9(%arg0: i32) -> (i32, i32) {
    %c0_i32 = arith.constant 0 : i32
    %c0_i32_0 = arith.constant 0 : i32
    %c0_i32_1 = arith.constant 0 : i32
    return %c0_i32, %c0_i32_0 : i32, i32
  }
  func.func @transform_10(%arg0: i32) -> (i32, i32) {
    %c0_i32 = arith.constant 0 : i32
    %c0_i32_0 = arith.constant 0 : i32
    %c0_i32_1 = arith.constant 0 : i32
    return %c0_i32, %c0_i32_0 : i32, i32
  }
  func.func @transform_11(%arg0: i32) -> (i32, i32) {
    %c0_i32 = arith.constant 0 : i32
    %c0_i32_0 = arith.constant 0 : i32
    return %arg0, %c0_i32 : i32, i32
  }
}

</mosaic_0001>

<bundles_post_ra>
// kernel: tpu_custom_call.1
= control target key start
LH: loop header
LB: loop body
LE: loop exit
PB: predicated region body
PF: predicated region fallthrough
CT: control target
= control target key end

     0   :  { %8 = vsyncpa [#allocation3], 0  ;;  %s693_s0 = inlined_call_operand.hbm [shape: f32[16,128], index: 0, kind: input, shape index: {}]   ;;  %s694_s1 = inlined_call_operand.hbm [shape: f32[8,128], index: 1, kind: input, shape index: {}]   ;;  %s695_s2 = inlined_call_operand.vmem [shape: f32[2,1,128], index: 2, kind: input, shape index: {}]   ;;  %s696_s3 = inlined_call_operand.hbm [shape: f32[16,128], index: 3, kind: output, shape index: {}]  }
   0x1   :  { %10 = vsyncpa [#allocation3 + $0x1], 0 }
   0x2   :  { %11 = vsyncpa [#allocation6], 0 }
   0x3   :  { %12 = vsyncpa [#allocation4], 0 }
   0x4   :  { %14 = vsyncpa [#allocation4 + $0x1], 0  ;;  %s524_s12 = smov 0   ;;  %s526_s13 = smov 0  }
   0x5   :  { %s528_s14 = smov 0   ;;  %s530_s15 = smov 0  }
   0x6 LB: > { %s545_s16 = sadd.s32 4294967295, %s499_s15   ;;  %s305_s17 = sadd.s32 4294967294, %s499_s15   ;;  %s499_s15 = sphi %s530_s15, %s719_s15   ;;  %s495_s14 = sphi %s528_s14, %s718_s14   ;;  %s491_s13 = sphi %s526_s13, %s717_s13   ;;  %s487_s12 = sphi %s524_s12, %s716_s12  }
   0x7   : > { %p40_p0 = scmp.ne.s32.totalorder %s491_s13, %s487_s12  ;;  %p697_p1 = scmp.eq.s32.totalorder %s545_s16, 0 }
   0x8   : > { %p112_p3 = scmp.eq.s32.totalorder %s305_s17, 1  ;;  %p306_p5 = scmp.ge.s32.totalorder %s499_s15, 1 }
   0x9   : > { %p554_p4 = por %p697_p1, %p40_p0  ;;  %p119_p7 = scmp.lt.s32.totalorder %s499_s15, 3 }
   0xa   : > { %p559_p6 = por %p112_p3, %p40_p0  ;;  %s501_s21 = smov [#allocation5]  }
   0xb   : > { %s701_s18 = scalar_select %p554_p4, 1, 0 }
   0xc   : > { %s702_s19 = scalar_select %p559_p6, 1, 0 }
   0xd   : > { %p564_p8 = pnand %p306_p5, %p119_p7  ;;  %s132_s22 = sshll.u32 %s501_s21, 4  ;;  %s133_s22 = int_to_ptr.vmem [resolvable:$true] %s132_s22 }
   0xe   : > { %s572_s23 = sadd.s32 1, %s499_s15   ;;  %s27_s27 = sadd.s32 1, %s495_s14 }
   0xf   : > { %s703_s20 = scalar_select %p564_p8, 1, 0 }
  0x10   : > { %p328_p10 = pneg %p564_p8  ;;  %s24_s25 = ssub.s32 %s499_s15, %s572_s23 }
  0x11   : > { %p582_p12 = scmp.eq.s32.totalorder %s24_s25, 0  ;;  %p34_p13 = scmp.ne.s32.totalorder %s495_s14, %s491_s13 }
  0x12   : > { %p576_p11 = pnand %p328_p10, %p697_p1  ;;  %s388_s28 = scalar_lea.vmem %s133_s22, 128 }
  0x13   : > { %p389_p3 = scmp.ne.s32.totalorder %s133_s22, %s388_s28  ;;  %p396_p9 = scmp.lt.s32.totalorder %s133_s22, %s133_s22 }
  0x14   : > { %p379_p0 = pneg %p576_p11  ;;  %p397_p2 = scmp.lt.s32.totalorder %s388_s28, %s388_s28 }
  0x16   : > { %p391_p5 = pnand %p389_p3, %p379_p0  ;;  %p398_p10 = por %p397_p2, %p396_p9 }
  0x18   : > { %p392_p7 = pneg %p391_p5 }
  0x1a   : > { %p399_p1 = pnand %p398_p10, %p392_p7 }
  0x1c   : > { %402 = shalt.err (!%p399_p1)
}
  0x1d   : > { %331 = dma.hbm_to_vmem [thread:$0]  (!%p576_p11), %s694_s1, 128, %s133_s22, [#allocation6]  }
  0x1e   : > { %s599_s4 = scalar_select %p582_p12, %s495_s14, %s27_s27  }
  0x1f   : > { %p35_p1 = scmp.eq.s32.totalorder %s499_s15, 0  ;;  %p706_p2 = scmp.eq.s32.totalorder %s545_s16, 1 }
  0x20   : > { %p341_p0 = scmp.lt.s32.totalorder %s499_s15, 2  ;;  %s146_s6 = sand.u32 1, %s495_s14  }
  0x21   : > { %p607_p9 = por %p706_p2, %p34_p13  ;;  %p36_p3 = por %p35_p1, %p34_p13 }
  0x22   : > { %s309_s7 = sshll.u32 %s146_s6, 3  ;;  %s310_s8 = sshll.u32 %s499_s15, 7 }
  0x23   : > { %s707_s5 = scalar_select %p607_p9, 1, 0 }
  0x24   : > { %s620_s11 = scalar_lea.hbm %s693_s0, %s310_s8  ;;  %s150_s17 = scalar_lea.vmem [#allocation2], %s309_s7 }
  0x25   : > { %s157_s21 = sshll.u32 %s150_s17, 4  ;;  %p622_p11 = pnand %p341_p0, %p36_p3  ;;  %s158_s21 = int_to_ptr.vmem [resolvable:$true] %s157_s21 }
  0x26   : > { %s147_s24 = scalar_lea.sflag [#allocation3], %s146_s6  ;;  %s403_s25 = scalar_lea.hbm %s620_s11, 128 }
  0x27   : > { %p404_p12 = scmp.ne.s32.totalorder %s620_s11, %s403_s25  ;;  %p405_p13 = pneg %p622_p11 }
  0x28   : > { %s408_s28 = scalar_lea.hbm %s693_s0, 256  ;;  %p409_p10 = scmp.lt.s32.totalorder %s620_s11, %s693_s0 }
  0x29   : > { %p406_p5 = pnand %p405_p13, %p404_p12  ;;  %p410_p1 = scmp.lt.s32.totalorder %s408_s28, %s403_s25 }
  0x2b   : > { %p407_p7 = pneg %p406_p5  ;;  %p411_p2 = por %p410_p1, %p409_p10 }
  0x2d   : > { %p412_p0 = pnand %p411_p2, %p407_p7 }
  0x2f   : > { %415 = shalt.err (!%p412_p0)
}
  0x30   : > { %s416_s7 = scalar_lea.vmem %s158_s21, 128  ;;  %s502_s6 = smov [#allocation2]  }
  0x31   : > { %p417_p3 = scmp.ne.s32.totalorder %s158_s21, %s416_s7  ;;  %s421_s8 = sshll.u32 %s502_s6, 4  ;;  %s422_s8 = int_to_ptr.vmem [resolvable:$false] %s421_s8 }
  0x32   : > { %s423_s9 = scalar_lea.vmem %s422_s8, 256  ;;  %p424_p12 = scmp.lt.s32.totalorder %s158_s21, %s422_s8 }
  0x33   : > { %p419_p6 = pnand %p417_p3, %p405_p13  ;;  %p425_p5 = scmp.lt.s32.totalorder %s423_s9, %s416_s7 }
  0x35   : > { %p420_p9 = pneg %p419_p6  ;;  %p426_p4 = por %p425_p5, %p424_p12 }
  0x37   : > { %p427_p8 = pnand %p426_p4, %p420_p9 }
  0x39   : > { %430 = shalt.err (!%p427_p8)
}
  0x3a   : > { %335 = dma.hbm_to_vmem [thread:$0]  (!%p622_p11), %s620_s11, 128, %s158_s21, %s147_s24  }
  0x3b   : > { %p709_p7 = scmp.ne.s32.totalorder %s703_s20, 0 }
  0x3c   : > { %s643_s10 = sand.u32 (!%p709_p7), 1, %s491_s13   ;;  %p710_p6 = scmp.ne.s32.totalorder (!%p709_p7), %s701_s18, 0 }
  0x3d   : > { %166 = sbr.rel (%p709_p7) target bundleno = 95 (0x5f), region = 32  ;;  %s312_s17 = sshll.u32 (!%p709_p7), %s643_s10, 3 }
  0x3e   : > { %s169_s25 = scalar_lea.sflag (!%p709_p7), [#allocation3], %s643_s10  ;;  %s172_s26 = scalar_lea.vmem (!%p709_p7), [#allocation2], %s312_s17 }
  0x42   : > { %474 = dma.done.wait (%p710_p6), %s169_s25, 128  }
  0x43   : > { %476 = vsyncadd (%p710_p6), %s169_s25, 4294967168  ;;  %p711_p4 = scmp.eq.s32.totalorder %s545_s16, 0 }
  0x45   : > { %478 = dma.done.wait (%p711_p4), [#allocation6], 128   ;;  %p712_p8 = pmov %p711_p4 }
  0x46   : > { %v199_v0 = vld [vmem:[%s172_s26] sm:$0xff]  ;;  %v200_v1 = vld [vmem:[#allocation5] sm:$0xff]  ;;  %s198_s21 = scalar_lea.vmem [#allocation7], %s312_s17  ;;  %s317_s24 = sshll.u32 %s545_s16, 7 }
  0x47   : > { %480 = vsyncadd (%p712_p8), [#allocation6], 4294967168  ;;  %v315_v2 = vld [vmem:[%s695_s2] ss:$0 sm:$0xff]  ;;  %s225_s22 = sshll.u32 %s198_s21, 4  ;;  %v201_v3 = vadd.f32 %v200_v1, %v199_v0  ;;  %s223_s28 = scalar_lea.hbm %s696_s3, %s317_s24  ;;  %s226_s22 = int_to_ptr.vmem [resolvable:$true] %s225_s22 }
  0x48   : > { %s212_s29 = scalar_lea.sflag [#allocation4], %s643_s10  ;;  %s431_s30 = scalar_lea.vmem %s226_s22, 128 }
  0x49   : > { %v209_v4 = vadd.f32 %v315_v2, %v201_v3  ;;  %p432_p9 = scmp.ne.s32.totalorder %s226_s22, %s431_s30  ;;  %p713_p11 = scmp.ne.s32.totalorder %s707_s5, 0 }
  0x4a   : > { %s503_s7 = smov [#allocation7]  }
  0x4b   : > { %210 = vst [vmem:[%s198_s21] sm:$0xff] %v209_v4  ;;  %p433_p13 = pnand %p432_p9, %p713_p11  ;;  %s435_s6 = sshll.u32 %s503_s7, 4  ;;  %s436_s6 = int_to_ptr.vmem [resolvable:$false] %s435_s6 }
  0x4c   : > { %s437_s8 = scalar_lea.vmem %s436_s6, 256  ;;  %p438_p1 = scmp.lt.s32.totalorder %s226_s22, %s436_s6 }
  0x4d   : > { %p434_p10 = pneg %p433_p13  ;;  %p439_p2 = scmp.lt.s32.totalorder %s437_s8, %s431_s30 }
  0x4f   : > { %p440_p0 = por %p439_p2, %p438_p1 }
  0x51   : > { %p441_p3 = pnand %p440_p0, %p434_p10 }
  0x53   : > { %444 = shalt.err (!%p441_p3)
}
  0x54   : > { %s445_s16 = scalar_lea.hbm %s223_s28, 128  ;;  %s449_s17 = scalar_lea.hbm %s696_s3, 256 }
  0x55   : > { %p446_p12 = scmp.ne.s32.totalorder %s223_s28, %s445_s16  ;;  %p450_p6 = scmp.lt.s32.totalorder %s223_s28, %s696_s3 }
  0x56   : > { %p451_p4 = scmp.lt.s32.totalorder %s449_s17, %s445_s16 }
  0x57   : > { %p447_p5 = pnand %p446_p12, %p713_p11 }
  0x58   : > { %p452_p8 = por %p451_p4, %p450_p6 }
  0x59   : > { %p448_p7 = pneg %p447_p5 }
  0x5b   : > { %p453_p9 = pnand %p452_p8, %p448_p7 }
  0x5d   : > { %456 = shalt.err (!%p453_p9)
}
  0x5e   : > { %326 = dma.vmem_to_hbm [thread:$0]  (%p713_p11), %s226_s22, 128, %s223_s28, %s212_s29  }
  0x5f PF: > { %s237_s20 = sand.u32 1, %s487_s12   ;;  %p714_p13 = scmp.ne.s32.totalorder %s702_s19, 0 }
  0x60   : > { %p715_p10 = scmp.ge.s32.totalorder %s499_s15, 2  ;;  %s238_s11 = scalar_lea.sflag [#allocation4], %s237_s20 }
  0x62   : > { %p337_p1 = pnand %p715_p10, %p714_p13 }
  0x64   : > { %p338_p2 = pneg %p337_p1 }
  0x66   : > { %482 = dma.done.wait (%p338_p2), %s238_s11, 128  }
  0x67   : > { %484 = vsyncadd (%p338_p2), %s238_s11, 4294967168  ;;  %p17_p0 = scmp.ge.s32.totalorder %s572_s23, 4   ;;  %s716_s12 = smov %s491_s13 }
  0x68   : > { %s717_s13 = smov %s495_s14  ;;  %s718_s14 = smov %s599_s4 }
  0x69   : > { %s719_s15 = smov %s572_s23  ;;  %19 = sbr.rel (!%p17_p0) target bundleno = 6 (0x6), region = 81 }
  0x6e   :  { %243 = vsyncpa [#allocation3], 1 }
  0x6f   :  { %245 = vsyncpa [#allocation3 + $0x1], 1 }
  0x70   :  { %246 = vsyncpa [#allocation6], 1 }
  0x71   :  { %247 = vsyncpa [#allocation4], 1 }
  0x72   :  { %249 = vsyncpa [#allocation4 + $0x1], 1 }

// kernel: tpu_custom_call.1
= control target key start
LH: loop header
LB: loop body
LE: loop exit
PB: predicated region body
PF: predicated region fallthrough
CT: control target
= control target key end

     0   :  { %16 = vsyncpa [#allocation3], 0  ;;  %s7898_s0 = inlined_call_operand.hbm [shape: bf16[64,512], index: 0, kind: input, shape index: {}]   ;;  %s7899_s1 = inlined_call_operand.hbm [shape: bf16[512,256], index: 1, kind: input, shape index: {}]   ;;  %s7900_s2 = inlined_call_operand.vmem [shape: f32[1,256], index: 2, kind: input, shape index: {}]   ;;  %s7901_s3 = inlined_call_operand.vmem [shape: f32[256,32], index: 3, kind: input, shape index: {}]   ;;  %s7902_s4 = inlined_call_operand.vmem [shape: f32[32,256], index: 4, kind: input, shape index: {}]   ;;  %s7903_s5 = inlined_call_operand.vmem [shape: f32[3,1,256], index: 5, kind: input, shape index: {}]   ;;  %s7904_s6 = inlined_call_operand.vmem [shape: f32[3,1,256], index: 6, kind: input, shape index: {}]   ;;  %s7905_s7 = inlined_call_operand.hbm [shape: bf16[3,256,256], index: 7, kind: input, shape index: {}]   ;;  %s7906_s8 = inlined_call_operand.hbm [shape: f32[3,1,256], index: 8, kind: input, shape index: {}]   ;;  %s7907_s9 = inlined_call_operand.vmem [shape: bf16[256,256], index: 9, kind: input, shape index: {}]   ;;  %s7908_s10 = inlined_call_operand.vmem [shape: f32[1,256], index: 10, kind: input, shape index: {}]   ;;  %s7909_s11 = inlined_call_operand.hbm [shape: f32[64,256], index: 11, kind: output, shape index: {}]  }
   0x1   :  { %17 = vsyncpa [#allocation6], 0 }
   0x2   :  { %18 = vsyncpa [#allocation9], 0 }
   0x3   :  { %19 = vsyncpa [#allocation4], 0  ;;  %s5788_s17 = smov [#allocation5]  }
   0x4   :  { %s37_s18 = sshll.u32 %s5788_s17, 4  ;;  %s38_s18 = int_to_ptr.vmem [resolvable:$true] %s37_s18 }
   0x5   :  { %s5688_s19 = scalar_lea.vmem %s38_s18, 8192  ;;  %p5693_p1 = scmp.lt.s32.totalorder %s38_s18, %s38_s18 }
   0x6   :  { %p5689_p0 = scmp.ne.s32.totalorder %s38_s18, %s5688_s19  ;;  %p5694_p2 = scmp.lt.s32.totalorder %s5688_s19, %s5688_s19 }
   0x8   :  { %p5695_p3 = por %p5694_p2, %p5693_p1 }
   0xa   :  { %p5696_p4 = pnand %p5695_p3, %p5689_p0 }
   0xc   :  { %5699 = shalt.err (!%p5696_p4)
}
   0xd   :  { %s5789_s20 = smov 128   ;;  %s5790_s21 = smov 8  }
   0xe   :  { %43 = dma.hbm_to_vmem [thread:$0]  %s7899_s1, 8192, %s38_s18, [#allocation6], %s5789_s20, %s5789_s20, %s5790_s21  }
   0xf   :  { %s5791_s24 = smov [#allocation2]  }
  0x10   :  { %s25_s25 = sshll.u32 %s5791_s24, 4  ;;  %s26_s25 = int_to_ptr.vmem [resolvable:$true] %s25_s25 }
  0x11   :  { %s5708_s26 = scalar_lea.vmem %s26_s25, 2048  ;;  %p5713_p6 = scmp.lt.s32.totalorder %s26_s25, %s26_s25 }
  0x12   :  { %p5709_p5 = scmp.ne.s32.totalorder %s26_s25, %s5708_s26  ;;  %p5714_p7 = scmp.lt.s32.totalorder %s5708_s26, %s5708_s26 }
  0x14   :  { %p5715_p8 = por %p5714_p7, %p5713_p6 }
  0x16   :  { %p5716_p9 = pnand %p5715_p8, %p5709_p5 }
  0x18   :  { %5719 = shalt.err (!%p5716_p9)
}
  0x19   :  { %s5792_s27 = smov 256   ;;  %s5793_s28 = smov 16  }
  0x1a   :  { %31 = dma.hbm_to_vmem [thread:$0]  %s7898_s0, 2048, %s26_s25, [#allocation3], %s5792_s27, %s5792_s27, %s5793_s28  }
  0x1b   :  { %s5794_s1 = smov [#allocation7]   ;;  %s5795_s13 = smov [#allocation8]  }
  0x1c   :  { %s59_s12 = sshll.u32 %s5794_s1, 4  ;;  %s71_s14 = sshll.u32 %s5795_s13, 4  ;;  %s60_s12 = int_to_ptr.vmem [resolvable:$true] %s59_s12  ;;  %s72_s14 = int_to_ptr.vmem [resolvable:$true] %s71_s14 }
  0x1d   :  { %s5728_s15 = scalar_lea.vmem %s60_s12, 12288  ;;  %p5733_p11 = scmp.lt.s32.totalorder %s60_s12, %s60_s12 }
  0x1e   :  { %p5729_p10 = scmp.ne.s32.totalorder %s60_s12, %s5728_s15  ;;  %p5734_p12 = scmp.lt.s32.totalorder %s5728_s15, %s5728_s15 }
  0x20   :  { %p5735_p13 = por %p5734_p12, %p5733_p11 }
  0x22   :  { %p5736_p0 = pnand %p5735_p13, %p5729_p10 }
  0x24   :  { %5739 = shalt.err (!%p5736_p0)
}
  0x25   :  { %65 = dma.hbm_to_vmem [thread:$0]  %s7905_s7, 12288, %s60_s12, [#allocation6], %s5789_s20, %s5789_s20, %s5790_s21  }
  0x26   :  { %s5748_s0 = scalar_lea.vmem %s72_s14, 96  ;;  %p5753_p2 = scmp.lt.s32.totalorder %s72_s14, %s72_s14 }
  0x27   :  { %p5749_p1 = scmp.ne.s32.totalorder %s72_s14, %s5748_s0  ;;  %p5754_p3 = scmp.lt.s32.totalorder %s5748_s0, %s5748_s0 }
  0x29   :  { %p5755_p4 = por %p5754_p3, %p5753_p2 }
  0x2b   :  { %p5756_p5 = pnand %p5755_p4, %p5749_p1 }
  0x2d   :  { %5759 = shalt.err (!%p5756_p5)
}
  0x2e   :  { %s5796_s18 = smov 32   ;;  %s5797_s19 = smov 2  }
  0x2f   :  { %77 = dma.hbm_to_vmem [thread:$0]  %s7906_s8, 96, %s72_s14, [#allocation9], %s5796_s18, %s5796_s18, %s5797_s19  }
  0x30   :  { %5780 = dma.done.wait [#allocation3], 2048  }
  0x31   :  { %5781 = vsyncadd [#allocation3], 4294965248 }
  0x32   :  { %5782 = dma.done.wait [#allocation6], 20480  }
  0x33   :  { %5783 = vsyncadd [#allocation6], 4294946816 }
  0x34   :  { %5784 = dma.done.wait [#allocation9], 96  }
  0x35   :  { %5785 = vsyncadd [#allocation9], 4294967200  ;;  %v4984_v0 = vld [vmem:[#allocation5 + $0x74] ss:$8 sps:$4 sm:$0xff]   ;;  %v4988_v2 = vld [vmem:[#allocation5 + $0x70] ss:$8 sps:$4 sm:$0xff]  }
  0x36   :  { %v4986_v1 = vld [vmem:[#allocation5 + $0x174] ss:$8 sps:$4 sm:$0xff]   ;;  %626 = vmatprep.subr.bf16.mxu0 %v4984_v0  ;;  %v4989_v3 = vld [vmem:[#allocation5 + $0x170] ss:$8 sps:$4 sm:$0xff]   ;;  %v4990_v4 = vld [vmem:[#allocation5 + $0x64] ss:$8 sps:$4 sm:$0xff]  }
  0x37   :  { %699 = vmatprep.subr.bf16.mxu1 %v4986_v1  ;;  %627 = vmatpush1.bf16.msra.mxu0 %v4988_v2  ;;  %v4992_v5 = vld [vmem:[#allocation5 + $0x164] ss:$8 sps:$4 sm:$0xff]   ;;  %v4994_v6 = vld [vmem:[#allocation5 + $0x60] ss:$8 sps:$4 sm:$0xff]   ;;  %v4996_v8 = vld [vmem:[#allocation5 + $0x54] ss:$8 sps:$4 sm:$0xff]  }
  0x38   :  { %700 = vmatpush1.bf16.msra.mxu1 %v4989_v3  ;;  %628 = vmatprep.subr.bf16.mxu0 %v4990_v4  ;;  %v4995_v7 = vld [vmem:[#allocation5 + $0x160] ss:$8 sps:$4 sm:$0xff]   ;;  %v4998_v9 = vld [vmem:[#allocation5 + $0x154] ss:$8 sps:$4 sm:$0xff]   ;;  %v5000_v10 = vld [vmem:[#allocation5 + $0x50] ss:$8 sps:$4 sm:$0xff]  }
  0x39   :  { %701 = vmatprep.subr.bf16.mxu1 %v4992_v5  ;;  %v5001_v11 = vld [vmem:[#allocation5 + $0x150] ss:$8 sps:$4 sm:$0xff]   ;;  %v5002_v12 = vld [vmem:[#allocation5 + $0x44] ss:$8 sps:$4 sm:$0xff]   ;;  %v5006_v14 = vld [vmem:[#allocation5 + $0x40] ss:$8 sps:$4 sm:$0xff]  }
  0x3a   :  { %v5004_v13 = vld [vmem:[#allocation5 + $0x144] ss:$8 sps:$4 sm:$0xff]   ;;  %v5007_v15 = vld [vmem:[#allocation5 + $0x140] ss:$8 sps:$4 sm:$0xff]   ;;  %v5008_v16 = vld [vmem:[#allocation5 + $0x34] ss:$8 sps:$4 sm:$0xff]  }
  0x3b   :  { %629 = vmatpush1.bf16.msra.mxu0 %v4994_v6  ;;  %v5010_v17 = vld [vmem:[#allocation5 + $0x134] ss:$8 sps:$4 sm:$0xff]   ;;  %v5012_v18 = vld [vmem:[#allocation5 + $0x30] ss:$8 sps:$4 sm:$0xff]   ;;  %v5014_v20 = vld [vmem:[#allocation5 + $0x24] ss:$8 sps:$4 sm:$0xff]  }
  0x3c   :  { %702 = vmatpush1.bf16.msra.mxu1 %v4995_v7  ;;  %630 = vmatprep.subr.bf16.mxu0 %v4996_v8  ;;  %v5013_v19 = vld [vmem:[#allocation5 + $0x130] ss:$8 sps:$4 sm:$0xff]   ;;  %v5016_v21 = vld [vmem:[#allocation5 + $0x124] ss:$8 sps:$4 sm:$0xff]   ;;  %v5018_v22 = vld [vmem:[#allocation5 + $0x20] ss:$8 sps:$4 sm:$0xff]  }
  0x3d   :  { %703 = vmatprep.subr.bf16.mxu1 %v4998_v9  ;;  %v5019_v23 = vld [vmem:[#allocation5 + $0x120] ss:$8 sps:$4 sm:$0xff]   ;;  %v5020_v24 = vld [vmem:[#allocation5 + $0x14] ss:$8 sps:$4 sm:$0xff]   ;;  %v5024_v26 = vld [vmem:[#allocation5 + $0x10] ss:$8 sps:$4 sm:$0xff]  }
  0x3e   :  { %v5022_v25 = vld [vmem:[#allocation5 + $0x114] ss:$8 sps:$4 sm:$0xff]   ;;  %v5025_v27 = vld [vmem:[#allocation5 + $0x110] ss:$8 sps:$4 sm:$0xff]   ;;  %v5026_v28 = vld [vmem:[#allocation5 + $0x4] ss:$8 sps:$4 sm:$0xff]  }
  0x3f   :  { %631 = vmatpush1.bf16.msra.mxu0 %v5000_v10  ;;  %v5028_v29 = vld [vmem:[#allocation5 + $0x104] ss:$8 sps:$4 sm:$0xff]   ;;  %v5030_v30 = vld [vmem:[#allocation5] ss:$8 sps:$4 sm:$0xff]   ;;  %v5032_v32 = vld [vmem:[#allocation5 + $0xf4] ss:$8 sps:$4 sm:$0xff]  }
  0x40   :  { %704 = vmatpush1.bf16.msra.mxu1 %v5001_v11  ;;  %632 = vmatprep.subr.bf16.mxu0 %v5002_v12  ;;  %v5031_v31 = vld [vmem:[#allocation5 + $0x100] ss:$8 sps:$4 sm:$0xff]   ;;  %v5034_v33 = vld [vmem:[#allocation5 + $0x1f4] ss:$8 sps:$4 sm:$0xff]   ;;  %v5036_v34 = vld [vmem:[#allocation5 + $0xf0] ss:$8 sps:$4 sm:$0xff]  }
  0x41   :  { %705 = vmatprep.subr.bf16.mxu1 %v5004_v13  ;;  %v5037_v35 = vld [vmem:[#allocation5 + $0x1f0] ss:$8 sps:$4 sm:$0xff]   ;;  %v5038_v36 = vld [vmem:[#allocation5 + $0xe4] ss:$8 sps:$4 sm:$0xff]   ;;  %v5042_v38 = vld [vmem:[#allocation5 + $0xe0] ss:$8 sps:$4 sm:$0xff]  }
  0x42   :  { %v5040_v37 = vld [vmem:[#allocation5 + $0x1e4] ss:$8 sps:$4 sm:$0xff]   ;;  %v5043_v39 = vld [vmem:[#allocation5 + $0x1e0] ss:$8 sps:$4 sm:$0xff]   ;;  %v5044_v40 = vld [vmem:[#allocation5 + $0xd4] ss:$8 sps:$4 sm:$0xff]  }
  0x43   :  { %633 = vmatpush1.bf16.msra.mxu0 %v5006_v14  ;;  %v5046_v41 = vld [vmem:[#allocation5 + $0x1d4] ss:$8 sps:$4 sm:$0xff]   ;;  %v5048_v42 = vld [vmem:[#allocation5 + $0xd0] ss:$8 sps:$4 sm:$0xff]   ;;  %v5050_v44 = vld [vmem:[#allocation5 + $0xc4] ss:$8 sps:$4 sm:$0xff]  }
  0x44   :  { %706 = vmatpush1.bf16.msra.mxu1 %v5007_v15  ;;  %634 = vmatprep.subr.bf16.mxu0 %v5008_v16  ;;  %v5049_v43 = vld [vmem:[#allocation5 + $0x1d0] ss:$8 sps:$4 sm:$0xff]   ;;  %v5052_v45 = vld [vmem:[#allocation5 + $0x1c4] ss:$8 sps:$4 sm:$0xff]   ;;  %v5054_v46 = vld [vmem:[#allocation5 + $0xc0] ss:$8 sps:$4 sm:$0xff]  }
  0x45   :  { %707 = vmatprep.subr.bf16.mxu1 %v5010_v17  ;;  %v5055_v47 = vld [vmem:[#allocation5 + $0x1c0] ss:$8 sps:$4 sm:$0xff]   ;;  %v5056_v48 = vld [vmem:[#allocation5 + $0xb4] ss:$8 sps:$4 sm:$0xff]   ;;  %v5060_v52 = vld [vmem:[#allocation5 + $0xb0] ss:$8 sps:$4 sm:$0xff]  }
  0x46   :  { %v5082_v49 = vld [vmem:[#allocation2 + $0x4] ss:$16 sps:$4 sm:$0xff]   ;;  %v5085_v51 = vld [vmem:[#allocation2 + $0xc] ss:$16 sps:$4 sm:$0xff]   ;;  %v5061_v53 = vld [vmem:[#allocation5 + $0x1b0] ss:$8 sps:$4 sm:$0xff]  }
  0x47   :  { %635 = vmatpush1.bf16.msra.mxu0 %v5012_v18  ;;  %v5058_v50 = vld [vmem:[#allocation5 + $0x1b4] ss:$8 sps:$4 sm:$0xff]   ;;  %658 = vmatprep.mubr.bf16.mxu0 %v5082_v49  ;;  %v5062_v54 = vld [vmem:[#allocation5 + $0xa4] ss:$8 sps:$4 sm:$0xff]   ;;  %v5066_v56 = vld [vmem:[#allocation5 + $0xa0] ss:$8 sps:$4 sm:$0xff]  }
  0x48   :  { %708 = vmatpush1.bf16.msra.mxu1 %v5013_v19  ;;  %636 = vmatprep.subr.bf16.mxu0 %v5014_v20  ;;  %v5064_v55 = vld [vmem:[#allocation5 + $0x1a4] ss:$8 sps:$4 sm:$0xff]   ;;  %v5067_v57 = vld [vmem:[#allocation5 + $0x1a0] ss:$8 sps:$4 sm:$0xff]   ;;  %v5068_v58 = vld [vmem:[#allocation5 + $0x94] ss:$8 sps:$4 sm:$0xff]  }
  0x49   :  { %709 = vmatprep.subr.bf16.mxu1 %v5016_v21  ;;  %731 = vmatprep.mubr.bf16.mxu1 %v5085_v51  ;;  %v5070_v59 = vld [vmem:[#allocation5 + $0x194] ss:$8 sps:$4 sm:$0xff]   ;;  %v5072_v60 = vld [vmem:[#allocation5 + $0x90] ss:$8 sps:$4 sm:$0xff]   ;;  %v5074_v62 = vld [vmem:[#allocation5 + $0x84] ss:$8 sps:$4 sm:$0xff]  }
  0x4a   :  { %v5073_v61 = vld [vmem:[#allocation5 + $0x190] ss:$8 sps:$4 sm:$0xff]   ;;  %v5076_v63 = vld [vmem:[#allocation5 + $0x184] ss:$8 sps:$4 sm:$0xff]   ;;  %v5078_v0 = vld [vmem:[#allocation5 + $0x80] ss:$8 sps:$4 sm:$0xff]  }
  0x4b   :  { %637 = vmatpush1.bf16.msra.mxu0 %v5018_v22  ;;  %v5079_v1 = vld [vmem:[#allocation5 + $0x180] ss:$8 sps:$4 sm:$0xff]   ;;  %v5086_v4 = vld [vmem:[#allocation2 + $0x24] ss:$16 sps:$4 sm:$0xff]   ;;  %v5088_v5 = vld [vmem:[#allocation2 + $0x2c] ss:$16 sps:$4 sm:$0xff]  }
  0x4c   :  { %710 = vmatpush1.bf16.msra.mxu1 %v5019_v23  ;;  %638 = vmatprep.subr.bf16.mxu0 %v5020_v24  ;;  %v5080_v2 = vld [vmem:[#allocation2] ss:$16 sps:$4 sm:$0xff]   ;;  %v5083_v3 = vld [vmem:[#allocation2 + $0x8] ss:$16 sps:$4 sm:$0xff]   ;;  %v5092_v8 = vld [vmem:[#allocation2 + $0x44] ss:$16 sps:$4 sm:$0xff]  }
  0x4d   :  { %711 = vmatprep.subr.bf16.mxu1 %v5022_v25  ;;  %v5090_v6 = vld [vmem:[#allocation2 + $0x20] ss:$16 sps:$4 sm:$0xff]   ;;  %v5091_v7 = vld [vmem:[#allocation2 + $0x28] ss:$16 sps:$4 sm:$0xff]   ;;  %v5094_v9 = vld [vmem:[#allocation2 + $0x4c] ss:$16 sps:$4 sm:$0xff]  }
  0x4e   :  { %v5096_v10 = vld [vmem:[#allocation2 + $0x40] ss:$16 sps:$4 sm:$0xff]   ;;  %v5097_v11 = vld [vmem:[#allocation2 + $0x48] ss:$16 sps:$4 sm:$0xff]   ;;  %v5098_v12 = vld [vmem:[#allocation2 + $0x64] ss:$16 sps:$4 sm:$0xff]  }
  0x4f   :  { %639 = vmatpush1.bf16.msra.mxu0 %v5024_v26  ;;  %v5100_v13 = vld [vmem:[#allocation2 + $0x6c] ss:$16 sps:$4 sm:$0xff]   ;;  %v5102_v14 = vld [vmem:[#allocation2 + $0x60] ss:$16 sps:$4 sm:$0xff]   ;;  %v5103_v15 = vld [vmem:[#allocation2 + $0x68] ss:$16 sps:$4 sm:$0xff]  }
  0x50   :  { %712 = vmatpush1.bf16.msra.mxu1 %v5025_v27  ;;  %640 = vmatprep.subr.bf16.mxu0 %v5026_v28  ;;  %v5884_v16 = vld [vmem:[%s7901_s3 + $0xf8] sm:$0xff]  ;;  %v5896_v18 = vld [vmem:[%s7901_s3 + $0xf0] sm:$0xff]  ;;  %v5908_v20 = vld [vmem:[%s7901_s3 + $0xe8] sm:$0xff]  ;;  %vm1032_vm0 = vcmask 261120  }
  0x51   :  { %713 = vmatprep.subr.bf16.mxu1 %v5028_v29  ;;  %7968 = vst [vmem:[#allocation15_spill] sm:$0xff] %v5884_v16  ;;  %v5890_v17 = vld [vmem:[%s7901_s3 + $0x78] sm:$0xff]  ;;  %v5902_v19 = vld [vmem:[%s7901_s3 + $0x70] sm:$0xff]  ;;  %v5914_v21 = vld [vmem:[%s7901_s3 + $0x68] sm:$0xff] }
  0x52   :  { %v5920_v22 = vld [vmem:[%s7901_s3 + $0xe0] sm:$0xff]  ;;  %v5932_v24 = vld [vmem:[%s7901_s3 + $0xd8] sm:$0xff]  ;;  %v5944_v26 = vld [vmem:[%s7901_s3 + $0xd0] sm:$0xff] }
  0x53   :  { %641 = vmatpush1.bf16.msra.mxu0 %v5030_v30  ;;  %v5926_v23 = vld [vmem:[%s7901_s3 + $0x60] sm:$0xff]  ;;  %v5938_v25 = vld [vmem:[%s7901_s3 + $0x58] sm:$0xff]  ;;  %v5950_v27 = vld [vmem:[%s7901_s3 + $0x50] sm:$0xff] }
  0x54   :  { %714 = vmatpush1.bf16.msra.mxu1 %v5031_v31  ;;  %642 = vmatprep.subr.bf16.mxu0 %v5032_v32  ;;  %v5956_v28 = vld [vmem:[%s7901_s3 + $0xc8] sm:$0xff]  ;;  %v5968_v30 = vld [vmem:[%s7901_s3 + $0xc0] sm:$0xff]  ;;  %v5980_v32 = vld [vmem:[%s7901_s3 + $0xb8] sm:$0xff] }
  0x55   :  { %715 = vmatprep.subr.bf16.mxu1 %v5034_v33  ;;  %v5962_v29 = vld [vmem:[%s7901_s3 + $0x48] sm:$0xff]  ;;  %v5974_v31 = vld [vmem:[%s7901_s3 + $0x40] sm:$0xff]  ;;  %v5986_v33 = vld [vmem:[%s7901_s3 + $0x38] sm:$0xff] }
  0x56   :  { %v6080_v49 = vld [vmem:[%s7902_s4 + $0x30] sm:$0xff]  ;;  %v6090_v51 = vld [vmem:[%s7902_s4 + $0x20] sm:$0xff] }
  0x57   :  { %643 = vmatpush2.bf16.msra.mxu0 %v5036_v34  ;;  %v5992_v34 = vld [vmem:[%s7901_s3 + $0xb0] sm:$0xff]  ;;  %7969 = vst [vmem:[#allocation16_spill] sm:$0xff] %v6080_v49  ;;  %7971 = vst [vmem:[#allocation18_spill] sm:$0xff] %v6090_v51 }
  0x58   :  { %716 = vmatpush2.bf16.msra.mxu1 %v5037_v35  ;;  %644 = vmatprep.subr.bf16.mxu0 %v5038_v36  ;;  %v5998_v35 = vld [vmem:[%s7901_s3 + $0x30] sm:$0xff]  ;;  %v6004_v36 = vld [vmem:[%s7901_s3 + $0xa8] sm:$0xff] }
  0x59   :  { %717 = vmatprep.subr.bf16.mxu1 %v5040_v37  ;;  %v6010_v37 = vld [vmem:[%s7901_s3 + $0x28] sm:$0xff] }
  0x5b   :  { %645 = vmatpush2.bf16.msra.mxu0 %v5042_v38  ;;  %v6016_v38 = vld [vmem:[%s7901_s3 + $0xa0] sm:$0xff] }
  0x5c   :  { %718 = vmatpush2.bf16.msra.mxu1 %v5043_v39  ;;  %646 = vmatprep.subr.bf16.mxu0 %v5044_v40  ;;  %v6022_v39 = vld [vmem:[%s7901_s3 + $0x20] sm:$0xff]  ;;  %v6028_v40 = vld [vmem:[%s7901_s3 + $0x98] sm:$0xff] }
  0x5d   :  { %719 = vmatprep.subr.bf16.mxu1 %v5046_v41  ;;  %v6034_v41 = vld [vmem:[%s7901_s3 + $0x18] sm:$0xff] }
  0x5f   :  { %647 = vmatpush2.bf16.msra.mxu0 %v5048_v42  ;;  %v6040_v42 = vld [vmem:[%s7901_s3 + $0x90] sm:$0xff] }
  0x60   :  { %720 = vmatpush2.bf16.msra.mxu1 %v5049_v43  ;;  %648 = vmatprep.subr.bf16.mxu0 %v5050_v44  ;;  %v6046_v43 = vld [vmem:[%s7901_s3 + $0x10] sm:$0xff]  ;;  %v6052_v44 = vld [vmem:[%s7901_s3 + $0x88] sm:$0xff] }
  0x61   :  { %721 = vmatprep.subr.bf16.mxu1 %v5052_v45  ;;  %v6058_v45 = vld [vmem:[%s7901_s3 + $0x8] sm:$0xff] }
  0x63   :  { %649 = vmatpush2.bf16.msra.mxu0 %v5054_v46  ;;  %v6064_v46 = vld [vmem:[%s7901_s3 + $0x80] sm:$0xff] }
  0x64   :  { %722 = vmatpush2.bf16.msra.mxu1 %v5055_v47  ;;  %650 = vmatprep.subr.bf16.mxu0 %v5056_v48  ;;  %v6070_v47 = vld [vmem:[%s7901_s3] sm:$0xff]  ;;  %v133_v48 = vld [vmem:[%s7902_s4 + $0x38] sm:$0xff] }
  0x65   :  { %723 = vmatprep.subr.bf16.mxu1 %v5058_v50  ;;  %v6085_v50 = vld [vmem:[%s7902_s4 + $0x28] sm:$0xff] }
  0x66   :  { %7970 = vst [vmem:[#allocation17_spill] sm:$0xff] %v6085_v50 }
  0x67   :  { %651 = vmatpush2.bf16.msra.mxu0 %v5060_v52  ;;  %v6096_v52 = vld [vmem:[%s7902_s4 + $0x18] sm:$0xff] }
  0x68   :  { %724 = vmatpush2.bf16.msra.mxu1 %v5061_v53  ;;  %652 = vmatprep.subr.bf16.mxu0 %v5062_v54  ;;  %7972 = vst [vmem:[#allocation19_spill] sm:$0xff] %v6096_v52  ;;  %v6102_v53 = vld [vmem:[%s7902_s4 + $0x10] sm:$0xff]  ;;  %v6108_v54 = vld [vmem:[%s7902_s4 + $0x8] sm:$0xff] }
  0x69   :  { %725 = vmatprep.subr.bf16.mxu1 %v5064_v55  ;;  %7973 = vst [vmem:[#allocation20_spill] sm:$0xff] %v6102_v53  ;;  %7974 = vst [vmem:[#allocation21_spill] sm:$0xff] %v6108_v54  ;;  %v6114_v55 = vld [vmem:[%s7902_s4] sm:$0xff] }
  0x6a   :  { %7975 = vst [vmem:[#allocation22_spill] sm:$0xff] %v6114_v55 }
  0x6b   :  { %653 = vmatpush2.bf16.msra.mxu0 %v5066_v56  ;;  %v216_v56 = vlaneseq }
  0x6c   :  { %726 = vmatpush2.bf16.msra.mxu1 %v5067_v57  ;;  %654 = vmatprep.subr.bf16.mxu0 %v5068_v58 }
  0x6d   :  { %727 = vmatprep.subr.bf16.mxu1 %v5070_v59  ;;  %v217_v57 = vshrl.u32 %v216_v56, 7  ;;  %v214_v59 = vld [vmem:[%s7900_s2] sm:$0x3] }
  0x6f   :  { %655 = vmatpush2.bf16.msra.mxu0 %v5072_v60  ;;  %v6119_v58 = vsub.s32 0, %v217_v57  ;;  %v6124_v60 = vsub.s32 1, %v217_v57 }
  0x70   :  { %728 = vmatpush2.bf16.msra.mxu1 %v5073_v61  ;;  %656 = vmatprep.subr.bf16.mxu0 %v5074_v62 }
  0x71   :  { %729 = vmatprep.subr.bf16.mxu1 %v5076_v63  ;;  %7976 = vst [vmem:[#allocation23_spill] sm:$0xff] %v6119_v58  ;;  %7977 = vst [vmem:[#allocation24_spill] sm:$0xff] %v6124_v60  ;;  %v6127_v61 = vrot.slane %v214_v59, %v6119_v58  ;;  %v6130_v62 = vrot.slane %v214_v59, %v6124_v60 }
  0x73   :  { %657 = vmatpush2.bf16.msra.mxu0 %v5078_v0 }
  0x74   :  { %730 = vmatpush2.bf16.msra.mxu1 %v5079_v1  ;;  %4636 = vmatprep.subr.mxu0 %v5884_v16 }
  0x75   :  { %1081 = vmatprep.subr.mxu1 %v133_v48 }
  0x76   :  { %659 = vmatmul.mubr.bf16.vlgmr.msra.gmra.mxu0 %v5080_v2 }
  0x77   :  { %732 = vmatmul.mubr.bf16.vlgmr.msra.gmra.mxu1 %v5083_v3  ;;  %668 = vmatprep.mubr.bf16.mxu0 %v5086_v4 }
  0x78   :  { %741 = vmatprep.mubr.bf16.mxu1 %v5088_v5  ;;  %4637 = vmatpush3.msra.mxu0 %v5890_v17 }
  0x79   :  { %4638 = vmatprep.subr.mxu0 %v5896_v18  ;;  %1082 = vmatpush1.msra.mxu1 %v6080_v49 }
  0x7a   :  { %4639 = vmatpush3.msra.mxu0 %v5902_v19  ;;  %1083 = vmatprep.subr.mxu1 %v6085_v50 }
  0x7b   :  { %4640 = vmatprep.subr.mxu0 %v5908_v20  ;;  %1084 = vmatpush1.msra.mxu1 %v6090_v51 }
  0x7c   :  { %4641 = vmatpush3.msra.mxu0 %v5914_v21  ;;  %1085 = vmatprep.subr.mxu1 %v6096_v52 }
  0x7d   :  { %4642 = vmatprep.subr.mxu0 %v5920_v22  ;;  %1086 = vmatpush1.msra.mxu1 %v6102_v53 }
  0x7e   :  { %669 = vmatmul.mubr.bf16.gmra.mxu0 %v5090_v6  ;;  %1087 = vmatprep.subr.mxu1 %v6108_v54 }
  0x7f   :  { %742 = vmatmul.mubr.bf16.gmra.mxu1 %v5091_v7  ;;  %678 = vmatprep.mubr.bf16.mxu0 %v5092_v8 }
  0x80   :  { %751 = vmatprep.mubr.bf16.mxu1 %v5094_v9  ;;  %4643 = vmatpush3.msra.mxu0 %v5926_v23 }
  0x81   :  { %4644 = vmatprep.subr.mxu0 %v5932_v24  ;;  %1088 = vmatpush1.msra.mxu1 %v6114_v55 }
  0x82   :  { %4645 = vmatpush3.msra.mxu0 %v5938_v25  ;;  %1379 = vmatprep.subr.mxu1 %v133_v48 }
  0x83   :  { %4646 = vmatprep.subr.mxu0 %v5944_v26 }
  0x84   :  { %4647 = vmatpush3.msra.mxu0 %v5950_v27 }
  0x85   :  { %4648 = vmatprep.subr.mxu0 %v5956_v28 }
  0x86   :  { %679 = vmatmul.mubr.bf16.gmra.mxu0 %v5096_v10 }
  0x87   :  { %752 = vmatmul.mubr.bf16.gmra.mxu1 %v5097_v11  ;;  %688 = vmatprep.mubr.bf16.mxu0 %v5098_v12 }
  0x88   :  { %761 = vmatprep.mubr.bf16.mxu1 %v5100_v13  ;;  %4649 = vmatpush3.msra.mxu0 %v5962_v29 }
  0x89   :  { %4650 = vmatprep.subr.mxu0 %v5968_v30 }
  0x8a   :  { %4651 = vmatpush3.msra.mxu0 %v5974_v31 }
  0x8b   :  { %4652 = vmatprep.subr.mxu0 %v5980_v32 }
  0x8c   :  { %4653 = vmatpush3.msra.mxu0 %v5986_v33 }
  0x8d   :  { %4654 = vmatprep.subr.mxu0 %v5992_v34 }
  0x8e   :  { %689 = vmatmul.mubr.bf16.gmra.mxu0 %v5102_v14 }
  0x8f   :  { %762 = vmatmul.mubr.bf16.gmra.mxu1 %v5103_v15  ;;  %4655 = vmatpush3.msra.mxu0 %v5998_v35 }
  0x90   :  { %4656 = vmatprep.subr.mxu0 %v6004_v36 }
  0x91   :  { %4657 = vmatpush3.msra.mxu0 %v6010_v37 }
  0x92   :  { %4658 = vmatprep.subr.mxu0 %v6016_v38 }
  0x93   :  { %4659 = vmatpush3.msra.mxu0 %v6022_v39 }
  0x94   :  { %4660 = vmatprep.subr.mxu0 %v6028_v40 }
  0x95   :  { %4661 = vmatpush3.msra.mxu0 %v6034_v41 }
  0x96   :  { %4662 = vmatprep.subr.mxu0 %v6040_v42 }
  0x97   :  { %4663 = vmatpush3.msra.mxu0 %v6046_v43 }
  0x98   :  { %4664 = vmatprep.subr.mxu0 %v6052_v44 }
  0x99   :  { %4665 = vmatpush3.msra.mxu0 %v6058_v45 }
  0x9a   :  { %4666 = vmatprep.subr.mxu0 %v6064_v46 }
  0x9b   :  { %4667 = vmatpush3.msra.mxu0 %v6070_v47 }
  0x9c   :  { %4692 = vmatprep.subr.mxu0 %v5884_v16 }
 0x136   :  { %v660_v63 = vpop.f32.mrf.mxu0 }
 0x137   :  { %v733_v0 = vpop.f32.mrf.mxu1  ;;  %v661_v1 = vadd.f32 %v660_v63, %v6127_v61 }
 0x138   :  { %v662_v2 = vpop.f32.mrf.mxu0 }
 0x139   :  { %v735_v3 = vpop.f32.mrf.mxu1  ;;  %v6133_v4 = vadd.f32 %v733_v0, %v661_v1  ;;  %v663_v5 = vadd.f32 %v662_v2, %v6130_v62 }
 0x13a   :  { %v664_v6 = vpop.f32.mrf.mxu0 }
 0x13b   :  { %v737_v7 = vpop.f32.mrf.mxu1  ;;  %v4392_v8 = vmul.f32 -1.442695, %v6133_v4  ;;  %v6137_v9 = vadd.f32 %v735_v3, %v663_v5  ;;  %v665_v10 = vadd.f32 %v664_v6, %v6127_v61 }
 0x13c   :  { %v666_v11 = vpop.f32.mrf.mxu0 }
 0x13d   :  { %v739_v12 = vpop.f32.mrf.mxu1  ;;  %5296 = vpow2.f32 %v4392_v8  ;;  %v4393_v13 = vmul.f32 -1.442695, %v6137_v9  ;;  %v6141_v14 = vadd.f32 %v737_v7, %v665_v10  ;;  %v667_v15 = vadd.f32 %v666_v11, %v6130_v62 }
 0x13e   :  { %v670_v48 = vpop.f32.mrf.mxu0 }
 0x13f   :  { %v743_v56 = vpop.f32.mrf.mxu1  ;;  %5298 = vpow2.f32 %v4393_v13  ;;  %v4394_v57 = vmul.f32 -1.442695, %v6141_v14  ;;  %v6145_v59 = vadd.f32 %v739_v12, %v667_v15  ;;  %v671_v63 = vadd.f32 %v670_v48, %v6127_v61 }
 0x140   :  { %v672_v0 = vpop.f32.mrf.mxu0 }
 0x141   :  { %v745_v1 = vpop.f32.mrf.mxu1  ;;  %5300 = vpow2.f32 %v4394_v57  ;;  %v4395_v2 = vmul.f32 -1.442695, %v6145_v59  ;;  %v6149_v3 = vadd.f32 %v743_v56, %v671_v63  ;;  %v673_v5 = vadd.f32 %v672_v0, %v6130_v62 }
 0x142   :  { %v674_v6 = vpop.f32.mrf.mxu0 }
 0x143   :  { %v747_v7 = vpop.f32.mrf.mxu1  ;;  %5302 = vpow2.f32 %v4395_v2  ;;  %v4396_v8 = vmul.f32 -1.442695, %v6149_v3  ;;  %v6153_v10 = vadd.f32 %v745_v1, %v673_v5  ;;  %v675_v11 = vadd.f32 %v674_v6, %v6127_v61 }
 0x144   :  { %v676_v12 = vpop.f32.mrf.mxu0 }
 0x145   :  { %v749_v13 = vpop.f32.mrf.mxu1  ;;  %5304 = vpow2.f32 %v4396_v8  ;;  %v4397_v15 = vmul.f32 -1.442695, %v6153_v10  ;;  %v6157_v48 = vadd.f32 %v747_v7, %v675_v11  ;;  %v677_v56 = vadd.f32 %v676_v12, %v6130_v62 }
 0x146   :  { %v680_v57 = vpop.f32.mrf.mxu0 }
 0x147   :  { %v753_v63 = vpop.f32.mrf.mxu1  ;;  %5306 = vpow2.f32 %v4397_v15  ;;  %v4398_v0 = vmul.f32 -1.442695, %v6157_v48  ;;  %v6161_v2 = vadd.f32 %v749_v13, %v677_v56  ;;  %v681_v1 = vadd.f32 %v680_v57, %v6127_v61 }
 0x148   :  { %v682_v5 = vpop.f32.mrf.mxu0 }
 0x149   :  { %v755_v6 = vpop.f32.mrf.mxu1  ;;  %5308 = vpow2.f32 %v4398_v0  ;;  %v4399_v8 = vmul.f32 -1.442695, %v6161_v2  ;;  %v6165_v58 = vadd.f32 %v753_v63, %v681_v1  ;;  %v683_v7 = vadd.f32 %v682_v5, %v6130_v62 }
 0x14a   :  { %v5297_v11 = vpop.eup %5296  ;;  %v684_v12 = vpop.f32.mrf.mxu0 }
 0x14b   :  { %v757_v60 = vpop.f32.mrf.mxu1  ;;  %v820_v16 = vadd.f32 1.0, %v5297_v11  ;;  %5310 = vpow2.f32 %v4399_v8  ;;  %v4400_v15 = vmul.f32 -1.442695, %v6165_v58  ;;  %v6169_v13 = vadd.f32 %v755_v6, %v683_v7 }
 0x14c   :  { %v5299_v56 = vpop.eup %5298  ;;  %v685_v57 = vadd.f32 %v684_v12, %v6127_v61  ;;  %v686_v55 = vpop.f32.mrf.mxu0 }
 0x14d   :  { %v759_v0 = vpop.f32.mrf.mxu1  ;;  %5312 = vrcp.f32 %v820_v16  ;;  %v821_v54 = vadd.f32 1.0, %v5299_v56  ;;  %v4401_v63 = vmul.f32 -1.442695, %v6169_v13  ;;  %v687_v1 = vadd.f32 %v686_v55, %v6130_v62 }
 0x14e   :  { %v5301_v5 = vpop.eup %5300  ;;  %5314 = vpow2.f32 %v4400_v15  ;;  %v6174_v53 = vadd.f32 %v757_v60, %v685_v57  ;;  %v690_v8 = vpop.f32.mrf.mxu0 }
 0x14f   :  { %v763_v11 = vpop.f32.mrf.mxu1  ;;  %5316 = vrcp.f32 %v821_v54  ;;  %v822_v6 = vadd.f32 1.0, %v5301_v5  ;;  %v6176_v7 = vadd.f32 %v759_v0, %v687_v1  ;;  %v691_v12 = vadd.f32 %v690_v8, %v6127_v61 }
 0x150   :  { %v5303_v52 = vpop.eup %5302  ;;  %5318 = vpow2.f32 %v4401_v63  ;;  %v4402_v16 = vmul.f32 -1.442695, %v6174_v53  ;;  %v692_v56 = vpop.f32.mrf.mxu0 }
 0x151   :  { %v765_v51 = vpop.f32.mrf.mxu1  ;;  %5320 = vrcp.f32 %v822_v6  ;;  %v823_v55 = vadd.f32 1.0, %v5303_v52  ;;  %v4403_v15 = vmul.f32 -1.442695, %v6176_v7  ;;  %v6181_v60 = vadd.f32 %v763_v11, %v691_v12 }
 0x152   :  { %v5305_v57 = vpop.eup %5304  ;;  %5322 = vpow2.f32 %v4402_v16  ;;  %v693_v54 = vadd.f32 %v692_v56, %v6130_v62  ;;  %v694_v0 = vpop.f32.mrf.mxu0 }
 0x153   :  { %v767_v1 = vpop.f32.mrf.mxu1  ;;  %5324 = vrcp.f32 %v823_v55  ;;  %v824_v5 = vadd.f32 1.0, %v5305_v57  ;;  %v4404_v63 = vmul.f32 -1.442695, %v6181_v60  ;;  %v695_v8 = vadd.f32 %v694_v0, %v6127_v61 }
 0x154   :  { %v5307_v50 = vpop.eup %5306  ;;  %5326 = vpow2.f32 %v4403_v15  ;;  %v6186_v6 = vadd.f32 %v765_v51, %v693_v54  ;;  %v696_v52 = vpop.f32.mrf.mxu0 }
 0x155   :  { %5328 = vrcp.f32 %v824_v5  ;;  %v825_v11 = vadd.f32 1.0, %v5307_v50  ;;  %v6188_v12 = vadd.f32 %v767_v1, %v695_v8  ;;  %v697_v16 = vadd.f32 %v696_v52, %v6130_v62  ;;  %v769_v57 = vpop.f32.mrf.mxu1 }
 0x156   :  { %v5309_v56 = vpop.eup %5308  ;;  %5330 = vpow2.f32 %v4404_v63  ;;  %v4405_v55 = vmul.f32 -1.442695, %v6186_v6 }
 0x157   :  { %5332 = vrcp.f32 %v825_v11  ;;  %v826_v49 = vadd.f32 1.0, %v5309_v56  ;;  %v4406_v61 = vmul.f32 -1.442695, %v6188_v12  ;;  %v6193_v0 = vadd.f32 %v769_v57, %v697_v16 }
 0x158   :  { %v5311_v51 = vpop.eup %5310  ;;  %5334 = vpow2.f32 %v4405_v55 }
 0x159   :  { %5336 = vrcp.f32 %v826_v49  ;;  %v827_v15 = vadd.f32 1.0, %v5311_v51  ;;  %v4407_v50 = vmul.f32 -1.442695, %v6193_v0 }
 0x15a   :  { %v5313_v54 = vpop.eup %5312  ;;  %5338 = vpow2.f32 %v4406_v61 }
 0x15b   :  { %v5315_v62 = vpop.eup %5314  ;;  %5340 = vrcp.f32 %v827_v15  ;;  %v6200_v11 = vmul.f32 %v5313_v54, %v6133_v4 }
 0x15c   :  { %v5317_v1 = vpop.eup %5316  ;;  %v828_v5 = vadd.f32 1.0, %v5315_v62  ;;  %5342 = vpow2.f32 %v4407_v50 }
 0x15d   :  { %v5319_v63 = vpop.eup %5318  ;;  %v6197_v8 = vmul.f32 %v5317_v1, %v6137_v9  ;;  %7979 = vst [vmem:[#allocation26_spill] sm:$0xff] %v6200_v11 }
 0x15e   :  { %v5321_v52 = vpop.eup %5320  ;;  %v829_v16 = vadd.f32 1.0, %v5319_v63  ;;  %5344 = vrcp.f32 %v828_v5  ;;  %v7999_v5 = vld [vmem:[#allocation21_spill] sm:$0xff] }
 0x15f   :  { %7978 = vst [vmem:[#allocation25_spill] sm:$0xff] %v6197_v8  ;;  %v5323_v49 = vpop.eup %5322  ;;  %983 = vmatprep.mubr.f32.mxu0 %v6197_v8  ;;  %v6209_v4 = vmul.f32 %v5321_v52, %v6141_v14  ;;  %v8000_v52 = vld [vmem:[#allocation22_spill] sm:$0xff] }
 0x160   :  { %v5325_v56 = vpop.eup %5324  ;;  %5346 = vrcp.f32 %v829_v16  ;;  %v830_v55 = vadd.f32 1.0, %v5323_v49  ;;  %984 = vmatmul.mubr.f32.vlgmr.msra.gmra.mxu0 %v6200_v11  ;;  %v8001_v49 = vld [vmem:[#allocation15_spill] sm:$0xff] }
 0x161   :  { %v5327_v57 = vpop.eup %5326  ;;  %v6205_v61 = vmul.f32 %v5325_v56, %v6145_v59  ;;  %4693 = vmatpush3.msra.mxu0 %v5890_v17  ;;  %7981 = vst [vmem:[#allocation28_spill] sm:$0xff] %v6209_v4 }
 0x162   :  { %v5329_v9 = vpop.eup %5328  ;;  %v831_v51 = vadd.f32 1.0, %v5327_v57  ;;  %4694 = vmatprep.subr.mxu0 %v5896_v18  ;;  %5348 = vrcp.f32 %v830_v55 }
 0x163   :  { %7980 = vst [vmem:[#allocation27_spill] sm:$0xff] %v6205_v61  ;;  %v5331_v15 = vpop.eup %5330  ;;  %988 = vmatprep.mubr.f32.mxu0 %v6205_v61  ;;  %4695 = vmatpush3.msra.mxu0 %v5902_v19  ;;  %v6221_v59 = vmul.f32 %v5329_v9, %v6149_v3 }
 0x164   :  { %v5333_v50 = vpop.eup %5332  ;;  %5350 = vrcp.f32 %v831_v51  ;;  %v832_v54 = vadd.f32 1.0, %v5331_v15  ;;  %989 = vmatmul.mubr.f32.gmra.mxu0 %v6209_v4  ;;  %4696 = vmatprep.subr.mxu0 %v5908_v20 }
 0x165   :  { %v5335_v17 = vpop.eup %5334  ;;  %v6217_v14 = vmul.f32 %v5333_v50, %v6153_v10  ;;  %4697 = vmatpush3.msra.mxu0 %v5914_v21  ;;  %7983 = vst [vmem:[#allocation30_spill] sm:$0xff] %v6221_v59 }
 0x166   :  { %v5337_v18 = vpop.eup %5336  ;;  %v833_v62 = vadd.f32 1.0, %v5335_v17  ;;  %4698 = vmatprep.subr.mxu0 %v5920_v22  ;;  %5352 = vrcp.f32 %v832_v54 }
 0x167   :  { %7982 = vst [vmem:[#allocation29_spill] sm:$0xff] %v6217_v14  ;;  %v5339_v19 = vpop.eup %5338  ;;  %993 = vmatprep.mubr.f32.mxu0 %v6217_v14  ;;  %4699 = vmatpush3.msra.mxu0 %v5926_v23  ;;  %v6233_v22 = vmul.f32 %v5337_v18, %v6157_v48 }
 0x168   :  { %v5341_v20 = vpop.eup %5340  ;;  %5354 = vrcp.f32 %v833_v62  ;;  %v834_v1 = vadd.f32 1.0, %v5339_v19  ;;  %994 = vmatmul.mubr.f32.gmra.mxu0 %v6221_v59  ;;  %4700 = vmatprep.subr.mxu0 %v5932_v24 }
 0x169   :  { %v5343_v21 = vpop.eup %5342  ;;  %v6229_v3 = vmul.f32 %v5341_v20, %v6161_v2  ;;  %4701 = vmatpush3.msra.mxu0 %v5938_v25  ;;  %7985 = vst [vmem:[#allocation32_spill] sm:$0xff] %v6233_v22 }
 0x16a   :  { %v835_v10 = vadd.f32 1.0, %v5343_v21  ;;  %4702 = vmatprep.subr.mxu0 %v5944_v26  ;;  %5356 = vrcp.f32 %v834_v1 }
 0x16b   :  { %7984 = vst [vmem:[#allocation31_spill] sm:$0xff] %v6229_v3  ;;  %998 = vmatprep.mubr.f32.mxu0 %v6229_v3  ;;  %4703 = vmatpush3.msra.mxu0 %v5950_v27  ;;  %v5345_v23 = vpop.eup %5344 }
 0x16c   :  { %5358 = vrcp.f32 %v835_v10  ;;  %999 = vmatmul.mubr.f32.gmra.mxu0 %v6233_v22  ;;  %4704 = vmatprep.subr.mxu0 %v5956_v28  ;;  %v6246_v26 = vmul.f32 %v5345_v23, %v6165_v58 }
 0x16d   :  { %v5347_v24 = vpop.eup %5346  ;;  %4705 = vmatpush3.msra.mxu0 %v5962_v29 }
 0x16e   :  { %v6242_v25 = vmul.f32 %v5347_v24, %v6169_v13  ;;  %4706 = vmatprep.subr.mxu0 %v5968_v30  ;;  %7987 = vst [vmem:[#allocation34_spill] sm:$0xff] %v6246_v26  ;;  %v7996_v13 = vld [vmem:[#allocation18_spill] sm:$0xff] }
 0x16f   :  { %4707 = vmatpush3.msra.mxu0 %v5974_v31  ;;  %v5349_v27 = vpop.eup %5348 }
 0x170   :  { %7986 = vst [vmem:[#allocation33_spill] sm:$0xff] %v6242_v25  ;;  %1003 = vmatprep.mubr.f32.mxu0 %v6242_v25  ;;  %4708 = vmatprep.subr.mxu0 %v5980_v32  ;;  %v6257_v29 = vmul.f32 %v5349_v27, %v6174_v53 }
 0x171   :  { %v5351_v48 = vpop.eup %5350  ;;  %1004 = vmatmul.mubr.f32.gmra.mxu0 %v6246_v26 }
 0x172   :  { %v6253_v28 = vmul.f32 %v5351_v48, %v6176_v7  ;;  %4709 = vmatpush3.msra.mxu0 %v5986_v33  ;;  %7989 = vst [vmem:[#allocation36_spill] sm:$0xff] %v6257_v29 }
 0x173   :  { %4710 = vmatprep.subr.mxu0 %v5992_v34  ;;  %v5353_v30 = vpop.eup %5352 }
 0x174   :  { %7988 = vst [vmem:[#allocation35_spill] sm:$0xff] %v6253_v28  ;;  %1008 = vmatprep.mubr.f32.mxu0 %v6253_v28  ;;  %4711 = vmatpush3.msra.mxu0 %v5998_v35  ;;  %v6269_v33 = vmul.f32 %v5353_v30, %v6181_v60  ;;  %v7997_v60 = vld [vmem:[#allocation19_spill] sm:$0xff] }
 0x175   :  { %v5355_v31 = vpop.eup %5354  ;;  %1009 = vmatmul.mubr.f32.gmra.mxu0 %v6257_v29  ;;  %4712 = vmatprep.subr.mxu0 %v6004_v36 }
 0x176   :  { %v6265_v32 = vmul.f32 %v5355_v31, %v6186_v6  ;;  %4713 = vmatpush3.msra.mxu0 %v6010_v37  ;;  %7991 = vst [vmem:[#allocation38_spill] sm:$0xff] %v6269_v33 }
 0x177   :  { %4714 = vmatprep.subr.mxu0 %v6016_v38  ;;  %v5357_v34 = vpop.eup %5356  ;;  %v7922_v38 = vmov 0.0  }
 0x178   :  { %7990 = vst [vmem:[#allocation37_spill] sm:$0xff] %v6265_v32  ;;  %1013 = vmatprep.mubr.f32.mxu0 %v6265_v32  ;;  %4715 = vmatpush3.msra.mxu0 %v6022_v39  ;;  %v6281_v37 = vmul.f32 %v5357_v34, %v6188_v12  ;;  %v7998_v12 = vld [vmem:[#allocation20_spill] sm:$0xff] }
 0x179   :  { %v5359_v35 = vpop.eup %5358  ;;  %1014 = vmatmul.mubr.f32.gmra.mxu0 %v6269_v33  ;;  %4716 = vmatprep.subr.mxu0 %v6028_v40 }
 0x17a   :  { %v6277_v36 = vmul.f32 %v5359_v35, %v6193_v0  ;;  %4717 = vmatpush3.msra.mxu0 %v6034_v41  ;;  %7993 = vst [vmem:[#allocation40_spill] sm:$0xff] %v6281_v37  ;;  %1121 = vmatprep.mubr.f32.mxu1 %v7922_v38 }
 0x17b   :  { %4718 = vmatprep.subr.mxu0 %v6040_v42 }
 0x17c   :  { %7992 = vst [vmem:[#allocation39_spill] sm:$0xff] %v6277_v36  ;;  %1018 = vmatprep.mubr.f32.mxu0 %v6277_v36  ;;  %4719 = vmatpush3.msra.mxu0 %v6046_v43 }
 0x17d   :  { %1019 = vmatmul.mubr.f32.gmra.mxu0 %v6281_v37  ;;  %4720 = vmatprep.subr.mxu0 %v6052_v44 }
 0x17e   :  { %4721 = vmatpush3.msra.mxu0 %v6058_v45  ;;  %v7994_v45 = vld [vmem:[#allocation16_spill] sm:$0xff] }
 0x17f   :  { %4722 = vmatprep.subr.mxu0 %v6064_v46 }
 0x180   :  { %4723 = vmatpush3.msra.mxu0 %v6070_v47  ;;  %v7995_v47 = vld [vmem:[#allocation17_spill] sm:$0xff] }
 0x220   :  { %v4668_v39 = vpop.f32.mrf.mxu0 }
 0x222   :  { %v4669_v40 = vpop.f32.mrf.mxu0 }
 0x223   :  { %v4670_v41 = vadd.f32 %v4669_v40, %v4668_v39 }
 0x224   :  { %v4671_v42 = vpop.f32.mrf.mxu0 }
 0x225   :  { %v1024_v53 = vmul.f32 0.125, %v4670_v41 }
 0x226   :  { %v4672_v43 = vpop.f32.mrf.mxu0 }
 0x227   :  { %v4673_v58 = vadd.f32 %v4672_v43, %v4671_v42  ;;  %4408 = vmatmul.mubr.msk.f32.vlgmr.msra.gmra.mxu1 %vm1032_vm0, %v1024_v53 }
 0x228   :  { %v4674_v44 = vpop.f32.mrf.mxu0  ;;  %1127 = vmatprep.mubr.f32.mxu1 %v7922_v38  ;;  %1380 = vmatpush1.msra.mxu1 %v7994_v45 }
 0x229   :  { %v1025_v46 = vmul.f32 0.125, %v4673_v58  ;;  %1381 = vmatprep.subr.mxu1 %v7995_v47 }
 0x22a   :  { %v4675_v2 = vpop.f32.mrf.mxu0  ;;  %1382 = vmatpush1.msra.mxu1 %v7996_v13 }
 0x22b   :  { %v4676_v7 = vadd.f32 %v4675_v2, %v4674_v44  ;;  %4409 = vmatmul.mubr.msk.f32.gmra.mxu1 %vm1032_vm0, %v1025_v46  ;;  %1383 = vmatprep.subr.mxu1 %v7997_v60 }
 0x22c   :  { %v4677_v6 = vpop.f32.mrf.mxu0  ;;  %1133 = vmatprep.mubr.f32.mxu1 %v7922_v38  ;;  %1384 = vmatpush1.msra.mxu1 %v7998_v12 }
 0x22d   :  { %v1026_v0 = vmul.f32 0.125, %v4676_v7  ;;  %1385 = vmatprep.subr.mxu1 %v7999_v5 }
 0x22e   :  { %v4678_v63 = vpop.f32.mrf.mxu0  ;;  %1386 = vmatpush1.msra.mxu1 %v8000_v52 }
 0x22f   :  { %v4679_v16 = vadd.f32 %v4678_v63, %v4677_v6  ;;  %4410 = vmatmul.mubr.msk.f32.gmra.mxu1 %vm1032_vm0, %v1026_v0  ;;  %4748 = vmatprep.subr.mxu1 %v8001_v49 }
 0x230   :  { %1139 = vmatprep.mubr.f32.mxu1 %v7922_v38 }
 0x231   :  { %v1027_v56 = vmul.f32 0.125, %v4679_v16  ;;  %v4680_v55 = vpop.f32.mrf.mxu0 }
 0x233   :  { %v4681_v57 = vpop.f32.mrf.mxu0  ;;  %4411 = vmatmul.mubr.msk.f32.gmra.mxu1 %vm1032_vm0, %v1027_v56 }
 0x234   :  { %v4682_v9 = vadd.f32 %v4681_v57, %v4680_v55  ;;  %1145 = vmatprep.mubr.f32.mxu1 %v7922_v38 }
 0x235   :  { %v4683_v51 = vpop.f32.mrf.mxu0 }
 0x236   :  { %v1028_v15 = vmul.f32 0.125, %v4682_v9 }
 0x237   :  { %v4684_v50 = vpop.f32.mrf.mxu0 }
 0x238   :  { %v4685_v54 = vadd.f32 %v4684_v50, %v4683_v51  ;;  %4412 = vmatmul.mubr.msk.f32.gmra.mxu1 %vm1032_vm0, %v1028_v15 }
 0x239   :  { %v4686_v17 = vpop.f32.mrf.mxu0  ;;  %1151 = vmatprep.mubr.f32.mxu1 %v7922_v38 }
 0x23a   :  { %v1029_v18 = vmul.f32 0.125, %v4685_v54 }
 0x23b   :  { %v4687_v62 = vpop.f32.mrf.mxu0 }
 0x23c   :  { %v4688_v19 = vadd.f32 %v4687_v62, %v4686_v17  ;;  %4413 = vmatmul.mubr.msk.f32.gmra.mxu1 %vm1032_vm0, %v1029_v18 }
 0x23d   :  { %v4689_v20 = vpop.f32.mrf.mxu0  ;;  %1157 = vmatprep.mubr.f32.mxu1 %v7922_v38 }
 0x23e   :  { %v1030_v1 = vmul.f32 0.125, %v4688_v19 }
 0x23f   :  { %v4690_v21 = vpop.f32.mrf.mxu0 }
 0x240   :  { %v4691_v10 = vadd.f32 %v4690_v21, %v4689_v20  ;;  %4414 = vmatmul.mubr.msk.f32.gmra.mxu1 %vm1032_vm0, %v1030_v1 }
 0x241   :  { %1163 = vmatprep.mubr.f32.mxu1 %v7922_v38 }
 0x242   :  { %v1031_v23 = vmul.f32 0.125, %v4691_v10 }
 0x244   :  { %4415 = vmatmul.mubr.msk.f32.gmra.mxu1 %vm1032_vm0, %v1031_v23 }
 0x245   :  { %1419 = vmatprep.mubr.f32.mxu1 %v7922_v38 }
 0x2e7   :  { %v1123_v24 = vpop.f32.mrf.mxu1 }
 0x2e8   :  { %v6317_v27 = vsub.f32 %v6200_v11, %v1123_v24 }
 0x2e9   :  { %v1125_v48 = vpop.f32.mrf.mxu1 }
 0x2ea   :  { %v6320_v30 = vsub.f32 %v6197_v8, %v1125_v48  ;;  %v1186_v35 = vmul.f32 %v6317_v27, %v6317_v27  ;;  %v5104_v48 = vld [vmem:[#allocation7 + $0x70] ss:$8 sps:$4 sm:$0xff]  }
 0x2eb   :  { %v1129_v31 = vpop.f32.mrf.mxu1 }
 0x2ec   :  { %v1187_v34 = vmul.f32 %v6320_v30, %v6320_v30  ;;  %v6327_v39 = vsub.f32 %v6209_v4, %v1129_v31  ;;  %v5106_v31 = vld [vmem:[#allocation7 + $0x74] ss:$8 sps:$4 sm:$0xff]  }
 0x2ed   :  { %v1131_v40 = vpop.f32.mrf.mxu1  ;;  %1717 = vmatprep.subr.bf16.mxu0 %v5106_v31 }
 0x2ee   :  { %v6330_v41 = vsub.f32 %v6205_v61, %v1131_v40  ;;  %1266 = vmatprep.mubr.f32.mxu0 %v1187_v34  ;;  %v1188_v43 = vmul.f32 %v6327_v39, %v6327_v39  ;;  %v5109_v34 = vld [vmem:[#allocation7 + $0x64] ss:$8 sps:$4 sm:$0xff]   ;;  %v5112_v40 = vld [vmem:[#allocation7 + $0x54] ss:$8 sps:$4 sm:$0xff]  }
 0x2ef   :  { %v1135_v42 = vpop.f32.mrf.mxu1  ;;  %1267 = vmatmul.mubr.f32.vlgmr.msra.gmra.mxu0 %v1186_v35  ;;  %v5107_v35 = vld [vmem:[#allocation7 + $0x60] ss:$8 sps:$4 sm:$0xff]  }
 0x2f0   :  { %v1189_v53 = vmul.f32 %v6330_v41, %v6330_v41  ;;  %v6337_v58 = vsub.f32 %v6221_v59, %v1135_v42  ;;  %1718 = vmatpush1.bf16.msra.mxu0 %v5104_v48  ;;  %v5110_v42 = vld [vmem:[#allocation7 + $0x50] ss:$8 sps:$4 sm:$0xff]  }
 0x2f1   :  { %v1137_v44 = vpop.f32.mrf.mxu1  ;;  %1719 = vmatprep.subr.bf16.mxu0 %v5109_v34 }
 0x2f2   :  { %v6340_v45 = vsub.f32 %v6217_v14, %v1137_v44  ;;  %1271 = vmatprep.mubr.f32.mxu0 %v1189_v53  ;;  %v1190_v2 = vmul.f32 %v6337_v58, %v6337_v58  ;;  %v5115_v53 = vld [vmem:[#allocation7 + $0x44] ss:$8 sps:$4 sm:$0xff]   ;;  %v5118_v44 = vld [vmem:[#allocation7 + $0x34] ss:$8 sps:$4 sm:$0xff]  }
 0x2f3   :  { %v1141_v46 = vpop.f32.mrf.mxu1  ;;  %1272 = vmatmul.mubr.f32.gmra.mxu0 %v1188_v43  ;;  %v5113_v43 = vld [vmem:[#allocation7 + $0x40] ss:$8 sps:$4 sm:$0xff]  }
 0x2f4   :  { %v1191_v47 = vmul.f32 %v6340_v45, %v6340_v45  ;;  %v6347_v13 = vsub.f32 %v6233_v22, %v1141_v46  ;;  %1720 = vmatpush1.bf16.msra.mxu0 %v5107_v35  ;;  %v5116_v46 = vld [vmem:[#allocation7 + $0x30] ss:$8 sps:$4 sm:$0xff]  }
 0x2f5   :  { %v1143_v7 = vpop.f32.mrf.mxu1  ;;  %1721 = vmatprep.subr.bf16.mxu0 %v5112_v40  ;;  %v6606_v22 = vld [vmem:[%s7901_s3 + $0xf8] sm:$0xff] }
 0x2f6   :  { %v6350_v60 = vsub.f32 %v6229_v3, %v1143_v7  ;;  %1276 = vmatprep.mubr.f32.mxu0 %v1191_v47  ;;  %v1192_v0 = vmul.f32 %v6347_v13, %v6347_v13  ;;  %v5121_v47 = vld [vmem:[#allocation7 + $0x24] ss:$8 sps:$4 sm:$0xff]   ;;  %v5124_v7 = vld [vmem:[#allocation7 + $0x14] ss:$8 sps:$4 sm:$0xff]   ;;  %8005 = vst [vmem:[#allocation19_spill] sm:$0xff] %v6606_v22 }
 0x2f7   :  { %1277 = vmatmul.mubr.f32.gmra.mxu0 %v1190_v2  ;;  %v5119_v2 = vld [vmem:[#allocation7 + $0x20] ss:$8 sps:$4 sm:$0xff]  }
 0x2f8   :  { %v1193_v6 = vmul.f32 %v6350_v60, %v6350_v60  ;;  %v1147_v12 = vpop.f32.mrf.mxu1  ;;  %1722 = vmatpush1.bf16.msra.mxu0 %v5110_v42 }
 0x2f9   :  { %v6357_v5 = vsub.f32 %v6246_v26, %v1147_v12  ;;  %1723 = vmatprep.subr.bf16.mxu0 %v5115_v53  ;;  %v5127_v12 = vld [vmem:[#allocation7 + $0x4] ss:$8 sps:$4 sm:$0xff]  }
 0x2fa   :  { %v1149_v63 = vpop.f32.mrf.mxu1  ;;  %1281 = vmatprep.mubr.f32.mxu0 %v1193_v6  ;;  %v5122_v6 = vld [vmem:[#allocation7 + $0x10] ss:$8 sps:$4 sm:$0xff]   ;;  %v5151_v26 = vld [vmem:[#allocation7 + $0x84] ss:$8 sps:$4 sm:$0xff]  }
 0x2fb   :  { %v6360_v52 = vsub.f32 %v6242_v25, %v1149_v63  ;;  %1282 = vmatmul.mubr.f32.gmra.mxu0 %v1192_v0  ;;  %v1194_v56 = vmul.f32 %v6357_v5, %v6357_v5  ;;  %v5125_v0 = vld [vmem:[#allocation7] ss:$8 sps:$4 sm:$0xff]   ;;  %v5130_v63 = vld [vmem:[#allocation7 + $0xf4] ss:$8 sps:$4 sm:$0xff]  }
 0x2fc   :  { %v1153_v16 = vpop.f32.mrf.mxu1  ;;  %1724 = vmatpush1.bf16.msra.mxu0 %v5113_v43  ;;  %v5149_v25 = vld [vmem:[#allocation7 + $0x80] ss:$8 sps:$4 sm:$0xff]  }
 0x2fd   :  { %v1195_v49 = vmul.f32 %v6360_v52, %v6360_v52  ;;  %v6367_v55 = vsub.f32 %v6257_v29, %v1153_v16  ;;  %1725 = vmatprep.subr.bf16.mxu0 %v5118_v44  ;;  %v5128_v16 = vld [vmem:[#allocation7 + $0xf0] ss:$8 sps:$4 sm:$0xff]   ;;  %v5148_v29 = vld [vmem:[#allocation7 + $0x94] ss:$8 sps:$4 sm:$0xff]  }
 0x2fe   :  { %v1155_v57 = vpop.f32.mrf.mxu1 }
 0x2ff   :  { %v6370_v9 = vsub.f32 %v6253_v28, %v1155_v57  ;;  %1286 = vmatprep.mubr.f32.mxu0 %v1195_v49  ;;  %v1196_v50 = vmul.f32 %v6367_v55, %v6367_v55  ;;  %v5133_v49 = vld [vmem:[#allocation7 + $0xe4] ss:$8 sps:$4 sm:$0xff]   ;;  %v5136_v57 = vld [vmem:[#allocation7 + $0xd4] ss:$8 sps:$4 sm:$0xff]   ;;  %v5146_v28 = vld [vmem:[#allocation7 + $0x90] ss:$8 sps:$4 sm:$0xff]  }
 0x300   :  { %v1159_v51 = vpop.f32.mrf.mxu1  ;;  %1287 = vmatmul.mubr.f32.gmra.mxu0 %v1194_v56  ;;  %v5131_v56 = vld [vmem:[#allocation7 + $0xe0] ss:$8 sps:$4 sm:$0xff]  }
 0x301   :  { %v1197_v15 = vmul.f32 %v6370_v9, %v6370_v9  ;;  %v6377_v54 = vsub.f32 %v6269_v33, %v1159_v51  ;;  %1726 = vmatpush1.bf16.msra.mxu0 %v5116_v46  ;;  %v5134_v51 = vld [vmem:[#allocation7 + $0xd0] ss:$8 sps:$4 sm:$0xff]   ;;  %v5145_v33 = vld [vmem:[#allocation7 + $0xa4] ss:$8 sps:$4 sm:$0xff]  }
 0x302   :  { %v1161_v17 = vpop.f32.mrf.mxu1  ;;  %1727 = vmatprep.subr.bf16.mxu0 %v5121_v47 }
 0x303   :  { %v6380_v18 = vsub.f32 %v6265_v32, %v1161_v17  ;;  %1291 = vmatprep.mubr.f32.mxu0 %v1197_v15  ;;  %v1198_v20 = vmul.f32 %v6377_v54, %v6377_v54  ;;  %v5139_v15 = vld [vmem:[#allocation7 + $0xc4] ss:$8 sps:$4 sm:$0xff]   ;;  %v5143_v32 = vld [vmem:[#allocation7 + $0xa0] ss:$8 sps:$4 sm:$0xff]  }
 0x304   :  { %v1165_v62 = vpop.f32.mrf.mxu1  ;;  %1292 = vmatmul.mubr.f32.gmra.mxu0 %v1196_v50  ;;  %v5137_v50 = vld [vmem:[#allocation7 + $0xc0] ss:$8 sps:$4 sm:$0xff]  }
 0x305   :  { %v1199_v19 = vmul.f32 %v6380_v18, %v6380_v18  ;;  %v6387_v1 = vsub.f32 %v6281_v37, %v1165_v62  ;;  %1728 = vmatpush1.bf16.msra.mxu0 %v5119_v2  ;;  %v5142_v37 = vld [vmem:[#allocation7 + $0xb4] ss:$8 sps:$4 sm:$0xff]  }
 0x306   :  { %v1167_v21 = vpop.f32.mrf.mxu1  ;;  %1729 = vmatprep.subr.bf16.mxu0 %v5124_v7 }
 0x307   :  { %v6390_v10 = vsub.f32 %v6277_v36, %v1167_v21  ;;  %1296 = vmatprep.mubr.f32.mxu0 %v1199_v19  ;;  %v1200_v24 = vmul.f32 %v6387_v1, %v6387_v1  ;;  %v5140_v36 = vld [vmem:[#allocation7 + $0xb0] ss:$8 sps:$4 sm:$0xff]  }
 0x308   :  { %1297 = vmatmul.mubr.f32.gmra.mxu0 %v1198_v20 }
 0x309   :  { %v1201_v23 = vmul.f32 %v6390_v10, %v6390_v10  ;;  %1730 = vmatpush1.bf16.msra.mxu0 %v5122_v6 }
 0x30a   :  { %1731 = vmatprep.subr.bf16.mxu0 %v5127_v12 }
 0x30b   :  { %1301 = vmatprep.mubr.f32.mxu0 %v1201_v23 }
 0x30c   :  { %1302 = vmatmul.mubr.f32.gmra.mxu0 %v1200_v24 }
 0x30d   :  { %1732 = vmatpush1.bf16.msra.mxu0 %v5125_v0 }
 0x30e   :  { %1733 = vmatprep.subr.bf16.mxu0 %v5130_v63 }
 0x311   :  { %1734 = vmatpush2.bf16.msra.mxu0 %v5128_v16 }
 0x312   :  { %1735 = vmatprep.subr.bf16.mxu0 %v5133_v49 }
 0x315   :  { %1736 = vmatpush2.bf16.msra.mxu0 %v5131_v56 }
 0x316   :  { %1737 = vmatprep.subr.bf16.mxu0 %v5136_v57 }
 0x319   :  { %1738 = vmatpush2.bf16.msra.mxu0 %v5134_v51 }
 0x31a   :  { %1739 = vmatprep.subr.bf16.mxu0 %v5139_v15  ;;  %v6401_v15 = vld [vmem:[%s7901_s3 + $0x78] sm:$0xff] }
 0x31d   :  { %1740 = vmatpush2.bf16.msra.mxu0 %v5137_v50 }
 0x31e   :  { %1741 = vmatprep.subr.bf16.mxu0 %v5142_v37 }
 0x321   :  { %1742 = vmatpush2.bf16.msra.mxu0 %v5140_v36 }
 0x322   :  { %1743 = vmatprep.subr.bf16.mxu0 %v5145_v33  ;;  %v916_v33 = vld [vmem:[%s7903_s5] sm:$0x3] }
 0x325   :  { %1744 = vmatpush2.bf16.msra.mxu0 %v5143_v32  ;;  %v8006_v32 = vld [vmem:[#allocation24_spill] sm:$0xff] }
 0x326   :  { %1745 = vmatprep.subr.bf16.mxu0 %v5148_v29  ;;  %v6613_v36 = vrot.slane %v916_v33, %v8006_v32 }
 0x329   :  { %1746 = vmatpush2.bf16.msra.mxu0 %v5146_v28  ;;  %v8007_v28 = vld [vmem:[#allocation23_spill] sm:$0xff] }
 0x32a   :  { %1747 = vmatprep.subr.bf16.mxu0 %v5151_v26  ;;  %v6616_v37 = vrot.slane %v916_v33, %v8007_v28 }
 0x32d   :  { %1748 = vmatpush2.bf16.msra.mxu0 %v5149_v25 }
 0x32e   :  { %4804 = vmatprep.subr.mxu0 %v6606_v22  ;;  %v917_v22 = vld [vmem:[%s7904_s6] sm:$0x3] }
 0x32f   :  { %v6626_v61 = vrot.slane %v917_v22, %v8006_v32 }
 0x3af   :  { %v4724_v17 = vpop.f32.mrf.mxu0 }
 0x3b1   :  { %v4725_v62 = vpop.f32.mrf.mxu0 }
 0x3b2   :  { %v4726_v19 = vadd.f32 %v4725_v62, %v4724_v17  ;;  %v6407_v17 = vld [vmem:[%s7901_s3 + $0xf0] sm:$0xff] }
 0x3b3   :  { %v4727_v20 = vpop.f32.mrf.mxu0 }
 0x3b4   :  { %v1307_v21 = vmul.f32 0.125, %v4726_v19 }
 0x3b5   :  { %v4728_v23 = vpop.f32.mrf.mxu0 }
 0x3b6   :  { %v1315_v24 = vadd.f32 1e-05, %v1307_v21  ;;  %v4729_v48 = vadd.f32 %v4728_v23, %v4727_v20  ;;  %v6413_v20 = vld [vmem:[%s7901_s3 + $0x70] sm:$0xff]  ;;  %v6420_v23 = vld [vmem:[%s7901_s3 + $0xe8] sm:$0xff] }
 0x3b7   :  { %v4730_v31 = vpop.f32.mrf.mxu0 }
 0x3b8   :  { %5360 = vrsqrt.f32 %v1315_v24  ;;  %v1308_v34 = vmul.f32 0.125, %v4729_v48 }
 0x3b9   :  { %v4731_v35 = vpop.f32.mrf.mxu0 }
 0x3ba   :  { %v1316_v40 = vadd.f32 1e-05, %v1308_v34  ;;  %v4732_v42 = vadd.f32 %v4731_v35, %v4730_v31  ;;  %v6427_v31 = vld [vmem:[%s7901_s3 + $0x68] sm:$0xff]  ;;  %v6433_v35 = vld [vmem:[%s7901_s3 + $0xe0] sm:$0xff] }
 0x3bb   :  { %v4733_v53 = vpop.f32.mrf.mxu0 }
 0x3bc   :  { %5362 = vrsqrt.f32 %v1316_v40  ;;  %v1309_v43 = vmul.f32 0.125, %v4732_v42 }
 0x3bd   :  { %v4734_v44 = vpop.f32.mrf.mxu0 }
 0x3be   :  { %v1317_v46 = vadd.f32 1e-05, %v1309_v43  ;;  %v4735_v47 = vadd.f32 %v4734_v44, %v4733_v53  ;;  %v6439_v53 = vld [vmem:[%s7901_s3 + $0x60] sm:$0xff]  ;;  %v6446_v44 = vld [vmem:[%s7901_s3 + $0xd8] sm:$0xff] }
 0x3c0   :  { %5364 = vrsqrt.f32 %v1317_v46  ;;  %v1310_v2 = vmul.f32 0.125, %v4735_v47  ;;  %v4736_v7 = vpop.f32.mrf.mxu0 }
 0x3c2   :  { %v1318_v6 = vadd.f32 1e-05, %v1310_v2  ;;  %v4737_v12 = vpop.f32.mrf.mxu0  ;;  %v6453_v2 = vld [vmem:[%s7901_s3 + $0x58] sm:$0xff] }
 0x3c3   :  { %v4738_v0 = vadd.f32 %v4737_v12, %v4736_v7  ;;  %v6459_v7 = vld [vmem:[%s7901_s3 + $0xd0] sm:$0xff] }
 0x3c4   :  { %5366 = vrsqrt.f32 %v1318_v6  ;;  %v4739_v63 = vpop.f32.mrf.mxu0 }
 0x3c5   :  { %v5361_v16 = vpop.eup %5360  ;;  %v1311_v49 = vmul.f32 0.125, %v4738_v0  ;;  %v6465_v0 = vld [vmem:[%s7901_s3 + $0x50] sm:$0xff] }
 0x3c6   :  { %v4740_v56 = vpop.f32.mrf.mxu0  ;;  %4416 = vmatmul.mubr.msk.f32.vlgmr.msra.gmra.mxu1 %vm1032_vm0, %v5361_v16 }
 0x3c7   :  { %v1319_v57 = vadd.f32 1e-05, %v1311_v49  ;;  %v4741_v51 = vadd.f32 %v4740_v56, %v4739_v63  ;;  %1425 = vmatprep.mubr.f32.mxu1 %v7922_v38  ;;  %4749 = vmatpush3.msra.mxu1 %v6401_v15  ;;  %v6472_v63 = vld [vmem:[%s7901_s3 + $0xc8] sm:$0xff]  ;;  %v6485_v56 = vld [vmem:[%s7901_s3 + $0xc0] sm:$0xff] }
 0x3c8   :  { %v4742_v50 = vpop.f32.mrf.mxu0  ;;  %4750 = vmatprep.subr.mxu1 %v6407_v17  ;;  %v6479_v49 = vld [vmem:[%s7901_s3 + $0x48] sm:$0xff] }
 0x3c9   :  { %v5363_v62 = vpop.eup %5362  ;;  %5368 = vrsqrt.f32 %v1319_v57  ;;  %v1312_v19 = vmul.f32 0.125, %v4741_v51  ;;  %4751 = vmatpush3.msra.mxu1 %v6413_v20  ;;  %v6491_v57 = vld [vmem:[%s7901_s3 + $0x40] sm:$0xff] }
 0x3ca   :  { %v4743_v21 = vpop.f32.mrf.mxu0  ;;  %4417 = vmatmul.mubr.msk.f32.gmra.mxu1 %vm1032_vm0, %v5363_v62  ;;  %4752 = vmatprep.subr.mxu1 %v6420_v23  ;;  %v6505_v62 = vld [vmem:[%s7901_s3 + $0x38] sm:$0xff] }
 0x3cb   :  { %v1320_v24 = vadd.f32 1e-05, %v1312_v19  ;;  %v4744_v48 = vadd.f32 %v4743_v21, %v4742_v50  ;;  %1431 = vmatprep.mubr.f32.mxu1 %v7922_v38  ;;  %4753 = vmatpush3.msra.mxu1 %v6427_v31  ;;  %v6497_v50 = vld [vmem:[%s7901_s3 + $0xb8] sm:$0xff]  ;;  %v6511_v19 = vld [vmem:[%s7901_s3 + $0xb0] sm:$0xff] }
 0x3cc   :  { %v4745_v34 = vpop.f32.mrf.mxu0  ;;  %4754 = vmatprep.subr.mxu1 %v6433_v35 }
 0x3cd   :  { %v5365_v40 = vpop.eup %5364  ;;  %5370 = vrsqrt.f32 %v1320_v24  ;;  %v1313_v42 = vmul.f32 0.125, %v4744_v48  ;;  %4755 = vmatpush3.msra.mxu1 %v6439_v53  ;;  %v6517_v24 = vld [vmem:[%s7901_s3 + $0x30] sm:$0xff]  ;;  %v6524_v48 = vld [vmem:[%s7901_s3 + $0xa8] sm:$0xff] }
 0x3ce   :  { %v4746_v43 = vpop.f32.mrf.mxu0  ;;  %4418 = vmatmul.mubr.msk.f32.gmra.mxu1 %vm1032_vm0, %v5365_v40  ;;  %4756 = vmatprep.subr.mxu1 %v6446_v44  ;;  %v6537_v40 = vld [vmem:[%s7901_s3 + $0xa0] sm:$0xff] }
 0x3cf   :  { %v1321_v46 = vadd.f32 1e-05, %v1313_v42  ;;  %v4747_v47 = vadd.f32 %v4746_v43, %v4745_v34  ;;  %1437 = vmatprep.mubr.f32.mxu1 %v7922_v38  ;;  %4757 = vmatpush3.msra.mxu1 %v6453_v2  ;;  %v6531_v34 = vld [vmem:[%s7901_s3 + $0x28] sm:$0xff]  ;;  %v6543_v43 = vld [vmem:[%s7901_s3 + $0x20] sm:$0xff] }
 0x3d0   :  { %4758 = vmatprep.subr.mxu1 %v6459_v7 }
 0x3d1   :  { %v5367_v6 = vpop.eup %5366  ;;  %5372 = vrsqrt.f32 %v1321_v46  ;;  %v1314_v12 = vmul.f32 0.125, %v4747_v47  ;;  %4759 = vmatpush3.msra.mxu1 %v6465_v0  ;;  %v6550_v46 = vld [vmem:[%s7901_s3 + $0x98] sm:$0xff] }
 0x3d2   :  { %4419 = vmatmul.mubr.msk.f32.gmra.mxu1 %vm1032_vm0, %v5367_v6  ;;  %4760 = vmatprep.subr.mxu1 %v6472_v63  ;;  %v6557_v47 = vld [vmem:[%s7901_s3 + $0x18] sm:$0xff]  ;;  %v6563_v6 = vld [vmem:[%s7901_s3 + $0x90] sm:$0xff] }
 0x3d3   :  { %v1322_v16 = vadd.f32 1e-05, %v1314_v12  ;;  %1443 = vmatprep.mubr.f32.mxu1 %v7922_v38  ;;  %4761 = vmatpush3.msra.mxu1 %v6479_v49 }
 0x3d4   :  { %4762 = vmatprep.subr.mxu1 %v6485_v56 }
 0x3d5   :  { %5374 = vrsqrt.f32 %v1322_v16  ;;  %4763 = vmatpush3.msra.mxu1 %v6491_v57  ;;  %v6569_v16 = vld [vmem:[%s7901_s3 + $0x10] sm:$0xff] }
 0x3d6   :  { %v5369_v51 = vpop.eup %5368  ;;  %4764 = vmatprep.subr.mxu1 %v6497_v50 }
 0x3d7   :  { %4420 = vmatmul.mubr.msk.f32.gmra.mxu1 %vm1032_vm0, %v5369_v51  ;;  %v6576_v51 = vld [vmem:[%s7901_s3 + $0x88] sm:$0xff] }
 0x3d8   :  { %1449 = vmatprep.mubr.f32.mxu1 %v7922_v38  ;;  %4765 = vmatpush3.msra.mxu1 %v6505_v62 }
 0x3d9   :  { %4766 = vmatprep.subr.mxu1 %v6511_v19 }
 0x3da   :  { %v5371_v21 = vpop.eup %5370  ;;  %4767 = vmatpush3.msra.mxu1 %v6517_v24 }
 0x3db   :  { %4421 = vmatmul.mubr.msk.f32.gmra.mxu1 %vm1032_vm0, %v5371_v21  ;;  %4768 = vmatprep.subr.mxu1 %v6524_v48  ;;  %v6582_v21 = vld [vmem:[%s7901_s3 + $0x8] sm:$0xff] }
 0x3dc   :  { %1455 = vmatprep.mubr.f32.mxu1 %v7922_v38  ;;  %4769 = vmatpush3.msra.mxu1 %v6531_v34 }
 0x3dd   :  { %4770 = vmatprep.subr.mxu1 %v6537_v40 }
 0x3de   :  { %v5373_v42 = vpop.eup %5372  ;;  %4771 = vmatpush3.msra.mxu1 %v6543_v43 }
 0x3df   :  { %4422 = vmatmul.mubr.msk.f32.gmra.mxu1 %vm1032_vm0, %v5373_v42  ;;  %4772 = vmatprep.subr.mxu1 %v6550_v46  ;;  %v6588_v42 = vld [vmem:[%s7901_s3 + $0x80] sm:$0xff] }
 0x3e0   :  { %1461 = vmatprep.mubr.f32.mxu1 %v7922_v38  ;;  %4773 = vmatpush3.msra.mxu1 %v6557_v47  ;;  %8002 = vst [vmem:[#allocation16_spill] sm:$0xff] %v6588_v42  ;;  %v6600_v38 = vld [vmem:[%s7902_s4 + $0x38] sm:$0xff] }
 0x3e1   :  { %4774 = vmatprep.subr.mxu1 %v6563_v6  ;;  %8004 = vst [vmem:[#allocation18_spill] sm:$0xff] %v6600_v38 }
 0x3e2   :  { %v5375_v12 = vpop.eup %5374  ;;  %4775 = vmatpush3.msra.mxu1 %v6569_v16 }
 0x3e3   :  { %4423 = vmatmul.mubr.msk.f32.gmra.mxu1 %vm1032_vm0, %v5375_v12  ;;  %4776 = vmatprep.subr.mxu1 %v6576_v51  ;;  %v6594_v12 = vld [vmem:[%s7901_s3] sm:$0xff] }
 0x3e4   :  { %4777 = vmatpush3.msra.mxu1 %v6582_v21  ;;  %8003 = vst [vmem:[#allocation17_spill] sm:$0xff] %v6594_v12 }
 0x3e5   :  { %4778 = vmatprep.subr.mxu1 %v6588_v42 }
 0x3e6   :  { %4779 = vmatpush3.msra.mxu1 %v6594_v12 }
 0x3e7   :  { %2118 = vmatprep.subr.mxu1 %v6600_v38 }
 0x486   :  { %v1421_v29 = vpop.f32.mrf.mxu1 }
 0x487   :  { %v1479_v3 = vmul.f32 %v6616_v37, %v1421_v29  ;;  %v6632_v29 = vrot.slane %v917_v22, %v8007_v28 }
 0x488   :  { %v1423_v26 = vpop.f32.mrf.mxu1 }
 0x489   :  { %v1480_v25 = vmul.f32 %v6613_v36, %v1423_v26  ;;  %v1495_v26 = vmul.f32 %v1479_v3, %v6317_v27 }
 0x48a   :  { %v1427_v38 = vpop.f32.mrf.mxu1 }
 0x48b   :  { %v1481_v59 = vmul.f32 %v6616_v37, %v1427_v38  ;;  %v1496_v4 = vmul.f32 %v1480_v25, %v6320_v30 }
 0x48c   :  { %v1429_v14 = vpop.f32.mrf.mxu1 }
 0x48d   :  { %v1497_v33 = vmul.f32 %v1481_v59, %v6327_v39  ;;  %v1482_v11 = vmul.f32 %v6613_v36, %v1429_v14  ;;  %v1523_v30 = vadd.f32 %v6626_v61, %v1496_v4  ;;  %v1522_v59 = vadd.f32 %v6632_v29, %v1495_v26 }
 0x48e   :  { %v1433_v8 = vpop.f32.mrf.mxu1 }
 0x48f   :  { %v1498_v12 = vmul.f32 %v1482_v11, %v6330_v41  ;;  %v1524_v38 = vadd.f32 %v6632_v29, %v1497_v33  ;;  %v1483_v14 = vmul.f32 %v6616_v37, %v1433_v8 }
 0x490   :  { %v1435_v42 = vpop.f32.mrf.mxu1 }
 0x491   :  { %v1525_v25 = vadd.f32 %v6626_v61, %v1498_v12  ;;  %v1484_v32 = vmul.f32 %v6613_v36, %v1435_v42  ;;  %v1538_v39 = vpack.c.bf16 %v1524_v38, %v1522_v59  ;;  %v1499_v12 = vmul.f32 %v1483_v14, %v6337_v58 }
 0x492   :  { %v1439_v3 = vpop.f32.mrf.mxu1 }
 0x493   :  { %v1485_v22 = vmul.f32 %v6616_v37, %v1439_v3  ;;  %v1539_v27 = vpack.c.bf16 %v1525_v25, %v1523_v30  ;;  %v1500_v11 = vmul.f32 %v1484_v32, %v6340_v45  ;;  %v1526_v32 = vadd.f32 %v6632_v29, %v1499_v12 }
 0x494   :  { %v1441_v28 = vpop.f32.mrf.mxu1 }
 0x495   :  { %v1501_v41 = vmul.f32 %v1485_v22, %v6347_v13  ;;  %v1486_v4 = vmul.f32 %v6613_v36, %v1441_v28  ;;  %1749 = vmatprep.mubr.bf16.mxu0 %v1539_v27  ;;  %v1527_v26 = vadd.f32 %v6626_v61, %v1500_v11 }
 0x496   :  { %1750 = vmatmul.mubr.bf16.vlgmr.msra.gmra.mxu0 %v1538_v39 }
 0x497   :  { %v1502_v42 = vmul.f32 %v1486_v4, %v6350_v60  ;;  %v1445_v33 = vpop.f32.mrf.mxu1  ;;  %4805 = vmatpush3.msra.mxu0 %v6401_v15  ;;  %v1528_v8 = vadd.f32 %v6632_v29, %v1501_v41 }
 0x498   :  { %4806 = vmatprep.subr.mxu0 %v6407_v17  ;;  %v1487_v60 = vmul.f32 %v6616_v37, %v1445_v33 }
 0x499   :  { %v1529_v45 = vadd.f32 %v6626_v61, %v1502_v42  ;;  %v1447_v13 = vpop.f32.mrf.mxu1  ;;  %4807 = vmatpush3.msra.mxu0 %v6413_v20  ;;  %v1540_v38 = vpack.c.bf16 %v1528_v8, %v1526_v32 }
 0x49a   :  { %v1488_v58 = vmul.f32 %v6613_v36, %v1447_v13  ;;  %4808 = vmatprep.subr.mxu0 %v6420_v23 }
 0x49b   :  { %v1451_v15 = vpop.f32.mrf.mxu1  ;;  %v1541_v28 = vpack.c.bf16 %v1529_v45, %v1527_v26  ;;  %4809 = vmatpush3.msra.mxu0 %v6427_v31  ;;  %v1503_v31 = vmul.f32 %v1487_v60, %v6357_v5 }
 0x49c   :  { %v1489_v17 = vmul.f32 %v6616_v37, %v1451_v15  ;;  %4810 = vmatprep.subr.mxu0 %v6433_v35  ;;  %v1504_v20 = vmul.f32 %v1488_v58, %v6360_v52 }
 0x49d   :  { %v1453_v30 = vpop.f32.mrf.mxu1  ;;  %1759 = vmatprep.mubr.bf16.mxu0 %v1541_v28  ;;  %4811 = vmatpush3.msra.mxu0 %v6439_v53  ;;  %v1530_v5 = vadd.f32 %v6632_v29, %v1503_v31 }
 0x49e   :  { %v1505_v25 = vmul.f32 %v1489_v17, %v6367_v55  ;;  %v1490_v23 = vmul.f32 %v6613_v36, %v1453_v30  ;;  %1760 = vmatmul.mubr.bf16.gmra.mxu0 %v1540_v38  ;;  %4812 = vmatprep.subr.mxu0 %v6446_v44  ;;  %v1531_v52 = vadd.f32 %v6626_v61, %v1504_v20 }
 0x49f   :  { %v1457_v59 = vpop.f32.mrf.mxu1  ;;  %4813 = vmatpush3.msra.mxu0 %v6453_v2 }
 0x4a0   :  { %v1506_v35 = vmul.f32 %v1490_v23, %v6370_v9  ;;  %4814 = vmatprep.subr.mxu0 %v6459_v7  ;;  %v1532_v53 = vadd.f32 %v6632_v29, %v1505_v25  ;;  %v1491_v2 = vmul.f32 %v6616_v37, %v1457_v59 }
 0x4a1   :  { %v1459_v14 = vpop.f32.mrf.mxu1  ;;  %4815 = vmatpush3.msra.mxu0 %v6465_v0 }
 0x4a2   :  { %v1533_v55 = vadd.f32 %v6626_v61, %v1506_v35  ;;  %v1492_v44 = vmul.f32 %v6613_v36, %v1459_v14  ;;  %4816 = vmatprep.subr.mxu0 %v6472_v63  ;;  %v1542_v22 = vpack.c.bf16 %v1532_v53, %v1530_v5 }
 0x4a3   :  { %v1463_v9 = vpop.f32.mrf.mxu1  ;;  %4817 = vmatpush3.msra.mxu0 %v6479_v49  ;;  %v1507_v49 = vmul.f32 %v1491_v2, %v6377_v54 }
 0x4a4   :  { %v1493_v7 = vmul.f32 %v6616_v37, %v1463_v9  ;;  %v1543_v3 = vpack.c.bf16 %v1533_v55, %v1531_v52  ;;  %4818 = vmatprep.subr.mxu0 %v6485_v56  ;;  %v1508_v27 = vmul.f32 %v1492_v44, %v6380_v18 }
 0x4a5   :  { %v1465_v0 = vpop.f32.mrf.mxu1  ;;  %4819 = vmatpush3.msra.mxu0 %v6491_v57  ;;  %v1534_v57 = vadd.f32 %v6632_v29, %v1507_v49 }
 0x4a6   :  { %v1509_v63 = vmul.f32 %v1493_v7, %v6387_v1  ;;  %v1494_v39 = vmul.f32 %v6613_v36, %v1465_v0  ;;  %1769 = vmatprep.mubr.bf16.mxu0 %v1543_v3  ;;  %4820 = vmatprep.subr.mxu0 %v6497_v50  ;;  %v1535_v18 = vadd.f32 %v6626_v61, %v1508_v27  ;;  %v8009_v50 = vld [vmem:[#allocation17_spill] sm:$0xff] }
 0x4a7   :  { %1770 = vmatmul.mubr.bf16.gmra.mxu0 %v1542_v22 }
 0x4a8   :  { %v1510_v37 = vmul.f32 %v1494_v39, %v6390_v10  ;;  %4821 = vmatpush3.msra.mxu0 %v6505_v62  ;;  %v1536_v56 = vadd.f32 %v6632_v29, %v1509_v63  ;;  %v918_v62 = vld [vmem:[#allocation8] sm:$0x3] }
 0x4a9   :  { %4822 = vmatprep.subr.mxu0 %v6511_v19  ;;  %v8010_v19 = vld [vmem:[#allocation23_spill] sm:$0xff] }
 0x4aa   :  { %v1537_v1 = vadd.f32 %v6626_v61, %v1510_v37  ;;  %4823 = vmatpush3.msra.mxu0 %v6517_v24  ;;  %v1544_v10 = vpack.c.bf16 %v1536_v56, %v1534_v57  ;;  %v8008_v61 = vld [vmem:[#allocation16_spill] sm:$0xff]  ;;  %v6707_v24 = vrot.slane %v918_v62, %v8010_v19 }
 0x4ab   :  { %4824 = vmatprep.subr.mxu0 %v6524_v48  ;;  %v8011_v48 = vld [vmem:[#allocation24_spill] sm:$0xff] }
 0x4ac   :  { %v1545_v54 = vpack.c.bf16 %v1537_v1, %v1535_v18  ;;  %4825 = vmatpush3.msra.mxu0 %v6531_v34  ;;  %v6710_v34 = vrot.slane %v918_v62, %v8011_v48 }
 0x4ad   :  { %4826 = vmatprep.subr.mxu0 %v6537_v40 }
 0x4ae   :  { %1779 = vmatprep.mubr.bf16.mxu0 %v1545_v54  ;;  %4827 = vmatpush3.msra.mxu0 %v6543_v43 }
 0x4af   :  { %1780 = vmatmul.mubr.bf16.gmra.mxu0 %v1544_v10  ;;  %4828 = vmatprep.subr.mxu0 %v6550_v46 }
 0x4b0   :  { %4829 = vmatpush3.msra.mxu0 %v6557_v47 }
 0x4b1   :  { %4830 = vmatprep.subr.mxu0 %v6563_v6 }
 0x4b2   :  { %4831 = vmatpush3.msra.mxu0 %v6569_v16 }
 0x4b3   :  { %4832 = vmatprep.subr.mxu0 %v6576_v51 }
 0x4b4   :  { %4833 = vmatpush3.msra.mxu0 %v6582_v21 }
 0x4b5   :  { %4834 = vmatprep.subr.mxu0 %v8008_v61 }
 0x4b6   :  { %4835 = vmatpush3.msra.mxu0 %v8009_v50 }
 0x556   :  { %v1751_v40 = vpop.f32.mrf.mxu0 }
 0x557   :  { %v6713_v43 = vadd.f32 %v1751_v40, %v6707_v24 }
 0x558   :  { %v1753_v46 = vpop.f32.mrf.mxu0 }
 0x559   :  { %v4456_v47 = vmul.f32 -1.442695, %v6713_v43  ;;  %v6717_v6 = vadd.f32 %v1753_v46, %v6710_v34 }
 0x55a   :  { %v1755_v16 = vpop.f32.mrf.mxu0 }
 0x55b   :  { %5376 = vpow2.f32 %v4456_v47  ;;  %v4457_v51 = vmul.f32 -1.442695, %v6717_v6  ;;  %v6721_v21 = vadd.f32 %v1755_v16, %v6707_v24 }
 0x55c   :  { %v1757_v36 = vpop.f32.mrf.mxu0 }
 0x55d   :  { %5378 = vpow2.f32 %v4457_v51  ;;  %v4458_v29 = vmul.f32 -1.442695, %v6721_v21  ;;  %v6725_v11 = vadd.f32 %v1757_v36, %v6710_v34 }
 0x55e   :  { %v1761_v41 = vpop.f32.mrf.mxu0 }
 0x55f   :  { %5380 = vpow2.f32 %v4458_v29  ;;  %v4459_v4 = vmul.f32 -1.442695, %v6725_v11  ;;  %v6729_v12 = vadd.f32 %v1761_v41, %v6707_v24 }
 0x560   :  { %v1763_v42 = vpop.f32.mrf.mxu0 }
 0x561   :  { %5382 = vpow2.f32 %v4459_v4  ;;  %v4460_v33 = vmul.f32 -1.442695, %v6729_v12  ;;  %v6733_v8 = vadd.f32 %v1763_v42, %v6710_v34 }
 0x562   :  { %v1765_v26 = vpop.f32.mrf.mxu0 }
 0x563   :  { %5384 = vpow2.f32 %v4460_v33  ;;  %v4461_v45 = vmul.f32 -1.442695, %v6733_v8  ;;  %v6737_v13 = vadd.f32 %v1765_v26, %v6707_v24 }
 0x564   :  { %v1767_v32 = vpop.f32.mrf.mxu0 }
 0x565   :  { %5386 = vpow2.f32 %v4461_v45  ;;  %v4462_v58 = vmul.f32 -1.442695, %v6737_v13  ;;  %v6741_v60 = vadd.f32 %v1767_v32, %v6710_v34  ;;  %v8012_v45 = vld [vmem:[#allocation25_spill] sm:$0xff] }
 0x567   :  { %5388 = vpow2.f32 %v4462_v58  ;;  %v4463_v15 = vmul.f32 -1.442695, %v6741_v60  ;;  %v1771_v28 = vpop.f32.mrf.mxu0 }
 0x568   :  { %v5377_v17 = vpop.eup %5376  ;;  %v6745_v38 = vadd.f32 %v1771_v28, %v6707_v24 }
 0x569   :  { %v1838_v30 = vadd.f32 1.0, %v5377_v17  ;;  %5390 = vpow2.f32 %v4463_v15  ;;  %v1773_v20 = vpop.f32.mrf.mxu0  ;;  %v8014_v15 = vld [vmem:[#allocation26_spill] sm:$0xff] }
 0x56a   :  { %v5379_v25 = vpop.eup %5378  ;;  %v4464_v23 = vmul.f32 -1.442695, %v6745_v38  ;;  %v6749_v31 = vadd.f32 %v1773_v20, %v6710_v34 }
 0x56b   :  { %5392 = vrcp.f32 %v1838_v30  ;;  %v1839_v59 = vadd.f32 1.0, %v5379_v25  ;;  %v1775_v35 = vpop.f32.mrf.mxu0 }
 0x56c   :  { %v5381_v53 = vpop.eup %5380  ;;  %5394 = vpow2.f32 %v4464_v23  ;;  %v4465_v14 = vmul.f32 -1.442695, %v6749_v31  ;;  %v6753_v52 = vadd.f32 %v1775_v35, %v6707_v24 }
 0x56d   :  { %5396 = vrcp.f32 %v1839_v59  ;;  %v1840_v55 = vadd.f32 1.0, %v5381_v53  ;;  %v1777_v44 = vpop.f32.mrf.mxu0  ;;  %v8016_v59 = vld [vmem:[#allocation27_spill] sm:$0xff] }
 0x56e   :  { %v5383_v5 = vpop.eup %5382  ;;  %5398 = vpow2.f32 %v4465_v14  ;;  %v4466_v2 = vmul.f32 -1.442695, %v6753_v52  ;;  %v6757_v9 = vadd.f32 %v1777_v44, %v6710_v34 }
 0x56f   :  { %5400 = vrcp.f32 %v1840_v55  ;;  %v1841_v7 = vadd.f32 1.0, %v5383_v5  ;;  %v1781_v3 = vpop.f32.mrf.mxu0  ;;  %v8018_v55 = vld [vmem:[#allocation28_spill] sm:$0xff] }
 0x570   :  { %v5385_v0 = vpop.eup %5384  ;;  %5402 = vpow2.f32 %v4466_v2  ;;  %v4467_v22 = vmul.f32 -1.442695, %v6757_v9  ;;  %v6761_v27 = vadd.f32 %v1781_v3, %v6707_v24  ;;  %v6804_v5 = vld [vmem:[%s7902_s4 + $0x28] sm:$0xff] }
 0x571   :  { %5404 = vrcp.f32 %v1841_v7  ;;  %v1842_v63 = vadd.f32 1.0, %v5385_v0  ;;  %v1783_v39 = vpop.f32.mrf.mxu0 }
 0x572   :  { %v5387_v49 = vpop.eup %5386  ;;  %5406 = vpow2.f32 %v4467_v22  ;;  %v4468_v37 = vmul.f32 -1.442695, %v6761_v27  ;;  %v6765_v56 = vadd.f32 %v1783_v39, %v6710_v34  ;;  %v6819_v22 = vld [vmem:[%s7902_s4 + $0x18] sm:$0xff] }
 0x573   :  { %5408 = vrcp.f32 %v1842_v63  ;;  %v1843_v18 = vadd.f32 1.0, %v5387_v49  ;;  %v1785_v1 = vpop.f32.mrf.mxu0  ;;  %v8020_v63 = vld [vmem:[#allocation29_spill] sm:$0xff] }
 0x574   :  { %v5389_v57 = vpop.eup %5388  ;;  %5410 = vpow2.f32 %v4468_v37  ;;  %v4469_v54 = vmul.f32 -1.442695, %v6765_v56  ;;  %v6769_v10 = vadd.f32 %v1785_v1, %v6707_v24  ;;  %v6828_v49 = vld [vmem:[%s7902_s4 + $0x10] sm:$0xff] }
 0x575   :  { %5412 = vrcp.f32 %v1843_v18  ;;  %v1844_v61 = vadd.f32 1.0, %v5389_v57  ;;  %v1787_v50 = vpop.f32.mrf.mxu0  ;;  %v8022_v57 = vld [vmem:[#allocation30_spill] sm:$0xff] }
 0x576   :  { %v5391_v62 = vpop.eup %5390  ;;  %5414 = vpow2.f32 %v4469_v54  ;;  %v4470_v40 = vmul.f32 -1.442695, %v6769_v10  ;;  %v6773_v46 = vadd.f32 %v1787_v50, %v6710_v34 }
 0x577   :  { %5416 = vrcp.f32 %v1844_v61  ;;  %v1845_v47 = vadd.f32 1.0, %v5391_v62  ;;  %v6838_v61 = vld [vmem:[%s7902_s4 + $0x8] sm:$0xff] }
 0x578   :  { %v5393_v16 = vpop.eup %5392  ;;  %5418 = vpow2.f32 %v4470_v40  ;;  %v4471_v51 = vmul.f32 -1.442695, %v6773_v46 }
 0x579   :  { %v5395_v36 = vpop.eup %5394  ;;  %5420 = vrcp.f32 %v1845_v47  ;;  %v1886_v29 = vmul.f32 %v5393_v16, %v6713_v43  ;;  %v8024_v47 = vld [vmem:[#allocation18_spill] sm:$0xff] }
 0x57a   :  { %v5397_v24 = vpop.eup %5396  ;;  %v1846_v41 = vadd.f32 1.0, %v5395_v36  ;;  %5422 = vpow2.f32 %v4471_v51  ;;  %v8025_v51 = vld [vmem:[#allocation31_spill] sm:$0xff] }
 0x57b   :  { %v5399_v4 = vpop.eup %5398  ;;  %v1887_v42 = vmul.f32 %v5397_v24, %v6717_v6  ;;  %v6782_v28 = vadd.f32 %v1886_v29, %v8014_v15 }
 0x57c   :  { %v5401_v33 = vpop.eup %5400  ;;  %5424 = vrcp.f32 %v1846_v41  ;;  %v1847_v34 = vadd.f32 1.0, %v5399_v4 }
 0x57d   :  { %v5403_v26 = vpop.eup %5402  ;;  %v6779_v32 = vadd.f32 %v1887_v42, %v8012_v45  ;;  %8015 = vst [vmem:[#allocation21_spill] sm:$0xff] %v6782_v28  ;;  %v1888_v17 = vmul.f32 %v5401_v33, %v6721_v21  ;;  %v6794_v21 = vld [vmem:[%s7902_s4 + $0x30] sm:$0xff] }
 0x57e   :  { %v5405_v58 = vpop.eup %5404  ;;  %5426 = vrcp.f32 %v1847_v34  ;;  %v1848_v43 = vadd.f32 1.0, %v5403_v26  ;;  %v8029_v33 = vld [vmem:[#allocation33_spill] sm:$0xff] }
 0x57f   :  { %8013 = vst [vmem:[#allocation20_spill] sm:$0xff] %v6779_v32  ;;  %v5407_v30 = vpop.eup %5406  ;;  %v1889_v20 = vmul.f32 %v5405_v58, %v6725_v11  ;;  %2021 = vmatprep.mubr.f32.mxu1 %v6779_v32  ;;  %v6799_v44 = vadd.f32 %v1888_v17, %v8018_v55  ;;  %v8031_v58 = vld [vmem:[#allocation34_spill] sm:$0xff] }
 0x580   :  { %v5409_v6 = vpop.eup %5408  ;;  %5428 = vrcp.f32 %v1848_v43  ;;  %v1849_v25 = vadd.f32 1.0, %v5407_v30  ;;  %2022 = vmatmul.mubr.f32.vlgmr.msra.gmra.mxu1 %v6782_v28 }
 0x581   :  { %v5411_v23 = vpop.eup %5410  ;;  %v6789_v35 = vadd.f32 %v1889_v20, %v8016_v59  ;;  %2119 = vmatpush1.msra.mxu1 %v6794_v21  ;;  %v1890_v11 = vmul.f32 %v5409_v6, %v6729_v12  ;;  %8019 = vst [vmem:[#allocation15_spill] sm:$0xff] %v6799_v44  ;;  %v6812_v12 = vld [vmem:[%s7902_s4 + $0x20] sm:$0xff]  ;;  %v8035_v6 = vld [vmem:[#allocation36_spill] sm:$0xff] }
 0x582   :  { %v5413_v53 = vpop.eup %5412  ;;  %5430 = vrcp.f32 %v1849_v25  ;;  %v1850_v14 = vadd.f32 1.0, %v5411_v23  ;;  %2120 = vmatprep.subr.mxu1 %v6804_v5 }
 0x583   :  { %8017 = vst [vmem:[#allocation22_spill] sm:$0xff] %v6789_v35  ;;  %v5415_v2 = vpop.eup %5414  ;;  %v1891_v7 = vmul.f32 %v5413_v53, %v6733_v8  ;;  %2026 = vmatprep.mubr.f32.mxu1 %v6789_v35  ;;  %2121 = vmatpush1.msra.mxu1 %v6812_v12  ;;  %v6833_v54 = vadd.f32 %v1890_v11, %v8022_v57 }
 0x584   :  { %v5417_v3 = vpop.eup %5416  ;;  %5432 = vrcp.f32 %v1850_v14  ;;  %v1851_v0 = vadd.f32 1.0, %v5415_v2  ;;  %2027 = vmatmul.mubr.f32.gmra.mxu1 %v6799_v44  ;;  %2122 = vmatprep.subr.mxu1 %v6819_v22  ;;  %v8039_v14 = vld [vmem:[#allocation38_spill] sm:$0xff] }
 0x585   :  { %v5419_v8 = vpop.eup %5418  ;;  %v6823_v39 = vadd.f32 %v1891_v7, %v8020_v63  ;;  %2123 = vmatpush1.msra.mxu1 %v6828_v49  ;;  %v1892_v18 = vmul.f32 %v5417_v3, %v6737_v13  ;;  %8023 = vst [vmem:[#allocation17_spill] sm:$0xff] %v6833_v54  ;;  %v6846_v13 = vld [vmem:[%s7902_s4] sm:$0xff]  ;;  %v8043_v7 = vld [vmem:[#allocation40_spill] sm:$0xff] }
 0x586   :  { %v5421_v37 = vpop.eup %5420  ;;  %5434 = vrcp.f32 %v1851_v0  ;;  %v1852_v1 = vadd.f32 1.0, %v5419_v8  ;;  %2124 = vmatprep.subr.mxu1 %v6838_v61 }
 0x587   :  { %8021 = vst [vmem:[#allocation16_spill] sm:$0xff] %v6823_v39  ;;  %v5423_v50 = vpop.eup %5422  ;;  %v1893_v62 = vmul.f32 %v5421_v37, %v6741_v60  ;;  %2031 = vmatprep.mubr.f32.mxu1 %v6823_v39  ;;  %2125 = vmatpush1.msra.mxu1 %v6846_v13  ;;  %v8027_v60 = vld [vmem:[#allocation32_spill] sm:$0xff] }
 0x588   :  { %5436 = vrcp.f32 %v1852_v1  ;;  %v1853_v40 = vadd.f32 1.0, %v5423_v50  ;;  %2032 = vmatmul.mubr.f32.gmra.mxu1 %v6833_v54  ;;  %2416 = vmatprep.subr.mxu1 %v8024_v47  ;;  %v6855_v24 = vadd.f32 %v1892_v18, %v8027_v60 }
 0x589   :  { %v5425_v16 = vpop.eup %5424  ;;  %v6852_v36 = vadd.f32 %v1893_v62, %v8025_v51 }
 0x58a   :  { %5438 = vrcp.f32 %v1853_v40  ;;  %8028 = vst [vmem:[#allocation26_spill] sm:$0xff] %v6855_v24  ;;  %v1894_v41 = vmul.f32 %v5425_v16, %v6745_v38 }
 0x58b   :  { %8026 = vst [vmem:[#allocation25_spill] sm:$0xff] %v6852_v36  ;;  %v5427_v29 = vpop.eup %5426  ;;  %2036 = vmatprep.mubr.f32.mxu1 %v6852_v36 }
 0x58c   :  { %v1895_v4 = vmul.f32 %v5427_v29, %v6749_v31  ;;  %2037 = vmatmul.mubr.f32.gmra.mxu1 %v6855_v24  ;;  %v6866_v15 = vadd.f32 %v1894_v41, %v8031_v58  ;;  %v8033_v31 = vld [vmem:[#allocation35_spill] sm:$0xff] }
 0x58d   :  { %v5429_v42 = vpop.eup %5428 }
 0x58e   :  { %v6862_v34 = vadd.f32 %v1895_v4, %v8029_v33  ;;  %v1896_v45 = vmul.f32 %v5429_v42, %v6753_v52  ;;  %8032 = vst [vmem:[#allocation28_spill] sm:$0xff] %v6866_v15 }
 0x58f   :  { %v5431_v26 = vpop.eup %5430 }
 0x590   :  { %8030 = vst [vmem:[#allocation27_spill] sm:$0xff] %v6862_v34  ;;  %v1897_v17 = vmul.f32 %v5431_v26, %v6757_v9  ;;  %2041 = vmatprep.mubr.f32.mxu1 %v6862_v34  ;;  %v6876_v25 = vadd.f32 %v1896_v45, %v8035_v6  ;;  %v8037_v9 = vld [vmem:[#allocation37_spill] sm:$0xff] }
 0x591   :  { %v5433_v38 = vpop.eup %5432  ;;  %2042 = vmatmul.mubr.f32.gmra.mxu1 %v6866_v15 }
 0x592   :  { %v6872_v43 = vadd.f32 %v1897_v17, %v8033_v31  ;;  %v1898_v20 = vmul.f32 %v5433_v38, %v6761_v27  ;;  %8036 = vst [vmem:[#allocation30_spill] sm:$0xff] %v6876_v25 }
 0x593   :  { %v5435_v30 = vpop.eup %5434 }
 0x594   :  { %8034 = vst [vmem:[#allocation29_spill] sm:$0xff] %v6872_v43  ;;  %v1899_v52 = vmul.f32 %v5435_v30, %v6765_v56  ;;  %2046 = vmatprep.mubr.f32.mxu1 %v6872_v43  ;;  %v6886_v55 = vadd.f32 %v1898_v20, %v8039_v14  ;;  %v8041_v56 = vld [vmem:[#allocation39_spill] sm:$0xff] }
 0x595   :  { %v5437_v23 = vpop.eup %5436  ;;  %2047 = vmatmul.mubr.f32.gmra.mxu1 %v6876_v25 }
 0x596   :  { %v6882_v59 = vadd.f32 %v1899_v52, %v8037_v9  ;;  %v1900_v11 = vmul.f32 %v5437_v23, %v6769_v10  ;;  %8040 = vst [vmem:[#allocation31_spill] sm:$0xff] %v6886_v55  ;;  %v8045_v10 = vmov 0.0  }
 0x597   :  { %v5439_v53 = vpop.eup %5438 }
 0x598   :  { %8038 = vst [vmem:[#allocation18_spill] sm:$0xff] %v6882_v59  ;;  %v1901_v27 = vmul.f32 %v5439_v53, %v6773_v46  ;;  %2051 = vmatprep.mubr.f32.mxu1 %v6882_v59  ;;  %v6895_v3 = vadd.f32 %v1900_v11, %v8043_v7 }
 0x599   :  { %2052 = vmatmul.mubr.f32.gmra.mxu1 %v6886_v55 }
 0x59a   :  { %v6892_v2 = vadd.f32 %v1901_v27, %v8041_v56  ;;  %8044 = vst [vmem:[#allocation33_spill] sm:$0xff] %v6895_v3 }
 0x59c   :  { %8042 = vst [vmem:[#allocation32_spill] sm:$0xff] %v6892_v2  ;;  %2056 = vmatprep.mubr.f32.mxu1 %v6892_v2 }
 0x59d   :  { %2057 = vmatmul.mubr.f32.gmra.mxu1 %v6895_v3 }
 0x59e   :  { %2158 = vmatprep.mubr.f32.mxu1 %v8045_v10 }
 0x640   :  { %v4780_v0 = vpop.f32.mrf.mxu1 }
 0x642   :  { %v4781_v8 = vpop.f32.mrf.mxu1 }
 0x643   :  { %v4782_v63 = vadd.f32 %v4781_v8, %v4780_v0 }
 0x644   :  { %v4783_v46 = vpop.f32.mrf.mxu1 }
 0x645   :  { %v2062_v37 = vmul.f32 0.125, %v4782_v63 }
 0x646   :  { %v4784_v18 = vpop.f32.mrf.mxu1 }
 0x647   :  { %v4785_v1 = vadd.f32 %v4784_v18, %v4783_v46  ;;  %4474 = vmatmul.mubr.msk.f32.vlgmr.msra.gmra.mxu1 %vm1032_vm0, %v2062_v37 }
 0x648   :  { %v4786_v57 = vpop.f32.mrf.mxu1  ;;  %2164 = vmatprep.mubr.f32.mxu1 %v8045_v10  ;;  %2417 = vmatpush1.msra.mxu1 %v6794_v21 }
 0x649   :  { %v2063_v50 = vmul.f32 0.125, %v4785_v1  ;;  %2418 = vmatprep.subr.mxu1 %v6804_v5 }
 0x64a   :  { %v4787_v62 = vpop.f32.mrf.mxu1  ;;  %2419 = vmatpush1.msra.mxu1 %v6812_v12  ;;  %v8046_v12 = vld [vmem:[#allocation19_spill] sm:$0xff] }
 0x64b   :  { %v4788_v40 = vadd.f32 %v4787_v62, %v4786_v57  ;;  %4475 = vmatmul.mubr.msk.f32.gmra.mxu1 %vm1032_vm0, %v2063_v50  ;;  %2420 = vmatprep.subr.mxu1 %v6819_v22 }
 0x64c   :  { %v4789_v47 = vpop.f32.mrf.mxu1  ;;  %2170 = vmatprep.mubr.f32.mxu1 %v8045_v10  ;;  %2421 = vmatpush1.msra.mxu1 %v6828_v49 }
 0x64d   :  { %v2064_v16 = vmul.f32 0.125, %v4788_v40  ;;  %2422 = vmatprep.subr.mxu1 %v6838_v61 }
 0x64e   :  { %v4790_v21 = vpop.f32.mrf.mxu1  ;;  %2423 = vmatpush1.msra.mxu1 %v6846_v13 }
 0x64f   :  { %v4791_v5 = vadd.f32 %v4790_v21, %v4789_v47  ;;  %4476 = vmatmul.mubr.msk.f32.gmra.mxu1 %vm1032_vm0, %v2064_v16  ;;  %4860 = vmatprep.subr.mxu1 %v8046_v12 }
 0x650   :  { %2176 = vmatprep.mubr.f32.mxu1 %v8045_v10 }
 0x651   :  { %v2065_v51 = vmul.f32 0.125, %v4791_v5  ;;  %v4792_v22 = vpop.f32.mrf.mxu1 }
 0x653   :  { %v4793_v60 = vpop.f32.mrf.mxu1  ;;  %4477 = vmatmul.mubr.msk.f32.gmra.mxu1 %vm1032_vm0, %v2065_v51 }
 0x654   :  { %v4794_v29 = vadd.f32 %v4793_v60, %v4792_v22  ;;  %2182 = vmatprep.mubr.f32.mxu1 %v8045_v10 }
 0x655   :  { %v4795_v49 = vpop.f32.mrf.mxu1 }
 0x656   :  { %v2066_v61 = vmul.f32 0.125, %v4794_v29 }
 0x657   :  { %v4796_v41 = vpop.f32.mrf.mxu1 }
 0x658   :  { %v4797_v4 = vadd.f32 %v4796_v41, %v4795_v49  ;;  %4478 = vmatmul.mubr.msk.f32.gmra.mxu1 %vm1032_vm0, %v2066_v61 }
 0x659   :  { %v4798_v13 = vpop.f32.mrf.mxu1  ;;  %2188 = vmatprep.mubr.f32.mxu1 %v8045_v10 }
 0x65a   :  { %v2067_v42 = vmul.f32 0.125, %v4797_v4 }
 0x65b   :  { %v4799_v33 = vpop.f32.mrf.mxu1 }
 0x65c   :  { %v4800_v26 = vadd.f32 %v4799_v33, %v4798_v13  ;;  %4479 = vmatmul.mubr.msk.f32.gmra.mxu1 %vm1032_vm0, %v2067_v42 }
 0x65d   :  { %v4801_v45 = vpop.f32.mrf.mxu1  ;;  %2194 = vmatprep.mubr.f32.mxu1 %v8045_v10 }
 0x65e   :  { %v2068_v58 = vmul.f32 0.125, %v4800_v26 }
 0x65f   :  { %v4802_v17 = vpop.f32.mrf.mxu1 }
 0x660   :  { %v4803_v38 = vadd.f32 %v4802_v17, %v4801_v45  ;;  %4480 = vmatmul.mubr.msk.f32.gmra.mxu1 %vm1032_vm0, %v2068_v58 }
 0x661   :  { %2200 = vmatprep.mubr.f32.mxu1 %v8045_v10 }
 0x662   :  { %v2069_v31 = vmul.f32 0.125, %v4803_v38 }
 0x664   :  { %4481 = vmatmul.mubr.msk.f32.gmra.mxu1 %vm1032_vm0, %v2069_v31 }
 0x665   :  { %2456 = vmatprep.mubr.f32.mxu1 %v8045_v10 }
 0x707   :  { %v2160_v30 = vpop.f32.mrf.mxu1 }
 0x708   :  { %v6925_v20 = vsub.f32 %v6782_v28, %v2160_v30 }
 0x709   :  { %v2162_v6 = vpop.f32.mrf.mxu1 }
 0x70a   :  { %v6928_v52 = vsub.f32 %v6779_v32, %v2162_v6  ;;  %v2223_v53 = vmul.f32 %v6925_v20, %v6925_v20 }
 0x70b   :  { %v2166_v23 = vpop.f32.mrf.mxu1 }
 0x70c   :  { %v2224_v9 = vmul.f32 %v6928_v52, %v6928_v52  ;;  %v6935_v11 = vsub.f32 %v6799_v44, %v2166_v23 }
 0x70d   :  { %v2168_v14 = vpop.f32.mrf.mxu1 }
 0x70e   :  { %v6938_v27 = vsub.f32 %v6789_v35, %v2168_v14  ;;  %2303 = vmatprep.mubr.f32.mxu0 %v2224_v9  ;;  %v2225_v0 = vmul.f32 %v6935_v11, %v6935_v11  ;;  %v5152_v9 = vld [vmem:[#allocation7 + $0x170] ss:$8 sps:$4 sm:$0xff]   ;;  %v5157_v14 = vld [vmem:[#allocation7 + $0x164] ss:$8 sps:$4 sm:$0xff]  }
 0x70f   :  { %v2172_v56 = vpop.f32.mrf.mxu1  ;;  %2304 = vmatmul.mubr.f32.vlgmr.msra.gmra.mxu0 %v2223_v53  ;;  %v5154_v53 = vld [vmem:[#allocation7 + $0x174] ss:$8 sps:$4 sm:$0xff]  }
 0x710   :  { %v2226_v7 = vmul.f32 %v6938_v27, %v6938_v27  ;;  %v6945_v8 = vsub.f32 %v6833_v54, %v2172_v56  ;;  %2754 = vmatprep.subr.bf16.mxu0 %v5154_v53  ;;  %v5155_v56 = vld [vmem:[#allocation7 + $0x160] ss:$8 sps:$4 sm:$0xff]  }
 0x711   :  { %v2174_v63 = vpop.f32.mrf.mxu1  ;;  %2755 = vmatpush1.bf16.msra.mxu0 %v5152_v9 }
 0x712   :  { %v6948_v46 = vsub.f32 %v6823_v39, %v2174_v63  ;;  %2308 = vmatprep.mubr.f32.mxu0 %v2226_v7  ;;  %v2227_v1 = vmul.f32 %v6945_v8, %v6945_v8  ;;  %2756 = vmatprep.subr.bf16.mxu0 %v5157_v14  ;;  %v5160_v7 = vld [vmem:[#allocation7 + $0x154] ss:$8 sps:$4 sm:$0xff]   ;;  %v5163_v63 = vld [vmem:[#allocation7 + $0x144] ss:$8 sps:$4 sm:$0xff]  }
 0x713   :  { %v2178_v37 = vpop.f32.mrf.mxu1  ;;  %2309 = vmatmul.mubr.f32.gmra.mxu0 %v2225_v0  ;;  %v5158_v0 = vld [vmem:[#allocation7 + $0x150] ss:$8 sps:$4 sm:$0xff]  }
 0x714   :  { %v2228_v18 = vmul.f32 %v6948_v46, %v6948_v46  ;;  %v6955_v57 = vsub.f32 %v6855_v24, %v2178_v37  ;;  %v5161_v37 = vld [vmem:[#allocation7 + $0x140] ss:$8 sps:$4 sm:$0xff]   ;;  %v5199_v24 = vld [vmem:[#allocation7 + $0x184] ss:$8 sps:$4 sm:$0xff]  }
 0x715   :  { %v2180_v50 = vpop.f32.mrf.mxu1  ;;  %2757 = vmatpush1.bf16.msra.mxu0 %v5155_v56 }
 0x716   :  { %v6958_v62 = vsub.f32 %v6852_v36, %v2180_v50  ;;  %2313 = vmatprep.mubr.f32.mxu0 %v2228_v18  ;;  %v2229_v16 = vmul.f32 %v6955_v57, %v6955_v57  ;;  %2758 = vmatprep.subr.bf16.mxu0 %v5160_v7  ;;  %v5166_v18 = vld [vmem:[#allocation7 + $0x134] ss:$8 sps:$4 sm:$0xff]   ;;  %v5169_v50 = vld [vmem:[#allocation7 + $0x124] ss:$8 sps:$4 sm:$0xff]   ;;  %v5197_v36 = vld [vmem:[#allocation7 + $0x180] ss:$8 sps:$4 sm:$0xff]  }
 0x717   :  { %2314 = vmatmul.mubr.f32.gmra.mxu0 %v2227_v1  ;;  %v5164_v1 = vld [vmem:[#allocation7 + $0x130] ss:$8 sps:$4 sm:$0xff]  }
 0x718   :  { %v2230_v40 = vmul.f32 %v6958_v62, %v6958_v62  ;;  %v2184_v47 = vpop.f32.mrf.mxu1 }
 0x719   :  { %v6965_v21 = vsub.f32 %v6866_v15, %v2184_v47  ;;  %2759 = vmatpush1.bf16.msra.mxu0 %v5158_v0  ;;  %v5172_v47 = vld [vmem:[#allocation7 + $0x114] ss:$8 sps:$4 sm:$0xff]  }
 0x71a   :  { %v2186_v5 = vpop.f32.mrf.mxu1  ;;  %2318 = vmatprep.mubr.f32.mxu0 %v2230_v40  ;;  %2760 = vmatprep.subr.bf16.mxu0 %v5163_v63  ;;  %v5167_v40 = vld [vmem:[#allocation7 + $0x120] ss:$8 sps:$4 sm:$0xff]   ;;  %v5196_v15 = vld [vmem:[#allocation7 + $0x194] ss:$8 sps:$4 sm:$0xff]  }
 0x71b   :  { %v6968_v12 = vsub.f32 %v6862_v34, %v2186_v5  ;;  %2319 = vmatmul.mubr.f32.gmra.mxu0 %v2229_v16  ;;  %v2231_v60 = vmul.f32 %v6965_v21, %v6965_v21  ;;  %v5170_v16 = vld [vmem:[#allocation7 + $0x110] ss:$8 sps:$4 sm:$0xff]   ;;  %v5175_v5 = vld [vmem:[#allocation7 + $0x104] ss:$8 sps:$4 sm:$0xff]  }
 0x71c   :  { %v2190_v51 = vpop.f32.mrf.mxu1  ;;  %v5194_v34 = vld [vmem:[#allocation7 + $0x190] ss:$8 sps:$4 sm:$0xff]  }
 0x71d   :  { %v2232_v22 = vmul.f32 %v6968_v12, %v6968_v12  ;;  %v6975_v29 = vsub.f32 %v6876_v25, %v2190_v51  ;;  %2761 = vmatpush1.bf16.msra.mxu0 %v5161_v37  ;;  %v5173_v51 = vld [vmem:[#allocation7 + $0x100] ss:$8 sps:$4 sm:$0xff]   ;;  %v5193_v25 = vld [vmem:[#allocation7 + $0x1a4] ss:$8 sps:$4 sm:$0xff]  }
 0x71e   :  { %v2192_v49 = vpop.f32.mrf.mxu1  ;;  %2762 = vmatprep.subr.bf16.mxu0 %v5166_v18 }
 0x71f   :  { %v6978_v61 = vsub.f32 %v6872_v43, %v2192_v49  ;;  %2323 = vmatprep.mubr.f32.mxu0 %v2232_v22  ;;  %v2233_v13 = vmul.f32 %v6975_v29, %v6975_v29  ;;  %v5178_v22 = vld [vmem:[#allocation7 + $0x1f4] ss:$8 sps:$4 sm:$0xff]   ;;  %v5181_v49 = vld [vmem:[#allocation7 + $0x1e4] ss:$8 sps:$4 sm:$0xff]   ;;  %v5191_v43 = vld [vmem:[#allocation7 + $0x1a0] ss:$8 sps:$4 sm:$0xff]  }
 0x720   :  { %v2196_v41 = vpop.f32.mrf.mxu1  ;;  %2324 = vmatmul.mubr.f32.gmra.mxu0 %v2231_v60  ;;  %v5176_v60 = vld [vmem:[#allocation7 + $0x1f0] ss:$8 sps:$4 sm:$0xff]  }
 0x721   :  { %v2234_v4 = vmul.f32 %v6978_v61, %v6978_v61  ;;  %v6985_v42 = vsub.f32 %v6886_v55, %v2196_v41  ;;  %2763 = vmatpush1.bf16.msra.mxu0 %v5164_v1  ;;  %v5179_v41 = vld [vmem:[#allocation7 + $0x1e0] ss:$8 sps:$4 sm:$0xff]   ;;  %v5190_v55 = vld [vmem:[#allocation7 + $0x1b4] ss:$8 sps:$4 sm:$0xff]  }
 0x722   :  { %v2198_v33 = vpop.f32.mrf.mxu1  ;;  %2764 = vmatprep.subr.bf16.mxu0 %v5169_v50 }
 0x723   :  { %v6988_v26 = vsub.f32 %v6882_v59, %v2198_v33  ;;  %2328 = vmatprep.mubr.f32.mxu0 %v2234_v4  ;;  %v2235_v17 = vmul.f32 %v6985_v42, %v6985_v42  ;;  %v5184_v4 = vld [vmem:[#allocation7 + $0x1d4] ss:$8 sps:$4 sm:$0xff]   ;;  %v5187_v33 = vld [vmem:[#allocation7 + $0x1c4] ss:$8 sps:$4 sm:$0xff]   ;;  %v5188_v59 = vld [vmem:[#allocation7 + $0x1b0] ss:$8 sps:$4 sm:$0xff]  }
 0x724   :  { %v2202_v45 = vpop.f32.mrf.mxu1  ;;  %2329 = vmatmul.mubr.f32.gmra.mxu0 %v2233_v13  ;;  %v5182_v13 = vld [vmem:[#allocation7 + $0x1d0] ss:$8 sps:$4 sm:$0xff]  }
 0x725   :  { %v2236_v58 = vmul.f32 %v6988_v26, %v6988_v26  ;;  %v6995_v38 = vsub.f32 %v6895_v3, %v2202_v45  ;;  %2765 = vmatpush1.bf16.msra.mxu0 %v5167_v40  ;;  %v5185_v45 = vld [vmem:[#allocation7 + $0x1c0] ss:$8 sps:$4 sm:$0xff]  }
 0x726   :  { %v2204_v31 = vpop.f32.mrf.mxu1  ;;  %2766 = vmatprep.subr.bf16.mxu0 %v5172_v47  ;;  %v7196_v3 = vld [vmem:[%s7901_s3 + $0x80] sm:$0xff] }
 0x727   :  { %v6998_v30 = vsub.f32 %v6892_v2, %v2204_v31  ;;  %2333 = vmatprep.mubr.f32.mxu0 %v2236_v58  ;;  %v2237_v23 = vmul.f32 %v6995_v38, %v6995_v38  ;;  %8047 = vst [vmem:[#allocation34_spill] sm:$0xff] %v7196_v3  ;;  %v7208_v2 = vld [vmem:[%s7902_s4 + $0x38] sm:$0xff] }
 0x728   :  { %2334 = vmatmul.mubr.f32.gmra.mxu0 %v2235_v17  ;;  %8049 = vst [vmem:[#allocation36_spill] sm:$0xff] %v7208_v2 }
 0x729   :  { %v2238_v6 = vmul.f32 %v6998_v30, %v6998_v30  ;;  %2767 = vmatpush1.bf16.msra.mxu0 %v5170_v16 }
 0x72a   :  { %2768 = vmatprep.subr.bf16.mxu0 %v5175_v5 }
 0x72b   :  { %2338 = vmatprep.mubr.f32.mxu0 %v2238_v6 }
 0x72c   :  { %2339 = vmatmul.mubr.f32.gmra.mxu0 %v2237_v23 }
 0x72d   :  { %2769 = vmatpush1.bf16.msra.mxu0 %v5173_v51 }
 0x72e   :  { %2770 = vmatprep.subr.bf16.mxu0 %v5178_v22 }
 0x731   :  { %2771 = vmatpush2.bf16.msra.mxu0 %v5176_v60 }
 0x732   :  { %2772 = vmatprep.subr.bf16.mxu0 %v5181_v49 }
 0x735   :  { %2773 = vmatpush2.bf16.msra.mxu0 %v5179_v41 }
 0x736   :  { %2774 = vmatprep.subr.bf16.mxu0 %v5184_v4 }
 0x739   :  { %2775 = vmatpush2.bf16.msra.mxu0 %v5182_v13 }
 0x73a   :  { %2776 = vmatprep.subr.bf16.mxu0 %v5187_v33 }
 0x73d   :  { %2777 = vmatpush2.bf16.msra.mxu0 %v5185_v45 }
 0x73e   :  { %2778 = vmatprep.subr.bf16.mxu0 %v5190_v55 }
 0x741   :  { %2779 = vmatpush2.bf16.msra.mxu0 %v5188_v59  ;;  %v4472_v59 = vld [vmem:[%s7903_s5 + $0x2] sm:$0x3] }
 0x742   :  { %2780 = vmatprep.subr.bf16.mxu0 %v5193_v25  ;;  %v7218_v25 = vrot.slane %v4472_v59, %v8011_v48 }
 0x745   :  { %2781 = vmatpush2.bf16.msra.mxu0 %v5191_v43 }
 0x746   :  { %2782 = vmatprep.subr.bf16.mxu0 %v5196_v15  ;;  %v7221_v15 = vrot.slane %v4472_v59, %v8010_v19 }
 0x749   :  { %2783 = vmatpush2.bf16.msra.mxu0 %v5194_v34 }
 0x74a   :  { %2784 = vmatprep.subr.bf16.mxu0 %v5199_v24 }
 0x74d   :  { %2785 = vmatpush2.bf16.msra.mxu0 %v5197_v36 }
 0x7cf   :  { %v4836_v58 = vpop.f32.mrf.mxu0 }
 0x7d1   :  { %v4837_v17 = vpop.f32.mrf.mxu0 }
 0x7d2   :  { %v4838_v31 = vadd.f32 %v4837_v17, %v4836_v58  ;;  %v7009_v58 = vld [vmem:[%s7901_s3 + $0x78] sm:$0xff] }
 0x7d3   :  { %v4839_v6 = vpop.f32.mrf.mxu0 }
 0x7d4   :  { %v2344_v23 = vmul.f32 0.125, %v4838_v31  ;;  %v7015_v31 = vld [vmem:[%s7901_s3 + $0xf0] sm:$0xff] }
 0x7d5   :  { %v4840_v9 = vpop.f32.mrf.mxu0 }
 0x7d6   :  { %v2352_v53 = vadd.f32 1e-05, %v2344_v23  ;;  %v4841_v14 = vadd.f32 %v4840_v9, %v4839_v6  ;;  %v7021_v9 = vld [vmem:[%s7901_s3 + $0x70] sm:$0xff] }
 0x7d7   :  { %v4842_v56 = vpop.f32.mrf.mxu0 }
 0x7d8   :  { %5440 = vrsqrt.f32 %v2352_v53  ;;  %v2345_v7 = vmul.f32 0.125, %v4841_v14  ;;  %v7028_v14 = vld [vmem:[%s7901_s3 + $0xe8] sm:$0xff] }
 0x7d9   :  { %v4843_v0 = vpop.f32.mrf.mxu0 }
 0x7da   :  { %v2353_v63 = vadd.f32 1e-05, %v2345_v7  ;;  %v4844_v37 = vadd.f32 %v4843_v0, %v4842_v56  ;;  %v7035_v0 = vld [vmem:[%s7901_s3 + $0x68] sm:$0xff] }
 0x7db   :  { %v4845_v18 = vpop.f32.mrf.mxu0 }
 0x7dc   :  { %5442 = vrsqrt.f32 %v2353_v63  ;;  %v2346_v1 = vmul.f32 0.125, %v4844_v37  ;;  %v7041_v37 = vld [vmem:[%s7901_s3 + $0xe0] sm:$0xff] }
 0x7dd   :  { %v4846_v50 = vpop.f32.mrf.mxu0 }
 0x7de   :  { %v2354_v40 = vadd.f32 1e-05, %v2346_v1  ;;  %v4847_v47 = vadd.f32 %v4846_v50, %v4845_v18  ;;  %v7047_v50 = vld [vmem:[%s7901_s3 + $0x60] sm:$0xff] }
 0x7e0   :  { %5444 = vrsqrt.f32 %v2354_v40  ;;  %v2347_v16 = vmul.f32 0.125, %v4847_v47  ;;  %v4848_v5 = vpop.f32.mrf.mxu0  ;;  %v7054_v47 = vld [vmem:[%s7901_s3 + $0xd8] sm:$0xff] }
 0x7e2   :  { %v2355_v51 = vadd.f32 1e-05, %v2347_v16  ;;  %v4849_v22 = vpop.f32.mrf.mxu0 }
 0x7e3   :  { %v4850_v60 = vadd.f32 %v4849_v22, %v4848_v5  ;;  %v7067_v22 = vld [vmem:[%s7901_s3 + $0xd0] sm:$0xff] }
 0x7e4   :  { %5446 = vrsqrt.f32 %v2355_v51  ;;  %v4851_v49 = vpop.f32.mrf.mxu0  ;;  %v7061_v51 = vld [vmem:[%s7901_s3 + $0x58] sm:$0xff] }
 0x7e5   :  { %v5441_v41 = vpop.eup %5440  ;;  %v2348_v4 = vmul.f32 0.125, %v4850_v60 }
 0x7e6   :  { %v4852_v13 = vpop.f32.mrf.mxu0  ;;  %4482 = vmatmul.mubr.msk.f32.vlgmr.msra.gmra.mxu1 %vm1032_vm0, %v5441_v41  ;;  %v7073_v41 = vld [vmem:[%s7901_s3 + $0x50] sm:$0xff] }
 0x7e7   :  { %v2356_v33 = vadd.f32 1e-05, %v2348_v4  ;;  %v4853_v45 = vadd.f32 %v4852_v13, %v4851_v49  ;;  %2462 = vmatprep.mubr.f32.mxu1 %v8045_v10  ;;  %4861 = vmatpush3.msra.mxu1 %v7009_v58  ;;  %v7080_v4 = vld [vmem:[%s7901_s3 + $0xc8] sm:$0xff] }
 0x7e8   :  { %v4854_v17 = vpop.f32.mrf.mxu0  ;;  %4862 = vmatprep.subr.mxu1 %v7015_v31 }
 0x7e9   :  { %v5443_v6 = vpop.eup %5442  ;;  %5448 = vrsqrt.f32 %v2356_v33  ;;  %v2349_v23 = vmul.f32 0.125, %v4853_v45  ;;  %4863 = vmatpush3.msra.mxu1 %v7021_v9  ;;  %v7087_v33 = vld [vmem:[%s7901_s3 + $0x48] sm:$0xff]  ;;  %v7093_v45 = vld [vmem:[%s7901_s3 + $0xc0] sm:$0xff] }
 0x7ea   :  { %v4855_v53 = vpop.f32.mrf.mxu0  ;;  %4483 = vmatmul.mubr.msk.f32.gmra.mxu1 %vm1032_vm0, %v5443_v6  ;;  %4864 = vmatprep.subr.mxu1 %v7028_v14 }
 0x7eb   :  { %v2357_v56 = vadd.f32 1e-05, %v2349_v23  ;;  %v4856_v7 = vadd.f32 %v4855_v53, %v4854_v17  ;;  %2468 = vmatprep.mubr.f32.mxu1 %v8045_v10  ;;  %4865 = vmatpush3.msra.mxu1 %v7035_v0  ;;  %v7099_v17 = vld [vmem:[%s7901_s3 + $0x40] sm:$0xff]  ;;  %v7105_v23 = vld [vmem:[%s7901_s3 + $0xb8] sm:$0xff] }
 0x7ec   :  { %v4857_v63 = vpop.f32.mrf.mxu0  ;;  %4866 = vmatprep.subr.mxu1 %v7041_v37  ;;  %v7113_v53 = vld [vmem:[%s7901_s3 + $0x38] sm:$0xff] }
 0x7ed   :  { %v5445_v18 = vpop.eup %5444  ;;  %5450 = vrsqrt.f32 %v2357_v56  ;;  %v2350_v1 = vmul.f32 0.125, %v4856_v7  ;;  %4867 = vmatpush3.msra.mxu1 %v7047_v50  ;;  %v7119_v56 = vld [vmem:[%s7901_s3 + $0xb0] sm:$0xff] }
 0x7ee   :  { %v4858_v40 = vpop.f32.mrf.mxu0  ;;  %4484 = vmatmul.mubr.msk.f32.gmra.mxu1 %vm1032_vm0, %v5445_v18  ;;  %4868 = vmatprep.subr.mxu1 %v7054_v47  ;;  %v7132_v18 = vld [vmem:[%s7901_s3 + $0xa8] sm:$0xff] }
 0x7ef   :  { %v2358_v16 = vadd.f32 1e-05, %v2350_v1  ;;  %v4859_v5 = vadd.f32 %v4858_v40, %v4857_v63  ;;  %2474 = vmatprep.mubr.f32.mxu1 %v8045_v10  ;;  %4869 = vmatpush3.msra.mxu1 %v7061_v51  ;;  %v7125_v63 = vld [vmem:[%s7901_s3 + $0x30] sm:$0xff]  ;;  %v7139_v1 = vld [vmem:[%s7901_s3 + $0x28] sm:$0xff]  ;;  %v7145_v40 = vld [vmem:[%s7901_s3 + $0xa0] sm:$0xff] }
 0x7f0   :  { %4870 = vmatprep.subr.mxu1 %v7067_v22 }
 0x7f1   :  { %v5447_v60 = vpop.eup %5446  ;;  %5452 = vrsqrt.f32 %v2358_v16  ;;  %v2351_v49 = vmul.f32 0.125, %v4859_v5  ;;  %4871 = vmatpush3.msra.mxu1 %v7073_v41  ;;  %v7151_v5 = vld [vmem:[%s7901_s3 + $0x20] sm:$0xff] }
 0x7f2   :  { %4485 = vmatmul.mubr.msk.f32.gmra.mxu1 %vm1032_vm0, %v5447_v60  ;;  %4872 = vmatprep.subr.mxu1 %v7080_v4  ;;  %v7158_v60 = vld [vmem:[%s7901_s3 + $0x98] sm:$0xff] }
 0x7f3   :  { %v2359_v13 = vadd.f32 1e-05, %v2351_v49  ;;  %2480 = vmatprep.mubr.f32.mxu1 %v8045_v10  ;;  %4873 = vmatpush3.msra.mxu1 %v7087_v33  ;;  %v7165_v49 = vld [vmem:[%s7901_s3 + $0x18] sm:$0xff] }
 0x7f4   :  { %4874 = vmatprep.subr.mxu1 %v7093_v45 }
 0x7f5   :  { %5454 = vrsqrt.f32 %v2359_v13  ;;  %4875 = vmatpush3.msra.mxu1 %v7099_v17  ;;  %v7171_v13 = vld [vmem:[%s7901_s3 + $0x90] sm:$0xff] }
 0x7f6   :  { %v5449_v6 = vpop.eup %5448  ;;  %4876 = vmatprep.subr.mxu1 %v7105_v23 }
 0x7f7   :  { %4486 = vmatmul.mubr.msk.f32.gmra.mxu1 %vm1032_vm0, %v5449_v6 }
 0x7f8   :  { %2486 = vmatprep.mubr.f32.mxu1 %v8045_v10  ;;  %4877 = vmatpush3.msra.mxu1 %v7113_v53 }
 0x7f9   :  { %4878 = vmatprep.subr.mxu1 %v7119_v56 }
 0x7fa   :  { %v5451_v7 = vpop.eup %5450  ;;  %4879 = vmatpush3.msra.mxu1 %v7125_v63 }
 0x7fb   :  { %4487 = vmatmul.mubr.msk.f32.gmra.mxu1 %vm1032_vm0, %v5451_v7  ;;  %4880 = vmatprep.subr.mxu1 %v7132_v18  ;;  %v7177_v7 = vld [vmem:[%s7901_s3 + $0x10] sm:$0xff] }
 0x7fc   :  { %2492 = vmatprep.mubr.f32.mxu1 %v8045_v10  ;;  %4881 = vmatpush3.msra.mxu1 %v7139_v1 }
 0x7fd   :  { %4882 = vmatprep.subr.mxu1 %v7145_v40 }
 0x7fe   :  { %v5453_v16 = vpop.eup %5452  ;;  %4883 = vmatpush3.msra.mxu1 %v7151_v5 }
 0x7ff   :  { %4488 = vmatmul.mubr.msk.f32.gmra.mxu1 %vm1032_vm0, %v5453_v16  ;;  %4884 = vmatprep.subr.mxu1 %v7158_v60  ;;  %v7184_v16 = vld [vmem:[%s7901_s3 + $0x88] sm:$0xff] }
 0x800   :  { %2498 = vmatprep.mubr.f32.mxu1 %v8045_v10  ;;  %4885 = vmatpush3.msra.mxu1 %v7165_v49  ;;  %v7190_v10 = vld [vmem:[%s7901_s3 + $0x8] sm:$0xff] }
 0x801   :  { %4886 = vmatprep.subr.mxu1 %v7171_v13 }
 0x802   :  { %v5455_v6 = vpop.eup %5454  ;;  %4887 = vmatpush3.msra.mxu1 %v7177_v7 }
 0x803   :  { %4489 = vmatmul.mubr.msk.f32.gmra.mxu1 %vm1032_vm0, %v5455_v6  ;;  %4888 = vmatprep.subr.mxu1 %v7184_v16  ;;  %v7202_v6 = vld [vmem:[%s7901_s3] sm:$0xff] }
 0x804   :  { %4889 = vmatpush3.msra.mxu1 %v7190_v10  ;;  %8048 = vst [vmem:[#allocation35_spill] sm:$0xff] %v7202_v6 }
 0x805   :  { %4890 = vmatprep.subr.mxu1 %v7196_v3 }
 0x806   :  { %4891 = vmatpush3.msra.mxu1 %v7202_v6 }
 0x807   :  { %3155 = vmatprep.subr.mxu1 %v7208_v2  ;;  %v5672_v2 = vld [vmem:[%s7901_s3 + $0xf8] sm:$0xff] }
 0x808   :  { %4916 = vmatprep.subr.mxu0 %v5672_v2  ;;  %v4473_v2 = vld [vmem:[%s7904_s6 + $0x2] sm:$0x3] }
 0x809   :  { %v7231_v35 = vrot.slane %v4473_v2, %v8011_v48 }
 0x8a6   :  { %v2458_v43 = vpop.f32.mrf.mxu1 }
 0x8a7   :  { %v2516_v36 = vmul.f32 %v7221_v15, %v2458_v43  ;;  %v7237_v43 = vrot.slane %v4473_v2, %v8010_v19 }
 0x8a8   :  { %v2460_v34 = vpop.f32.mrf.mxu1 }
 0x8a9   :  { %v2517_v24 = vmul.f32 %v7218_v25, %v2460_v34  ;;  %v2532_v34 = vmul.f32 %v2516_v36, %v6925_v20 }
 0x8aa   :  { %v2464_v55 = vpop.f32.mrf.mxu1 }
 0x8ab   :  { %v2518_v54 = vmul.f32 %v7221_v15, %v2464_v55  ;;  %v2533_v44 = vmul.f32 %v2517_v24, %v6928_v52 }
 0x8ac   :  { %v2466_v39 = vpop.f32.mrf.mxu1 }
 0x8ad   :  { %v2534_v59 = vmul.f32 %v2518_v54, %v6935_v11  ;;  %v2519_v28 = vmul.f32 %v7218_v25, %v2466_v39  ;;  %v2560_v52 = vadd.f32 %v7231_v35, %v2533_v44  ;;  %v2559_v54 = vadd.f32 %v7237_v43, %v2532_v34 }
 0x8ae   :  { %v2470_v32 = vpop.f32.mrf.mxu1 }
 0x8af   :  { %v2535_v6 = vmul.f32 %v2519_v28, %v6938_v27  ;;  %v2561_v55 = vadd.f32 %v7237_v43, %v2534_v59  ;;  %v2520_v39 = vmul.f32 %v7221_v15, %v2470_v32 }
 0x8b0   :  { %v2472_v3 = vpop.f32.mrf.mxu1 }
 0x8b1   :  { %v2562_v24 = vadd.f32 %v7231_v35, %v2535_v6  ;;  %v2521_v48 = vmul.f32 %v7218_v25, %v2472_v3  ;;  %v2575_v2 = vpack.c.bf16 %v2561_v55, %v2559_v54  ;;  %v2536_v6 = vmul.f32 %v2520_v39, %v6945_v8 }
 0x8b2   :  { %v2476_v20 = vpop.f32.mrf.mxu1 }
 0x8b3   :  { %v2522_v11 = vmul.f32 %v7221_v15, %v2476_v20  ;;  %v2576_v36 = vpack.c.bf16 %v2562_v24, %v2560_v52  ;;  %v2537_v28 = vmul.f32 %v2521_v48, %v6948_v46 }
 0x8b4   :  { %v2478_v19 = vpop.f32.mrf.mxu1 }
 0x8b5   :  { %v2538_v27 = vmul.f32 %v2522_v11, %v6955_v57  ;;  %v2523_v44 = vmul.f32 %v7218_v25, %v2478_v19  ;;  %2786 = vmatprep.mubr.bf16.mxu0 %v2576_v36  ;;  %v2564_v34 = vadd.f32 %v7231_v35, %v2537_v28  ;;  %v2563_v19 = vadd.f32 %v7237_v43, %v2536_v6 }
 0x8b6   :  { %2787 = vmatmul.mubr.bf16.vlgmr.msra.gmra.mxu0 %v2575_v2 }
 0x8b7   :  { %v2539_v3 = vmul.f32 %v2523_v44, %v6958_v62  ;;  %v2482_v59 = vpop.f32.mrf.mxu1  ;;  %4917 = vmatpush3.msra.mxu0 %v7009_v58  ;;  %v2565_v32 = vadd.f32 %v7237_v43, %v2538_v27 }
 0x8b8   :  { %4918 = vmatprep.subr.mxu0 %v7015_v31  ;;  %v2524_v57 = vmul.f32 %v7221_v15, %v2482_v59 }
 0x8b9   :  { %v2566_v48 = vadd.f32 %v7231_v35, %v2539_v3  ;;  %v2484_v46 = vpop.f32.mrf.mxu1  ;;  %4919 = vmatpush3.msra.mxu0 %v7021_v9  ;;  %v2577_v55 = vpack.c.bf16 %v2565_v32, %v2563_v19 }
 0x8ba   :  { %v2525_v8 = vmul.f32 %v7218_v25, %v2484_v46  ;;  %4920 = vmatprep.subr.mxu0 %v7028_v14 }
 0x8bb   :  { %v2488_v62 = vpop.f32.mrf.mxu1  ;;  %v2578_v58 = vpack.c.bf16 %v2566_v48, %v2564_v34  ;;  %4921 = vmatpush3.msra.mxu0 %v7035_v0  ;;  %v2540_v0 = vmul.f32 %v2524_v57, %v6965_v21 }
 0x8bc   :  { %v2526_v31 = vmul.f32 %v7221_v15, %v2488_v62  ;;  %4922 = vmatprep.subr.mxu0 %v7041_v37  ;;  %v2541_v9 = vmul.f32 %v2525_v8, %v6968_v12 }
 0x8bd   :  { %v2490_v52 = vpop.f32.mrf.mxu1  ;;  %2796 = vmatprep.mubr.bf16.mxu0 %v2578_v58  ;;  %4923 = vmatpush3.msra.mxu0 %v7047_v50  ;;  %v2567_v21 = vadd.f32 %v7237_v43, %v2540_v0 }
 0x8be   :  { %v2542_v24 = vmul.f32 %v2526_v31, %v6975_v29  ;;  %v2527_v14 = vmul.f32 %v7218_v25, %v2490_v52  ;;  %2797 = vmatmul.mubr.bf16.gmra.mxu0 %v2577_v55  ;;  %4924 = vmatprep.subr.mxu0 %v7054_v47  ;;  %v2568_v12 = vadd.f32 %v7231_v35, %v2541_v9 }
 0x8bf   :  { %v2494_v54 = vpop.f32.mrf.mxu1  ;;  %4925 = vmatpush3.msra.mxu0 %v7061_v51 }
 0x8c0   :  { %v2543_v37 = vmul.f32 %v2527_v14, %v6978_v61  ;;  %4926 = vmatprep.subr.mxu0 %v7067_v22  ;;  %v2569_v50 = vadd.f32 %v7237_v43, %v2542_v24  ;;  %v2528_v51 = vmul.f32 %v7221_v15, %v2494_v54 }
 0x8c1   :  { %v2496_v39 = vpop.f32.mrf.mxu1  ;;  %4927 = vmatpush3.msra.mxu0 %v7073_v41 }
 0x8c2   :  { %v2570_v29 = vadd.f32 %v7231_v35, %v2543_v37  ;;  %v2529_v47 = vmul.f32 %v7218_v25, %v2496_v39  ;;  %4928 = vmatprep.subr.mxu0 %v7080_v4  ;;  %v2579_v11 = vpack.c.bf16 %v2569_v50, %v2567_v21 }
 0x8c3   :  { %v2500_v61 = vpop.f32.mrf.mxu1  ;;  %4929 = vmatpush3.msra.mxu0 %v7087_v33  ;;  %v2544_v33 = vmul.f32 %v2528_v51, %v6985_v42 }
 0x8c4   :  { %v2530_v22 = vmul.f32 %v7221_v15, %v2500_v61  ;;  %v2580_v20 = vpack.c.bf16 %v2570_v29, %v2568_v12  ;;  %4930 = vmatprep.subr.mxu0 %v7093_v45  ;;  %v2545_v36 = vmul.f32 %v2529_v47, %v6988_v26 }
 0x8c5   :  { %v2502_v41 = vpop.f32.mrf.mxu1  ;;  %4931 = vmatpush3.msra.mxu0 %v7099_v17  ;;  %v2571_v17 = vadd.f32 %v7237_v43, %v2544_v33 }
 0x8c6   :  { %v2546_v4 = vmul.f32 %v2530_v22, %v6995_v38  ;;  %v2531_v2 = vmul.f32 %v7218_v25, %v2502_v41  ;;  %2806 = vmatprep.mubr.bf16.mxu0 %v2580_v20  ;;  %4932 = vmatprep.subr.mxu0 %v7105_v23  ;;  %v2572_v26 = vadd.f32 %v7231_v35, %v2545_v36  ;;  %v8051_v23 = vld [vmem:[#allocation35_spill] sm:$0xff] }
 0x8c7   :  { %2807 = vmatmul.mubr.bf16.gmra.mxu0 %v2579_v11 }
 0x8c8   :  { %v2547_v15 = vmul.f32 %v2531_v2, %v6998_v30  ;;  %4933 = vmatpush3.msra.mxu0 %v7113_v53  ;;  %v2573_v45 = vadd.f32 %v7237_v43, %v2546_v4  ;;  %v1956_v53 = vld [vmem:[#allocation8 + $0x2] sm:$0x3] }
 0x8c9   :  { %4934 = vmatprep.subr.mxu0 %v7119_v56  ;;  %v8052_v56 = vld [vmem:[#allocation23_spill] sm:$0xff] }
 0x8ca   :  { %v2574_v38 = vadd.f32 %v7231_v35, %v2547_v15  ;;  %4935 = vmatpush3.msra.mxu0 %v7125_v63  ;;  %v2581_v30 = vpack.c.bf16 %v2573_v45, %v2571_v17  ;;  %v8050_v35 = vld [vmem:[#allocation34_spill] sm:$0xff]  ;;  %v7312_v63 = vrot.slane %v1956_v53, %v8052_v56 }
 0x8cb   :  { %4936 = vmatprep.subr.mxu0 %v7132_v18  ;;  %v8053_v18 = vld [vmem:[#allocation24_spill] sm:$0xff] }
 0x8cc   :  { %v2582_v42 = vpack.c.bf16 %v2574_v38, %v2572_v26  ;;  %4937 = vmatpush3.msra.mxu0 %v7139_v1  ;;  %v7315_v1 = vrot.slane %v1956_v53, %v8053_v18 }
 0x8cd   :  { %4938 = vmatprep.subr.mxu0 %v7145_v40 }
 0x8ce   :  { %2816 = vmatprep.mubr.bf16.mxu0 %v2582_v42  ;;  %4939 = vmatpush3.msra.mxu0 %v7151_v5 }
 0x8cf   :  { %2817 = vmatmul.mubr.bf16.gmra.mxu0 %v2581_v30  ;;  %4940 = vmatprep.subr.mxu0 %v7158_v60 }
 0x8d0   :  { %4941 = vmatpush3.msra.mxu0 %v7165_v49 }
 0x8d1   :  { %4942 = vmatprep.subr.mxu0 %v7171_v13 }
 0x8d2   :  { %4943 = vmatpush3.msra.mxu0 %v7177_v7 }
 0x8d3   :  { %4944 = vmatprep.subr.mxu0 %v7184_v16 }
 0x8d4   :  { %4945 = vmatpush3.msra.mxu0 %v7190_v10 }
 0x8d5   :  { %4946 = vmatprep.subr.mxu0 %v8050_v35 }
 0x8d6   :  { %4947 = vmatpush3.msra.mxu0 %v8051_v23 }
 0x976   :  { %v2788_v40 = vpop.f32.mrf.mxu0 }
 0x977   :  { %v7318_v5 = vadd.f32 %v2788_v40, %v7312_v63 }
 0x978   :  { %v2790_v60 = vpop.f32.mrf.mxu0 }
 0x979   :  { %v4522_v49 = vmul.f32 -1.442695, %v7318_v5  ;;  %v7322_v10 = vadd.f32 %v2790_v60, %v7315_v1 }
 0x97a   :  { %v2792_v13 = vpop.f32.mrf.mxu0 }
 0x97b   :  { %5456 = vpow2.f32 %v4522_v49  ;;  %v4523_v7 = vmul.f32 -1.442695, %v7322_v10  ;;  %v7326_v16 = vadd.f32 %v2792_v13, %v7312_v63 }
 0x97c   :  { %v2794_v25 = vpop.f32.mrf.mxu0 }
 0x97d   :  { %5458 = vpow2.f32 %v4523_v7  ;;  %v4524_v43 = vmul.f32 -1.442695, %v7326_v16  ;;  %v7330_v28 = vadd.f32 %v2794_v25, %v7315_v1 }
 0x97e   :  { %v2798_v27 = vpop.f32.mrf.mxu0 }
 0x97f   :  { %5460 = vpow2.f32 %v4524_v43  ;;  %v4525_v44 = vmul.f32 -1.442695, %v7330_v28  ;;  %v7334_v6 = vadd.f32 %v2798_v27, %v7312_v63 }
 0x980   :  { %v2800_v3 = vpop.f32.mrf.mxu0 }
 0x981   :  { %5462 = vpow2.f32 %v4525_v44  ;;  %v4526_v59 = vmul.f32 -1.442695, %v7334_v6  ;;  %v7338_v32 = vadd.f32 %v2800_v3, %v7315_v1 }
 0x982   :  { %v2802_v34 = vpop.f32.mrf.mxu0 }
 0x983   :  { %5464 = vpow2.f32 %v4526_v59  ;;  %v4527_v48 = vmul.f32 -1.442695, %v7338_v32  ;;  %v7342_v46 = vadd.f32 %v2802_v34, %v7312_v63 }
 0x984   :  { %v2804_v19 = vpop.f32.mrf.mxu0 }
 0x985   :  { %5466 = vpow2.f32 %v4527_v48  ;;  %v4528_v8 = vmul.f32 -1.442695, %v7342_v46  ;;  %v7346_v57 = vadd.f32 %v2804_v19, %v7315_v1  ;;  %v8054_v48 = vld [vmem:[#allocation20_spill] sm:$0xff] }
 0x987   :  { %5468 = vpow2.f32 %v4528_v8  ;;  %v4529_v62 = vmul.f32 -1.442695, %v7346_v57  ;;  %v2808_v58 = vpop.f32.mrf.mxu0 }
 0x988   :  { %v5457_v31 = vpop.eup %5456  ;;  %v7350_v55 = vadd.f32 %v2808_v58, %v7312_v63 }
 0x989   :  { %v2875_v52 = vadd.f32 1.0, %v5457_v31  ;;  %5470 = vpow2.f32 %v4529_v62  ;;  %v2810_v9 = vpop.f32.mrf.mxu0  ;;  %v8055_v62 = vld [vmem:[#allocation21_spill] sm:$0xff] }
 0x98a   :  { %v5459_v24 = vpop.eup %5458  ;;  %v4530_v14 = vmul.f32 -1.442695, %v7350_v55  ;;  %v7354_v0 = vadd.f32 %v2810_v9, %v7315_v1 }
 0x98b   :  { %5472 = vrcp.f32 %v2875_v52  ;;  %v2876_v54 = vadd.f32 1.0, %v5459_v24  ;;  %v2812_v37 = vpop.f32.mrf.mxu0 }
 0x98c   :  { %v5461_v50 = vpop.eup %5460  ;;  %5474 = vpow2.f32 %v4530_v14  ;;  %v4531_v39 = vmul.f32 -1.442695, %v7354_v0  ;;  %v7358_v12 = vadd.f32 %v2812_v37, %v7312_v63 }
 0x98d   :  { %5476 = vrcp.f32 %v2876_v54  ;;  %v2877_v29 = vadd.f32 1.0, %v5461_v50  ;;  %v2814_v47 = vpop.f32.mrf.mxu0  ;;  %v8056_v54 = vld [vmem:[#allocation22_spill] sm:$0xff] }
 0x98e   :  { %v5463_v21 = vpop.eup %5462  ;;  %5478 = vpow2.f32 %v4531_v39  ;;  %v4532_v51 = vmul.f32 -1.442695, %v7358_v12  ;;  %v7362_v61 = vadd.f32 %v2814_v47, %v7315_v1 }
 0x98f   :  { %5480 = vrcp.f32 %v2877_v29  ;;  %v2878_v22 = vadd.f32 1.0, %v5463_v21  ;;  %v2818_v20 = vpop.f32.mrf.mxu0  ;;  %v8057_v29 = vld [vmem:[#allocation15_spill] sm:$0xff] }
 0x990   :  { %v5465_v41 = vpop.eup %5464  ;;  %5482 = vpow2.f32 %v4532_v51  ;;  %v4533_v11 = vmul.f32 -1.442695, %v7362_v61  ;;  %v7366_v36 = vadd.f32 %v2818_v20, %v7312_v63  ;;  %v7409_v21 = vld [vmem:[%s7902_s4 + $0x28] sm:$0xff] }
 0x991   :  { %5484 = vrcp.f32 %v2878_v22  ;;  %v2879_v4 = vadd.f32 1.0, %v5465_v41  ;;  %v2820_v2 = vpop.f32.mrf.mxu0 }
 0x992   :  { %v5467_v33 = vpop.eup %5466  ;;  %5486 = vpow2.f32 %v4533_v11  ;;  %v4534_v15 = vmul.f32 -1.442695, %v7366_v36  ;;  %v7370_v45 = vadd.f32 %v2820_v2, %v7315_v1  ;;  %v7424_v11 = vld [vmem:[%s7902_s4 + $0x18] sm:$0xff] }
 0x993   :  { %5488 = vrcp.f32 %v2879_v4  ;;  %v2880_v26 = vadd.f32 1.0, %v5467_v33  ;;  %v2822_v38 = vpop.f32.mrf.mxu0  ;;  %v8058_v4 = vld [vmem:[#allocation16_spill] sm:$0xff] }
 0x994   :  { %v5469_v17 = vpop.eup %5468  ;;  %5490 = vpow2.f32 %v4534_v15  ;;  %v4535_v42 = vmul.f32 -1.442695, %v7370_v45  ;;  %v7374_v30 = vadd.f32 %v2822_v38, %v7312_v63  ;;  %v7433_v33 = vld [vmem:[%s7902_s4 + $0x10] sm:$0xff] }
 0x995   :  { %5492 = vrcp.f32 %v2880_v26  ;;  %v2881_v35 = vadd.f32 1.0, %v5469_v17  ;;  %v2824_v23 = vpop.f32.mrf.mxu0  ;;  %v8059_v17 = vld [vmem:[#allocation17_spill] sm:$0xff] }
 0x996   :  { %v5471_v53 = vpop.eup %5470  ;;  %5494 = vpow2.f32 %v4535_v42  ;;  %v4536_v40 = vmul.f32 -1.442695, %v7374_v30  ;;  %v7378_v60 = vadd.f32 %v2824_v23, %v7315_v1 }
 0x997   :  { %5496 = vrcp.f32 %v2881_v35  ;;  %v2882_v49 = vadd.f32 1.0, %v5471_v53  ;;  %v7443_v35 = vld [vmem:[%s7902_s4 + $0x8] sm:$0xff] }
 0x998   :  { %v5473_v13 = vpop.eup %5472  ;;  %5498 = vpow2.f32 %v4536_v40  ;;  %v4537_v7 = vmul.f32 -1.442695, %v7378_v60 }
 0x999   :  { %v5475_v25 = vpop.eup %5474  ;;  %5500 = vrcp.f32 %v2882_v49  ;;  %v2923_v43 = vmul.f32 %v5473_v13, %v7318_v5  ;;  %v8060_v49 = vld [vmem:[#allocation36_spill] sm:$0xff] }
 0x99a   :  { %v5477_v63 = vpop.eup %5476  ;;  %v2883_v27 = vadd.f32 1.0, %v5475_v25  ;;  %5502 = vpow2.f32 %v4537_v7  ;;  %v8061_v7 = vld [vmem:[#allocation25_spill] sm:$0xff] }
 0x99b   :  { %v5479_v44 = vpop.eup %5478  ;;  %v2924_v3 = vmul.f32 %v5477_v63, %v7322_v10  ;;  %v7387_v58 = vadd.f32 %v2923_v43, %v8055_v62 }
 0x99c   :  { %v5481_v59 = vpop.eup %5480  ;;  %5504 = vrcp.f32 %v2883_v27  ;;  %v2884_v1 = vadd.f32 1.0, %v5479_v44 }
 0x99d   :  { %v5483_v34 = vpop.eup %5482  ;;  %v7384_v19 = vadd.f32 %v2924_v3, %v8054_v48  ;;  %v2925_v31 = vmul.f32 %v5481_v59, %v7326_v16  ;;  %v7399_v16 = vld [vmem:[%s7902_s4 + $0x30] sm:$0xff]  ;;  %v8063_v59 = vld [vmem:[#allocation27_spill] sm:$0xff] }
 0x99e   :  { %v5485_v8 = vpop.eup %5484  ;;  %5506 = vrcp.f32 %v2884_v1  ;;  %v2885_v5 = vadd.f32 1.0, %v5483_v34 }
 0x99f   :  { %v5487_v52 = vpop.eup %5486  ;;  %v2926_v9 = vmul.f32 %v5485_v8, %v7330_v28  ;;  %3058 = vmatprep.mubr.f32.mxu1 %v7384_v19  ;;  %v7404_v47 = vadd.f32 %v2925_v31, %v8057_v29  ;;  %v8064_v8 = vld [vmem:[#allocation28_spill] sm:$0xff] }
 0x9a0   :  { %v5489_v10 = vpop.eup %5488  ;;  %5508 = vrcp.f32 %v2885_v5  ;;  %v2886_v24 = vadd.f32 1.0, %v5487_v52  ;;  %3059 = vmatmul.mubr.f32.vlgmr.msra.gmra.mxu1 %v7387_v58 }
 0x9a1   :  { %v5491_v14 = vpop.eup %5490  ;;  %v7394_v37 = vadd.f32 %v2926_v9, %v8056_v54  ;;  %3156 = vmatpush1.msra.mxu1 %v7399_v16  ;;  %v2927_v28 = vmul.f32 %v5489_v10, %v7334_v6  ;;  %v7417_v6 = vld [vmem:[%s7902_s4 + $0x20] sm:$0xff] }
 0x9a2   :  { %v5493_v50 = vpop.eup %5492  ;;  %5510 = vrcp.f32 %v2886_v24  ;;  %v2887_v39 = vadd.f32 1.0, %v5491_v14  ;;  %3157 = vmatprep.subr.mxu1 %v7409_v21  ;;  %v8066_v10 = vld [vmem:[#allocation30_spill] sm:$0xff] }
 0x9a3   :  { %v5495_v51 = vpop.eup %5494  ;;  %v2928_v22 = vmul.f32 %v5493_v50, %v7338_v32  ;;  %3063 = vmatprep.mubr.f32.mxu1 %v7394_v37  ;;  %3158 = vmatpush1.msra.mxu1 %v7417_v6  ;;  %v7438_v42 = vadd.f32 %v2927_v28, %v8059_v17 }
 0x9a4   :  { %v5497_v20 = vpop.eup %5496  ;;  %5512 = vrcp.f32 %v2887_v39  ;;  %v2888_v41 = vadd.f32 1.0, %v5495_v51  ;;  %3064 = vmatmul.mubr.f32.gmra.mxu1 %v7404_v47  ;;  %3159 = vmatprep.subr.mxu1 %v7424_v11  ;;  %v8068_v39 = vld [vmem:[#allocation31_spill] sm:$0xff] }
 0x9a5   :  { %v5499_v32 = vpop.eup %5498  ;;  %v7428_v2 = vadd.f32 %v2928_v22, %v8058_v4  ;;  %3160 = vmatpush1.msra.mxu1 %v7433_v33  ;;  %v2929_v26 = vmul.f32 %v5497_v20, %v7342_v46  ;;  %v7451_v46 = vld [vmem:[%s7902_s4] sm:$0xff]  ;;  %v8070_v22 = vld [vmem:[#allocation33_spill] sm:$0xff] }
 0x9a6   :  { %v5501_v15 = vpop.eup %5500  ;;  %5514 = vrcp.f32 %v2888_v41  ;;  %v2889_v38 = vadd.f32 1.0, %v5499_v32  ;;  %3161 = vmatprep.subr.mxu1 %v7443_v35 }
 0x9a7   :  { %v5503_v23 = vpop.eup %5502  ;;  %v2930_v53 = vmul.f32 %v5501_v15, %v7346_v57  ;;  %3068 = vmatprep.mubr.f32.mxu1 %v7428_v2  ;;  %3162 = vmatpush1.msra.mxu1 %v7451_v46  ;;  %v8062_v57 = vld [vmem:[#allocation26_spill] sm:$0xff] }
 0x9a8   :  { %5516 = vrcp.f32 %v2889_v38  ;;  %v2890_v40 = vadd.f32 1.0, %v5503_v23  ;;  %3069 = vmatmul.mubr.f32.gmra.mxu1 %v7438_v42  ;;  %3453 = vmatprep.subr.mxu1 %v8060_v49  ;;  %v7460_v63 = vadd.f32 %v2929_v26, %v8062_v57 }
 0x9a9   :  { %v5505_v13 = vpop.eup %5504  ;;  %v7457_v25 = vadd.f32 %v2930_v53, %v8061_v7 }
 0x9aa   :  { %5518 = vrcp.f32 %v2890_v40  ;;  %v2931_v27 = vmul.f32 %v5505_v13, %v7350_v55 }
 0x9ab   :  { %v5507_v43 = vpop.eup %5506  ;;  %3073 = vmatprep.mubr.f32.mxu1 %v7457_v25 }
 0x9ac   :  { %v2932_v44 = vmul.f32 %v5507_v43, %v7354_v0  ;;  %3074 = vmatmul.mubr.f32.gmra.mxu1 %v7460_v63  ;;  %v7471_v62 = vadd.f32 %v2931_v27, %v8064_v8  ;;  %v8065_v0 = vld [vmem:[#allocation29_spill] sm:$0xff] }
 0x9ad   :  { %v5509_v3 = vpop.eup %5508 }
 0x9ae   :  { %v7467_v1 = vadd.f32 %v2932_v44, %v8063_v59  ;;  %v2933_v48 = vmul.f32 %v5509_v3, %v7358_v12 }
 0x9af   :  { %v5511_v34 = vpop.eup %5510 }
 0x9b0   :  { %v2934_v31 = vmul.f32 %v5511_v34, %v7362_v61  ;;  %3078 = vmatprep.mubr.f32.mxu1 %v7467_v1  ;;  %v7481_v24 = vadd.f32 %v2933_v48, %v8066_v10  ;;  %v8067_v61 = vld [vmem:[#allocation18_spill] sm:$0xff] }
 0x9b1   :  { %v5513_v55 = vpop.eup %5512  ;;  %3079 = vmatmul.mubr.f32.gmra.mxu1 %v7471_v62 }
 0x9b2   :  { %v7477_v5 = vadd.f32 %v2934_v31, %v8065_v0  ;;  %v2935_v9 = vmul.f32 %v5513_v55, %v7366_v36 }
 0x9b3   :  { %v5515_v52 = vpop.eup %5514 }
 0x9b4   :  { %v2936_v12 = vmul.f32 %v5515_v52, %v7370_v45  ;;  %3083 = vmatprep.mubr.f32.mxu1 %v7477_v5  ;;  %v7491_v29 = vadd.f32 %v2935_v9, %v8068_v39  ;;  %v8069_v45 = vld [vmem:[#allocation32_spill] sm:$0xff] }
 0x9b5   :  { %v5517_v14 = vpop.eup %5516  ;;  %3084 = vmatmul.mubr.f32.gmra.mxu1 %v7481_v24 }
 0x9b6   :  { %v7487_v54 = vadd.f32 %v2936_v12, %v8067_v61  ;;  %v2937_v28 = vmul.f32 %v5517_v14, %v7374_v30  ;;  %v8071_v30 = vmov 0.0  }
 0x9b7   :  { %v5519_v50 = vpop.eup %5518 }
 0x9b8   :  { %v2938_v36 = vmul.f32 %v5519_v50, %v7378_v60  ;;  %3088 = vmatprep.mubr.f32.mxu1 %v7487_v54  ;;  %v7500_v20 = vadd.f32 %v2937_v28, %v8070_v22 }
 0x9b9   :  { %3089 = vmatmul.mubr.f32.gmra.mxu1 %v7491_v29 }
 0x9ba   :  { %v7497_v51 = vadd.f32 %v2938_v36, %v8069_v45 }
 0x9bc   :  { %3093 = vmatprep.mubr.f32.mxu1 %v7497_v51 }
 0x9bd   :  { %3094 = vmatmul.mubr.f32.gmra.mxu1 %v7500_v20 }
 0x9be   :  { %3195 = vmatprep.mubr.f32.mxu1 %v8071_v30 }
 0xa60   :  { %v4892_v41 = vpop.f32.mrf.mxu1 }
 0xa62   :  { %v4893_v32 = vpop.f32.mrf.mxu1 }
 0xa63   :  { %v4894_v4 = vadd.f32 %v4893_v32, %v4892_v41 }
 0xa64   :  { %v4895_v60 = vpop.f32.mrf.mxu1 }
 0xa65   :  { %v3099_v15 = vmul.f32 0.125, %v4894_v4 }
 0xa66   :  { %v4896_v26 = vpop.f32.mrf.mxu1 }
 0xa67   :  { %v4897_v38 = vadd.f32 %v4896_v26, %v4895_v60  ;;  %4540 = vmatmul.mubr.msk.f32.vlgmr.msra.gmra.mxu1 %vm1032_vm0, %v3099_v15 }
 0xa68   :  { %v4898_v17 = vpop.f32.mrf.mxu1  ;;  %3201 = vmatprep.mubr.f32.mxu1 %v8071_v30  ;;  %3454 = vmatpush1.msra.mxu1 %v7399_v16 }
 0xa69   :  { %v3100_v23 = vmul.f32 0.125, %v4897_v38  ;;  %3455 = vmatprep.subr.mxu1 %v7409_v21 }
 0xa6a   :  { %v4899_v53 = vpop.f32.mrf.mxu1  ;;  %3456 = vmatpush1.msra.mxu1 %v7417_v6 }
 0xa6b   :  { %v4900_v40 = vadd.f32 %v4899_v53, %v4898_v17  ;;  %4541 = vmatmul.mubr.msk.f32.gmra.mxu1 %vm1032_vm0, %v3100_v23  ;;  %3457 = vmatprep.subr.mxu1 %v7424_v11 }
 0xa6c   :  { %v4901_v49 = vpop.f32.mrf.mxu1  ;;  %3207 = vmatprep.mubr.f32.mxu1 %v8071_v30  ;;  %3458 = vmatpush1.msra.mxu1 %v7433_v33 }
 0xa6d   :  { %v3101_v13 = vmul.f32 0.125, %v4900_v40  ;;  %3459 = vmatprep.subr.mxu1 %v7443_v35 }
 0xa6e   :  { %v4902_v16 = vpop.f32.mrf.mxu1  ;;  %3460 = vmatpush1.msra.mxu1 %v7451_v46 }
 0xa6f   :  { %v4903_v21 = vadd.f32 %v4902_v16, %v4901_v49  ;;  %4542 = vmatmul.mubr.msk.f32.gmra.mxu1 %vm1032_vm0, %v3101_v13 }
 0xa70   :  { %3213 = vmatprep.mubr.f32.mxu1 %v8071_v30 }
 0xa71   :  { %v3102_v6 = vmul.f32 0.125, %v4903_v21  ;;  %v4904_v7 = vpop.f32.mrf.mxu1 }
 0xa73   :  { %v4905_v57 = vpop.f32.mrf.mxu1  ;;  %4543 = vmatmul.mubr.msk.f32.gmra.mxu1 %vm1032_vm0, %v3102_v6 }
 0xa74   :  { %v4906_v11 = vadd.f32 %v4905_v57, %v4904_v7  ;;  %3219 = vmatprep.mubr.f32.mxu1 %v8071_v30 }
 0xa75   :  { %v4907_v33 = vpop.f32.mrf.mxu1 }
 0xa76   :  { %v3103_v43 = vmul.f32 0.125, %v4906_v11 }
 0xa77   :  { %v4908_v27 = vpop.f32.mrf.mxu1 }
 0xa78   :  { %v4909_v35 = vadd.f32 %v4908_v27, %v4907_v33  ;;  %4544 = vmatmul.mubr.msk.f32.gmra.mxu1 %vm1032_vm0, %v3103_v43 }
 0xa79   :  { %v4910_v46 = vpop.f32.mrf.mxu1  ;;  %3225 = vmatprep.mubr.f32.mxu1 %v8071_v30 }
 0xa7a   :  { %v3104_v44 = vmul.f32 0.125, %v4909_v35 }
 0xa7b   :  { %v4911_v3 = vpop.f32.mrf.mxu1 }
 0xa7c   :  { %v4912_v59 = vadd.f32 %v4911_v3, %v4910_v46  ;;  %4545 = vmatmul.mubr.msk.f32.gmra.mxu1 %vm1032_vm0, %v3104_v44 }
 0xa7d   :  { %v4913_v34 = vpop.f32.mrf.mxu1  ;;  %3231 = vmatprep.mubr.f32.mxu1 %v8071_v30 }
 0xa7e   :  { %v3105_v48 = vmul.f32 0.125, %v4912_v59 }
 0xa7f   :  { %v4914_v8 = vpop.f32.mrf.mxu1 }
 0xa80   :  { %v4915_v31 = vadd.f32 %v4914_v8, %v4913_v34  ;;  %4546 = vmatmul.mubr.msk.f32.gmra.mxu1 %vm1032_vm0, %v3105_v48 }
 0xa81   :  { %3237 = vmatprep.mubr.f32.mxu1 %v8071_v30 }
 0xa82   :  { %v3106_v55 = vmul.f32 0.125, %v4915_v31 }
 0xa84   :  { %4547 = vmatmul.mubr.msk.f32.gmra.mxu1 %vm1032_vm0, %v3106_v55 }
 0xa85   :  { %3493 = vmatprep.mubr.f32.mxu1 %v8071_v30 }
 0xb27   :  { %v3197_v0 = vpop.f32.mrf.mxu1 }
 0xb28   :  { %v7529_v52 = vsub.f32 %v7387_v58, %v3197_v0 }
 0xb29   :  { %v3199_v9 = vpop.f32.mrf.mxu1 }
 0xb2a   :  { %v7532_v10 = vsub.f32 %v7384_v19, %v3199_v9  ;;  %v3260_v61 = vmul.f32 %v7529_v52, %v7529_v52 }
 0xb2b   :  { %v3203_v12 = vpop.f32.mrf.mxu1 }
 0xb2c   :  { %v3261_v14 = vmul.f32 %v7532_v10, %v7532_v10  ;;  %v7539_v50 = vsub.f32 %v7404_v47, %v3203_v12 }
 0xb2d   :  { %v3205_v28 = vpop.f32.mrf.mxu1 }
 0xb2e   :  { %v7542_v39 = vsub.f32 %v7394_v37, %v3205_v28  ;;  %3340 = vmatprep.mubr.f32.mxu0 %v3261_v14  ;;  %v3262_v22 = vmul.f32 %v7539_v50, %v7539_v50  ;;  %v5200_v14 = vld [vmem:[#allocation7 + $0x270] ss:$8 sps:$4 sm:$0xff]   ;;  %v5205_v28 = vld [vmem:[#allocation7 + $0x264] ss:$8 sps:$4 sm:$0xff]  }
 0xb2f   :  { %v3209_v36 = vpop.f32.mrf.mxu1  ;;  %3341 = vmatmul.mubr.f32.vlgmr.msra.gmra.mxu0 %v3260_v61  ;;  %v5202_v61 = vld [vmem:[#allocation7 + $0x274] ss:$8 sps:$4 sm:$0xff]  }
 0xb30   :  { %v3263_v45 = vmul.f32 %v7542_v39, %v7542_v39  ;;  %v7549_v41 = vsub.f32 %v7438_v42, %v3209_v36  ;;  %3791 = vmatprep.subr.bf16.mxu0 %v5202_v61  ;;  %v5203_v36 = vld [vmem:[#allocation7 + $0x260] ss:$8 sps:$4 sm:$0xff]  }
 0xb31   :  { %v3211_v32 = vpop.f32.mrf.mxu1  ;;  %3792 = vmatpush1.bf16.msra.mxu0 %v5200_v14 }
 0xb32   :  { %v7552_v4 = vsub.f32 %v7428_v2, %v3211_v32  ;;  %3345 = vmatprep.mubr.f32.mxu0 %v3263_v45  ;;  %v3264_v26 = vmul.f32 %v7549_v41, %v7549_v41  ;;  %3793 = vmatprep.subr.bf16.mxu0 %v5205_v28  ;;  %v5208_v45 = vld [vmem:[#allocation7 + $0x254] ss:$8 sps:$4 sm:$0xff]   ;;  %v5211_v32 = vld [vmem:[#allocation7 + $0x244] ss:$8 sps:$4 sm:$0xff]  }
 0xb33   :  { %v3215_v60 = vpop.f32.mrf.mxu1  ;;  %3346 = vmatmul.mubr.f32.gmra.mxu0 %v3262_v22  ;;  %v5206_v22 = vld [vmem:[#allocation7 + $0x250] ss:$8 sps:$4 sm:$0xff]  }
 0xb34   :  { %v3265_v15 = vmul.f32 %v7552_v4, %v7552_v4  ;;  %v7559_v38 = vsub.f32 %v7460_v63, %v3215_v60  ;;  %v5209_v60 = vld [vmem:[#allocation7 + $0x240] ss:$8 sps:$4 sm:$0xff]  }
 0xb35   :  { %v3217_v17 = vpop.f32.mrf.mxu1  ;;  %3794 = vmatpush1.bf16.msra.mxu0 %v5203_v36 }
 0xb36   :  { %v7562_v23 = vsub.f32 %v7457_v25, %v3217_v17  ;;  %3350 = vmatprep.mubr.f32.mxu0 %v3265_v15  ;;  %v3266_v49 = vmul.f32 %v7559_v38, %v7559_v38  ;;  %3795 = vmatprep.subr.bf16.mxu0 %v5208_v45  ;;  %v5214_v15 = vld [vmem:[#allocation7 + $0x234] ss:$8 sps:$4 sm:$0xff]   ;;  %v5217_v17 = vld [vmem:[#allocation7 + $0x224] ss:$8 sps:$4 sm:$0xff]  }
 0xb37   :  { %3351 = vmatmul.mubr.f32.gmra.mxu0 %v3264_v26  ;;  %v5212_v26 = vld [vmem:[#allocation7 + $0x230] ss:$8 sps:$4 sm:$0xff]  }
 0xb38   :  { %v3267_v53 = vmul.f32 %v7562_v23, %v7562_v23  ;;  %v3221_v40 = vpop.f32.mrf.mxu1 }
 0xb39   :  { %v7569_v13 = vsub.f32 %v7471_v62, %v3221_v40  ;;  %3796 = vmatpush1.bf16.msra.mxu0 %v5206_v22  ;;  %v5220_v40 = vld [vmem:[#allocation7 + $0x214] ss:$8 sps:$4 sm:$0xff]  }
 0xb3a   :  { %v3223_v16 = vpop.f32.mrf.mxu1  ;;  %3355 = vmatprep.mubr.f32.mxu0 %v3267_v53  ;;  %3797 = vmatprep.subr.bf16.mxu0 %v5211_v32  ;;  %v5215_v53 = vld [vmem:[#allocation7 + $0x220] ss:$8 sps:$4 sm:$0xff]  }
 0xb3b   :  { %v7572_v21 = vsub.f32 %v7467_v1, %v3223_v16  ;;  %3356 = vmatmul.mubr.f32.gmra.mxu0 %v3266_v49  ;;  %v3268_v57 = vmul.f32 %v7569_v13, %v7569_v13  ;;  %v5218_v49 = vld [vmem:[#allocation7 + $0x210] ss:$8 sps:$4 sm:$0xff]   ;;  %v5223_v16 = vld [vmem:[#allocation7 + $0x204] ss:$8 sps:$4 sm:$0xff]  }
 0xb3c   :  { %v3227_v6 = vpop.f32.mrf.mxu1 }
 0xb3d   :  { %v3269_v7 = vmul.f32 %v7572_v21, %v7572_v21  ;;  %v7579_v11 = vsub.f32 %v7481_v24, %v3227_v6  ;;  %3798 = vmatpush1.bf16.msra.mxu0 %v5209_v60  ;;  %v5221_v6 = vld [vmem:[#allocation7 + $0x200] ss:$8 sps:$4 sm:$0xff]  }
 0xb3e   :  { %v3229_v33 = vpop.f32.mrf.mxu1  ;;  %3799 = vmatprep.subr.bf16.mxu0 %v5214_v15 }
 0xb3f   :  { %v7582_v43 = vsub.f32 %v7477_v5, %v3229_v33  ;;  %3360 = vmatprep.mubr.f32.mxu0 %v3269_v7  ;;  %v3270_v46 = vmul.f32 %v7579_v11, %v7579_v11  ;;  %v5226_v7 = vld [vmem:[#allocation7 + $0x2f4] ss:$8 sps:$4 sm:$0xff]   ;;  %v5229_v33 = vld [vmem:[#allocation7 + $0x2e4] ss:$8 sps:$4 sm:$0xff]  }
 0xb40   :  { %v3233_v27 = vpop.f32.mrf.mxu1  ;;  %3361 = vmatmul.mubr.f32.gmra.mxu0 %v3268_v57  ;;  %v5224_v57 = vld [vmem:[#allocation7 + $0x2f0] ss:$8 sps:$4 sm:$0xff]  }
 0xb41   :  { %v3271_v35 = vmul.f32 %v7582_v43, %v7582_v43  ;;  %v7589_v44 = vsub.f32 %v7491_v29, %v3233_v27  ;;  %3800 = vmatpush1.bf16.msra.mxu0 %v5212_v26  ;;  %v5227_v27 = vld [vmem:[#allocation7 + $0x2e0] ss:$8 sps:$4 sm:$0xff]  }
 0xb42   :  { %v3235_v3 = vpop.f32.mrf.mxu1  ;;  %3801 = vmatprep.subr.bf16.mxu0 %v5217_v17 }
 0xb43   :  { %v7592_v59 = vsub.f32 %v7487_v54, %v3235_v3  ;;  %3365 = vmatprep.mubr.f32.mxu0 %v3271_v35  ;;  %v3272_v8 = vmul.f32 %v7589_v44, %v7589_v44  ;;  %v5232_v35 = vld [vmem:[#allocation7 + $0x2d4] ss:$8 sps:$4 sm:$0xff]   ;;  %v5235_v3 = vld [vmem:[#allocation7 + $0x2c4] ss:$8 sps:$4 sm:$0xff]  }
 0xb44   :  { %v3239_v34 = vpop.f32.mrf.mxu1  ;;  %3366 = vmatmul.mubr.f32.gmra.mxu0 %v3270_v46  ;;  %v5230_v46 = vld [vmem:[#allocation7 + $0x2d0] ss:$8 sps:$4 sm:$0xff]  }
 0xb45   :  { %v3273_v48 = vmul.f32 %v7592_v59, %v7592_v59  ;;  %v7599_v31 = vsub.f32 %v7500_v20, %v3239_v34  ;;  %3802 = vmatpush1.bf16.msra.mxu0 %v5215_v53  ;;  %v5233_v34 = vld [vmem:[#allocation7 + $0x2c0] ss:$8 sps:$4 sm:$0xff]  }
 0xb46   :  { %v3241_v55 = vpop.f32.mrf.mxu1  ;;  %3803 = vmatprep.subr.bf16.mxu0 %v5220_v40 }
 0xb47   :  { %v7602_v0 = vsub.f32 %v7497_v51, %v3241_v55  ;;  %3370 = vmatprep.mubr.f32.mxu0 %v3273_v48  ;;  %v3274_v12 = vmul.f32 %v7599_v31, %v7599_v31 }
 0xb48   :  { %3371 = vmatmul.mubr.f32.gmra.mxu0 %v3272_v8 }
 0xb49   :  { %v3275_v9 = vmul.f32 %v7602_v0, %v7602_v0  ;;  %3804 = vmatpush1.bf16.msra.mxu0 %v5218_v49 }
 0xb4a   :  { %3805 = vmatprep.subr.bf16.mxu0 %v5223_v16 }
 0xb4b   :  { %3375 = vmatprep.mubr.f32.mxu0 %v3275_v9 }
 0xb4c   :  { %3376 = vmatmul.mubr.f32.gmra.mxu0 %v3274_v12 }
 0xb4d   :  { %3806 = vmatpush1.bf16.msra.mxu0 %v5221_v6 }
 0xb4e   :  { %3807 = vmatprep.subr.bf16.mxu0 %v5226_v7 }
 0xb51   :  { %3808 = vmatpush2.bf16.msra.mxu0 %v5224_v57 }
 0xb52   :  { %3809 = vmatprep.subr.bf16.mxu0 %v5229_v33 }
 0xb55   :  { %3810 = vmatpush2.bf16.msra.mxu0 %v5227_v27 }
 0xb56   :  { %3811 = vmatprep.subr.bf16.mxu0 %v5232_v35 }
 0xb59   :  { %3812 = vmatpush2.bf16.msra.mxu0 %v5230_v46 }
 0xb5a   :  { %3813 = vmatprep.subr.bf16.mxu0 %v5235_v3 }
 0xb5d   :  { %3814 = vmatpush2.bf16.msra.mxu0 %v5233_v34 }
 0xbef   :  { %v4948_v48 = vpop.f32.mrf.mxu0 }
 0xbf1   :  { %v4949_v8 = vpop.f32.mrf.mxu0 }
 0xbf2   :  { %v4950_v55 = vadd.f32 %v4949_v8, %v4948_v48 }
 0xbf3   :  { %v4951_v9 = vpop.f32.mrf.mxu0 }
 0xbf4   :  { %v3381_v12 = vmul.f32 0.125, %v4950_v55 }
 0xbf5   :  { %v4952_v14 = vpop.f32.mrf.mxu0 }
 0xbf6   :  { %v3389_v61 = vadd.f32 1e-05, %v3381_v12  ;;  %v4953_v28 = vadd.f32 %v4952_v14, %v4951_v9 }
 0xbf7   :  { %v4954_v36 = vpop.f32.mrf.mxu0 }
 0xbf8   :  { %5520 = vrsqrt.f32 %v3389_v61  ;;  %v3382_v45 = vmul.f32 0.125, %v4953_v28 }
 0xbf9   :  { %v4955_v22 = vpop.f32.mrf.mxu0 }
 0xbfa   :  { %v3390_v32 = vadd.f32 1e-05, %v3382_v45  ;;  %v4956_v60 = vadd.f32 %v4955_v22, %v4954_v36 }
 0xbfb   :  { %v4957_v15 = vpop.f32.mrf.mxu0 }
 0xbfc   :  { %5522 = vrsqrt.f32 %v3390_v32  ;;  %v3383_v26 = vmul.f32 0.125, %v4956_v60 }
 0xbfd   :  { %v4958_v17 = vpop.f32.mrf.mxu0 }
 0xbfe   :  { %v3391_v53 = vadd.f32 1e-05, %v3383_v26  ;;  %v4959_v40 = vadd.f32 %v4958_v17, %v4957_v15 }
 0xc00   :  { %5524 = vrsqrt.f32 %v3391_v53  ;;  %v3384_v49 = vmul.f32 0.125, %v4959_v40  ;;  %v4960_v16 = vpop.f32.mrf.mxu0 }
 0xc02   :  { %v3392_v6 = vadd.f32 1e-05, %v3384_v49  ;;  %v4961_v7 = vpop.f32.mrf.mxu0 }
 0xc03   :  { %v4962_v57 = vadd.f32 %v4961_v7, %v4960_v16  ;;  %v5238_v16 = vld [vmem:[#allocation7 + $0x2b4] ss:$8 sps:$4 sm:$0xff]   ;;  %v5241_v7 = vld [vmem:[#allocation7 + $0x2a4] ss:$8 sps:$4 sm:$0xff]  }
 0xc04   :  { %5526 = vrsqrt.f32 %v3392_v6  ;;  %v4963_v33 = vpop.f32.mrf.mxu0  ;;  %v5236_v6 = vld [vmem:[#allocation7 + $0x2b0] ss:$8 sps:$4 sm:$0xff]   ;;  %3815 = vmatprep.subr.bf16.mxu0 %v5238_v16 }
 0xc05   :  { %v5521_v27 = vpop.eup %5520  ;;  %v3385_v35 = vmul.f32 0.125, %v4962_v57  ;;  %3816 = vmatpush2.bf16.msra.mxu0 %v5236_v6  ;;  %v5239_v57 = vld [vmem:[#allocation7 + $0x2a0] ss:$8 sps:$4 sm:$0xff]  }
 0xc06   :  { %v4964_v46 = vpop.f32.mrf.mxu0  ;;  %4548 = vmatmul.mubr.msk.f32.vlgmr.msra.gmra.mxu1 %vm1032_vm0, %v5521_v27  ;;  %3817 = vmatprep.subr.bf16.mxu0 %v5241_v7  ;;  %v5242_v27 = vld [vmem:[#allocation7 + $0x290] ss:$8 sps:$4 sm:$0xff]  }
 0xc07   :  { %v3393_v3 = vadd.f32 1e-05, %v3385_v35  ;;  %v4965_v34 = vadd.f32 %v4964_v46, %v4963_v33  ;;  %3499 = vmatprep.mubr.f32.mxu1 %v8071_v30  ;;  %v5244_v33 = vld [vmem:[#allocation7 + $0x294] ss:$8 sps:$4 sm:$0xff]   ;;  %v5247_v35 = vld [vmem:[#allocation7 + $0x284] ss:$8 sps:$4 sm:$0xff]  }
 0xc08   :  { %v4966_v48 = vpop.f32.mrf.mxu0  ;;  %v5245_v46 = vld [vmem:[#allocation7 + $0x280] ss:$8 sps:$4 sm:$0xff]  }
 0xc09   :  { %v5523_v8 = vpop.eup %5522  ;;  %5528 = vrsqrt.f32 %v3393_v3  ;;  %v3386_v55 = vmul.f32 0.125, %v4965_v34  ;;  %3818 = vmatpush2.bf16.msra.mxu0 %v5239_v57  ;;  %v5250_v3 = vld [vmem:[%s7907_s9 + $0x74] ss:$8 sps:$4 sm:$0xff]   ;;  %v5253_v34 = vld [vmem:[%s7907_s9 + $0x64] ss:$8 sps:$4 sm:$0xff]  }
 0xc0a   :  { %v4967_v9 = vpop.f32.mrf.mxu0  ;;  %4549 = vmatmul.mubr.msk.f32.gmra.mxu1 %vm1032_vm0, %v5523_v8  ;;  %3819 = vmatprep.subr.bf16.mxu0 %v5244_v33  ;;  %v5256_v8 = vld [vmem:[%s7907_s9 + $0x54] ss:$8 sps:$4 sm:$0xff]  }
 0xc0b   :  { %v3394_v12 = vadd.f32 1e-05, %v3386_v55  ;;  %v4968_v14 = vadd.f32 %v4967_v9, %v4966_v48  ;;  %3505 = vmatprep.mubr.f32.mxu1 %v8071_v30  ;;  %4204 = vmatprep.subr.bf16.mxu1 %v5250_v3  ;;  %v5251_v48 = vld [vmem:[%s7907_s9 + $0x60] ss:$8 sps:$4 sm:$0xff]   ;;  %v5254_v55 = vld [vmem:[%s7907_s9 + $0x50] ss:$8 sps:$4 sm:$0xff]  }
 0xc0c   :  { %v4969_v61 = vpop.f32.mrf.mxu0  ;;  %v5259_v9 = vld [vmem:[%s7907_s9 + $0x44] ss:$8 sps:$4 sm:$0xff]  }
 0xc0d   :  { %v5525_v28 = vpop.eup %5524  ;;  %5530 = vrsqrt.f32 %v3394_v12  ;;  %v3387_v36 = vmul.f32 0.125, %v4968_v14  ;;  %3820 = vmatpush2.bf16.msra.mxu0 %v5242_v27  ;;  %v5257_v12 = vld [vmem:[%s7907_s9 + $0x40] ss:$8 sps:$4 sm:$0xff]   ;;  %v4538_v14 = vld [vmem:[%s7903_s5 + $0x4] sm:$0x3] }
 0xc0e   :  { %v4970_v45 = vpop.f32.mrf.mxu0  ;;  %4550 = vmatmul.mubr.msk.f32.gmra.mxu1 %vm1032_vm0, %v5525_v28  ;;  %3821 = vmatprep.subr.bf16.mxu0 %v5247_v35 }
 0xc0f   :  { %v3395_v22 = vadd.f32 1e-05, %v3387_v36  ;;  %v4971_v32 = vadd.f32 %v4970_v45, %v4969_v61  ;;  %3511 = vmatprep.mubr.f32.mxu1 %v8071_v30  ;;  %v7651_v61 = vrot.slane %v4538_v14, %v8053_v18  ;;  %v7654_v36 = vrot.slane %v4538_v14, %v8052_v56 }
 0xc11   :  { %v5527_v60 = vpop.eup %5526  ;;  %5532 = vrsqrt.f32 %v3395_v22  ;;  %v3388_v15 = vmul.f32 0.125, %v4971_v32  ;;  %3822 = vmatpush2.bf16.msra.mxu0 %v5245_v46 }
 0xc12   :  { %4551 = vmatmul.mubr.msk.f32.gmra.mxu1 %vm1032_vm0, %v5527_v60 }
 0xc13   :  { %v3396_v26 = vadd.f32 1e-05, %v3388_v15  ;;  %3517 = vmatprep.mubr.f32.mxu1 %v8071_v30  ;;  %v4539_v15 = vld [vmem:[%s7904_s6 + $0x4] sm:$0x3] }
 0xc14   :  { %v7670_v7 = vrot.slane %v4539_v15, %v8052_v56 }
 0xc15   :  { %5534 = vrsqrt.f32 %v3396_v26 }
 0xc16   :  { %v5529_v17 = vpop.eup %5528 }
 0xc17   :  { %4552 = vmatmul.mubr.msk.f32.gmra.mxu1 %vm1032_vm0, %v5529_v17 }
 0xc18   :  { %3523 = vmatprep.mubr.f32.mxu1 %v8071_v30 }
 0xc1a   :  { %v5531_v53 = vpop.eup %5530 }
 0xc1b   :  { %4553 = vmatmul.mubr.msk.f32.gmra.mxu1 %vm1032_vm0, %v5531_v53 }
 0xc1c   :  { %3529 = vmatprep.mubr.f32.mxu1 %v8071_v30 }
 0xc1e   :  { %v5533_v40 = vpop.eup %5532 }
 0xc1f   :  { %4554 = vmatmul.mubr.msk.f32.gmra.mxu1 %vm1032_vm0, %v5533_v40  ;;  %v7664_v40 = vrot.slane %v4539_v15, %v8053_v18 }
 0xc20   :  { %3535 = vmatprep.mubr.f32.mxu1 %v8071_v30  ;;  %v5248_v30 = vld [vmem:[%s7907_s9 + $0x70] ss:$8 sps:$4 sm:$0xff]  }
 0xc21   :  { %4205 = vmatpush1.bf16.msra.mxu1 %v5248_v30 }
 0xc22   :  { %v5535_v49 = vpop.eup %5534  ;;  %4206 = vmatprep.subr.bf16.mxu1 %v5253_v34 }
 0xc23   :  { %4555 = vmatmul.mubr.msk.f32.gmra.mxu1 %vm1032_vm0, %v5535_v49 }
 0xc25   :  { %4207 = vmatpush1.bf16.msra.mxu1 %v5251_v48 }
 0xc26   :  { %4208 = vmatprep.subr.bf16.mxu1 %v5256_v8 }
 0xc29   :  { %4209 = vmatpush1.bf16.msra.mxu1 %v5254_v55 }
 0xc2a   :  { %4210 = vmatprep.subr.bf16.mxu1 %v5259_v9 }
 0xc2d   :  { %4211 = vmatpush1.bf16.msra.mxu1 %v5257_v12 }
 0xcc6   :  { %v3495_v28 = vpop.f32.mrf.mxu1 }
 0xcc7   :  { %v3553_v32 = vmul.f32 %v7654_v36, %v3495_v28 }
 0xcc8   :  { %v3497_v45 = vpop.f32.mrf.mxu1 }
 0xcc9   :  { %v3554_v22 = vmul.f32 %v7651_v61, %v3497_v45  ;;  %v3569_v6 = vmul.f32 %v3553_v32, %v7529_v52 }
 0xcca   :  { %v3501_v60 = vpop.f32.mrf.mxu1 }
 0xccb   :  { %v3555_v26 = vmul.f32 %v7654_v36, %v3501_v60  ;;  %v3570_v53 = vmul.f32 %v3554_v22, %v7532_v10 }
 0xccc   :  { %v3503_v17 = vpop.f32.mrf.mxu1 }
 0xccd   :  { %v3571_v49 = vmul.f32 %v3555_v26, %v7539_v50  ;;  %v3556_v16 = vmul.f32 %v7651_v61, %v3503_v17  ;;  %v3597_v10 = vadd.f32 %v7664_v40, %v3570_v53  ;;  %v3596_v50 = vadd.f32 %v7670_v7, %v3569_v6 }
 0xcce   :  { %v3507_v57 = vpop.f32.mrf.mxu1 }
 0xccf   :  { %v3572_v33 = vmul.f32 %v3556_v16, %v7542_v39  ;;  %v3598_v27 = vadd.f32 %v7670_v7, %v3571_v49  ;;  %v3557_v3 = vmul.f32 %v7654_v36, %v3507_v57 }
 0xcd0   :  { %v3509_v35 = vpop.f32.mrf.mxu1 }
 0xcd1   :  { %v3599_v46 = vadd.f32 %v7664_v40, %v3572_v33  ;;  %v3558_v30 = vmul.f32 %v7651_v61, %v3509_v35  ;;  %v3612_v8 = vpack.c.bf16 %v3598_v27, %v3596_v50  ;;  %v3573_v14 = vmul.f32 %v3557_v3, %v7549_v41 }
 0xcd2   :  { %v3513_v52 = vpop.f32.mrf.mxu1 }
 0xcd3   :  { %v3559_v34 = vmul.f32 %v7654_v36, %v3513_v52  ;;  %v3613_v48 = vpack.c.bf16 %v3599_v46, %v3597_v10  ;;  %v3574_v39 = vmul.f32 %v3558_v30, %v7552_v4  ;;  %v3600_v4 = vadd.f32 %v7670_v7, %v3573_v14 }
 0xcd4   :  { %v3515_v55 = vpop.f32.mrf.mxu1 }
 0xcd5   :  { %v3575_v9 = vmul.f32 %v3559_v34, %v7559_v38  ;;  %v3560_v12 = vmul.f32 %v7651_v61, %v3515_v55  ;;  %3823 = vmatprep.mubr.bf16.mxu0 %v3613_v48  ;;  %v3601_v32 = vadd.f32 %v7664_v40, %v3574_v39 }
 0xcd6   :  { %3824 = vmatmul.mubr.bf16.vlgmr.msra.gmra.mxu0 %v3612_v8 }
 0xcd7   :  { %v3576_v28 = vmul.f32 %v3560_v12, %v7562_v23  ;;  %v3519_v45 = vpop.f32.mrf.mxu1  ;;  %v3602_v22 = vadd.f32 %v7670_v7, %v3575_v9 }
 0xcd8   :  { %v3561_v26 = vmul.f32 %v7654_v36, %v3519_v45 }
 0xcd9   :  { %v3603_v60 = vadd.f32 %v7664_v40, %v3576_v28  ;;  %v3521_v15 = vpop.f32.mrf.mxu1  ;;  %v3614_v41 = vpack.c.bf16 %v3602_v22, %v3600_v4  ;;  %v5272_v4 = vld [vmem:[%s7907_s9 + $0xf0] ss:$8 sps:$4 sm:$0xff]  }
 0xcda   :  { %v3562_v38 = vmul.f32 %v7651_v61, %v3521_v15  ;;  %v3577_v33 = vmul.f32 %v3561_v26, %v7569_v13  ;;  %v5274_v15 = vld [vmem:[%s7907_s9 + $0xf4] ss:$8 sps:$4 sm:$0xff]   ;;  %v5275_v26 = vld [vmem:[%s7907_s9 + $0xe0] ss:$8 sps:$4 sm:$0xff]  }
 0xcdb   :  { %v3525_v17 = vpop.f32.mrf.mxu1  ;;  %v3615_v53 = vpack.c.bf16 %v3603_v60, %v3601_v32  ;;  %v5271_v32 = vld [vmem:[%s7907_s9 + $0x4] ss:$8 sps:$4 sm:$0xff]   ;;  %v5269_v60 = vld [vmem:[%s7907_s9] ss:$8 sps:$4 sm:$0xff]  }
 0xcdc   :  { %v3563_v49 = vmul.f32 %v7654_v36, %v3525_v17  ;;  %v3578_v16 = vmul.f32 %v3562_v38, %v7572_v21  ;;  %v3604_v21 = vadd.f32 %v7670_v7, %v3577_v33  ;;  %v5277_v38 = vld [vmem:[%s7907_s9 + $0xe4] ss:$8 sps:$4 sm:$0xff]   ;;  %v5280_v17 = vld [vmem:[%s7907_s9 + $0xd4] ss:$8 sps:$4 sm:$0xff]  }
 0xcdd   :  { %v3527_v23 = vpop.f32.mrf.mxu1  ;;  %3833 = vmatprep.mubr.bf16.mxu0 %v3615_v53  ;;  %v5278_v53 = vld [vmem:[%s7907_s9 + $0xd0] ss:$8 sps:$4 sm:$0xff]   ;;  %v5292_v33 = vld [vmem:[%s7907_s9 + $0x94] ss:$8 sps:$4 sm:$0xff]  }
 0xcde   :  { %v3579_v6 = vmul.f32 %v3563_v49, %v7579_v11  ;;  %v3564_v57 = vmul.f32 %v7651_v61, %v3527_v23  ;;  %3834 = vmatmul.mubr.bf16.gmra.mxu0 %v3614_v41  ;;  %v3605_v30 = vadd.f32 %v7664_v40, %v3578_v16  ;;  %v5283_v41 = vld [vmem:[%s7907_s9 + $0xc4] ss:$8 sps:$4 sm:$0xff]   ;;  %v5281_v49 = vld [vmem:[%s7907_s9 + $0xc0] ss:$8 sps:$4 sm:$0xff]   ;;  %v5286_v23 = vld [vmem:[%s7907_s9 + $0xb4] ss:$8 sps:$4 sm:$0xff]  }
 0xcdf   :  { %v3531_v27 = vpop.f32.mrf.mxu1  ;;  %v5284_v16 = vld [vmem:[%s7907_s9 + $0xb0] ss:$8 sps:$4 sm:$0xff]  }
 0xce0   :  { %v3580_v35 = vmul.f32 %v3564_v57, %v7582_v43  ;;  %v3606_v10 = vadd.f32 %v7670_v7, %v3579_v6  ;;  %v3565_v11 = vmul.f32 %v7654_v36, %v3531_v27  ;;  %v5289_v6 = vld [vmem:[%s7907_s9 + $0xa4] ss:$8 sps:$4 sm:$0xff]   ;;  %v5287_v57 = vld [vmem:[%s7907_s9 + $0xa0] ss:$8 sps:$4 sm:$0xff]   ;;  %v5290_v27 = vld [vmem:[%s7907_s9 + $0x90] ss:$8 sps:$4 sm:$0xff]  }
 0xce1   :  { %v3533_v46 = vpop.f32.mrf.mxu1 }
 0xce2   :  { %v3607_v50 = vadd.f32 %v7664_v40, %v3580_v35  ;;  %v3566_v3 = vmul.f32 %v7651_v61, %v3533_v46  ;;  %v3616_v48 = vpack.c.bf16 %v3606_v10, %v3604_v21  ;;  %v3581_v9 = vmul.f32 %v3565_v11, %v7589_v44  ;;  %v5260_v44 = vld [vmem:[%s7907_s9 + $0x30] ss:$8 sps:$4 sm:$0xff]   ;;  %v5295_v35 = vld [vmem:[%s7907_s9 + $0x84] ss:$8 sps:$4 sm:$0xff]   ;;  %v5293_v10 = vld [vmem:[%s7907_s9 + $0x80] ss:$8 sps:$4 sm:$0xff]  }
 0xce3   :  { %v3537_v52 = vpop.f32.mrf.mxu1  ;;  %v2993_v46 = vld [vmem:[#allocation8 + $0x4] sm:$0x3] }
 0xce4   :  { %v3567_v34 = vmul.f32 %v7654_v36, %v3537_v52  ;;  %v3617_v13 = vpack.c.bf16 %v3607_v50, %v3605_v30  ;;  %v3582_v43 = vmul.f32 %v3566_v3, %v7592_v59  ;;  %v3608_v45 = vadd.f32 %v7670_v7, %v3581_v9 }
 0xce5   :  { %v3539_v8 = vpop.f32.mrf.mxu1  ;;  %v7786_v30 = vrot.slane %v2993_v46, %v8052_v56  ;;  %v7789_v50 = vrot.slane %v2993_v46, %v8053_v18 }
 0xce6   :  { %v3583_v55 = vmul.f32 %v3567_v34, %v7599_v31  ;;  %v3568_v39 = vmul.f32 %v7651_v61, %v3539_v8  ;;  %3843 = vmatprep.mubr.bf16.mxu0 %v3617_v13  ;;  %v3609_v28 = vadd.f32 %v7664_v40, %v3582_v43  ;;  %v5262_v31 = vld [vmem:[%s7907_s9 + $0x34] ss:$8 sps:$4 sm:$0xff]   ;;  %v5263_v61 = vld [vmem:[%s7907_s9 + $0x20] ss:$8 sps:$4 sm:$0xff]  }
 0xce7   :  { %3844 = vmatmul.mubr.bf16.gmra.mxu0 %v3616_v48  ;;  %4212 = vmatprep.subr.bf16.mxu1 %v5262_v31 }
 0xce8   :  { %v3584_v12 = vmul.f32 %v3568_v39, %v7602_v0  ;;  %v3610_v14 = vadd.f32 %v7670_v7, %v3583_v55  ;;  %4213 = vmatpush1.bf16.msra.mxu1 %v5260_v44  ;;  %v5265_v0 = vld [vmem:[%s7907_s9 + $0x24] ss:$8 sps:$4 sm:$0xff]   ;;  %v5266_v7 = vld [vmem:[%s7907_s9 + $0x10] ss:$8 sps:$4 sm:$0xff]  }
 0xce9   :  { %4214 = vmatprep.subr.bf16.mxu1 %v5265_v0 }
 0xcea   :  { %v3611_v36 = vadd.f32 %v7664_v40, %v3584_v12  ;;  %v3618_v59 = vpack.c.bf16 %v3610_v14, %v3608_v45  ;;  %v5268_v40 = vld [vmem:[%s7907_s9 + $0x14] ss:$8 sps:$4 sm:$0xff]  }
 0xcec   :  { %v3619_v22 = vpack.c.bf16 %v3611_v36, %v3609_v28  ;;  %4215 = vmatpush1.bf16.msra.mxu1 %v5263_v61 }
 0xced   :  { %4216 = vmatprep.subr.bf16.mxu1 %v5268_v40 }
 0xcee   :  { %3853 = vmatprep.mubr.bf16.mxu0 %v3619_v22 }
 0xcef   :  { %3854 = vmatmul.mubr.bf16.gmra.mxu0 %v3618_v59 }
 0xcf0   :  { %4217 = vmatpush1.bf16.msra.mxu1 %v5266_v7 }
 0xcf1   :  { %4218 = vmatprep.subr.bf16.mxu1 %v5271_v32 }
 0xcf4   :  { %4219 = vmatpush1.bf16.msra.mxu1 %v5269_v60 }
 0xcf5   :  { %4220 = vmatprep.subr.bf16.mxu1 %v5274_v15 }
 0xcf8   :  { %4221 = vmatpush2.bf16.msra.mxu1 %v5272_v4 }
 0xcf9   :  { %4222 = vmatprep.subr.bf16.mxu1 %v5277_v38 }
 0xcfc   :  { %4223 = vmatpush2.bf16.msra.mxu1 %v5275_v26 }
 0xcfd   :  { %4224 = vmatprep.subr.bf16.mxu1 %v5280_v17 }
 0xd00   :  { %4225 = vmatpush2.bf16.msra.mxu1 %v5278_v53 }
 0xd01   :  { %4226 = vmatprep.subr.bf16.mxu1 %v5283_v41 }
 0xd04   :  { %4227 = vmatpush2.bf16.msra.mxu1 %v5281_v49 }
 0xd05   :  { %4228 = vmatprep.subr.bf16.mxu1 %v5286_v23 }
 0xd08   :  { %4229 = vmatpush2.bf16.msra.mxu1 %v5284_v16 }
 0xd09   :  { %4230 = vmatprep.subr.bf16.mxu1 %v5289_v6 }
 0xd0c   :  { %4231 = vmatpush2.bf16.msra.mxu1 %v5287_v57 }
 0xd0d   :  { %4232 = vmatprep.subr.bf16.mxu1 %v5292_v33 }
 0xd10   :  { %4233 = vmatpush2.bf16.msra.mxu1 %v5290_v27 }
 0xd11   :  { %4234 = vmatprep.subr.bf16.mxu1 %v5295_v35 }
 0xd14   :  { %4235 = vmatpush2.bf16.msra.mxu1 %v5293_v10 }
 0xd96   :  { %v3825_v3 = vpop.f32.mrf.mxu0 }
 0xd97   :  { %v7792_v21 = vadd.f32 %v3825_v3, %v7786_v30 }
 0xd98   :  { %v3827_v11 = vpop.f32.mrf.mxu0 }
 0xd99   :  { %v4588_v52 = vmul.f32 -1.442695, %v7792_v21  ;;  %v7796_v34 = vadd.f32 %v3827_v11, %v7789_v50 }
 0xd9a   :  { %v3829_v13 = vpop.f32.mrf.mxu0 }
 0xd9b   :  { %5536 = vpow2.f32 %v4588_v52  ;;  %v4589_v48 = vmul.f32 -1.442695, %v7796_v34  ;;  %v7800_v8 = vadd.f32 %v3829_v13, %v7786_v30 }
 0xd9c   :  { %v3831_v43 = vpop.f32.mrf.mxu0 }
 0xd9d   :  { %5538 = vpow2.f32 %v4589_v48  ;;  %v4590_v55 = vmul.f32 -1.442695, %v7800_v8  ;;  %v7804_v39 = vadd.f32 %v3831_v43, %v7789_v50 }
 0xd9e   :  { %v3835_v9 = vpop.f32.mrf.mxu0 }
 0xd9f   :  { %5540 = vpow2.f32 %v4590_v55  ;;  %v4591_v12 = vmul.f32 -1.442695, %v7804_v39  ;;  %v7808_v14 = vadd.f32 %v3835_v9, %v7786_v30 }
 0xda0   :  { %v3837_v28 = vpop.f32.mrf.mxu0 }
 0xda1   :  { %5542 = vpow2.f32 %v4591_v12  ;;  %v4592_v36 = vmul.f32 -1.442695, %v7808_v14  ;;  %v7812_v45 = vadd.f32 %v3837_v28, %v7789_v50 }
 0xda2   :  { %v3839_v22 = vpop.f32.mrf.mxu0 }
 0xda3   :  { %5544 = vpow2.f32 %v4592_v36  ;;  %v4593_v59 = vmul.f32 -1.442695, %v7812_v45  ;;  %v7816_v31 = vadd.f32 %v3839_v22, %v7786_v30 }
 0xda4   :  { %v3841_v44 = vpop.f32.mrf.mxu0 }
 0xda5   :  { %5546 = vpow2.f32 %v4593_v59  ;;  %v4594_v0 = vmul.f32 -1.442695, %v7816_v31  ;;  %v7820_v61 = vadd.f32 %v3841_v44, %v7789_v50 }
 0xda7   :  { %5548 = vpow2.f32 %v4594_v0  ;;  %v4595_v40 = vmul.f32 -1.442695, %v7820_v61  ;;  %v3845_v7 = vpop.f32.mrf.mxu0 }
 0xda8   :  { %v5537_v32 = vpop.eup %5536  ;;  %v7824_v60 = vadd.f32 %v3845_v7, %v7786_v30 }
 0xda9   :  { %v3912_v15 = vadd.f32 1.0, %v5537_v32  ;;  %5550 = vpow2.f32 %v4595_v40  ;;  %v3847_v4 = vpop.f32.mrf.mxu0 }
 0xdaa   :  { %v5539_v38 = vpop.eup %5538  ;;  %v4596_v26 = vmul.f32 -1.442695, %v7824_v60  ;;  %v7828_v17 = vadd.f32 %v3847_v4, %v7789_v50 }
 0xdab   :  { %5552 = vrcp.f32 %v3912_v15  ;;  %v3913_v53 = vadd.f32 1.0, %v5539_v38  ;;  %v3849_v41 = vpop.f32.mrf.mxu0 }
 0xdac   :  { %v5541_v49 = vpop.eup %5540  ;;  %5554 = vpow2.f32 %v4596_v26  ;;  %v4597_v23 = vmul.f32 -1.442695, %v7828_v17  ;;  %v7832_v16 = vadd.f32 %v3849_v41, %v7786_v30 }
 0xdad   :  { %5556 = vrcp.f32 %v3913_v53  ;;  %v3914_v6 = vadd.f32 1.0, %v5541_v49  ;;  %v3851_v57 = vpop.f32.mrf.mxu0 }
 0xdae   :  { %v5543_v33 = vpop.eup %5542  ;;  %5558 = vpow2.f32 %v4597_v23  ;;  %v4598_v27 = vmul.f32 -1.442695, %v7832_v16  ;;  %v7836_v35 = vadd.f32 %v3851_v57, %v7789_v50 }
 0xdaf   :  { %5560 = vrcp.f32 %v3914_v6  ;;  %v3915_v10 = vadd.f32 1.0, %v5543_v33  ;;  %v3855_v46 = vpop.f32.mrf.mxu0 }
 0xdb0   :  { %v5545_v3 = vpop.eup %5544  ;;  %5562 = vpow2.f32 %v4598_v27  ;;  %v4599_v11 = vmul.f32 -1.442695, %v7836_v35  ;;  %v7840_v52 = vadd.f32 %v3855_v46, %v7786_v30 }
 0xdb1   :  { %5564 = vrcp.f32 %v3915_v10  ;;  %v3916_v13 = vadd.f32 1.0, %v5545_v3  ;;  %v3857_v48 = vpop.f32.mrf.mxu0 }
 0xdb2   :  { %v5547_v43 = vpop.eup %5546  ;;  %5566 = vpow2.f32 %v4599_v11  ;;  %v4600_v55 = vmul.f32 -1.442695, %v7840_v52  ;;  %v7844_v9 = vadd.f32 %v3857_v48, %v7789_v50 }
 0xdb3   :  { %5568 = vrcp.f32 %v3916_v13  ;;  %v3917_v12 = vadd.f32 1.0, %v5547_v43  ;;  %v3859_v28 = vpop.f32.mrf.mxu0 }
 0xdb4   :  { %v5549_v36 = vpop.eup %5548  ;;  %5570 = vpow2.f32 %v4600_v55  ;;  %v4601_v22 = vmul.f32 -1.442695, %v7844_v9  ;;  %v7848_v59 = vadd.f32 %v3859_v28, %v7786_v30 }
 0xdb5   :  { %5572 = vrcp.f32 %v3917_v12  ;;  %v3918_v44 = vadd.f32 1.0, %v5549_v36  ;;  %v3861_v0 = vpop.f32.mrf.mxu0 }
 0xdb6   :  { %v5551_v40 = vpop.eup %5550  ;;  %5574 = vpow2.f32 %v4601_v22  ;;  %v4602_v7 = vmul.f32 -1.442695, %v7848_v59  ;;  %v7852_v32 = vadd.f32 %v3861_v0, %v7789_v50 }
 0xdb7   :  { %5576 = vrcp.f32 %v3918_v44  ;;  %v3919_v15 = vadd.f32 1.0, %v5551_v40 }
 0xdb8   :  { %v5553_v4 = vpop.eup %5552  ;;  %5578 = vpow2.f32 %v4602_v7  ;;  %v4603_v38 = vmul.f32 -1.442695, %v7852_v32 }
 0xdb9   :  { %v5555_v26 = vpop.eup %5554  ;;  %5580 = vrcp.f32 %v3919_v15  ;;  %v3960_v27 = vmul.f32 %v5553_v4, %v7792_v21 }
 0xdba   :  { %v5557_v30 = vpop.eup %5556  ;;  %5582 = vpow2.f32 %v4603_v38  ;;  %v3920_v41 = vadd.f32 1.0, %v5555_v26 }
 0xdbb   :  { %v5559_v53 = vpop.eup %5558  ;;  %v3961_v57 = vmul.f32 %v5557_v30, %v7796_v34  ;;  %v3976_v12 = vadd.f32 %v3960_v27, %v7387_v58 }
 0xdbc   :  { %v5561_v49 = vpop.eup %5560  ;;  %v3921_v23 = vadd.f32 1.0, %v5559_v53 }
 0xdbd   :  { %v5563_v6 = vpop.eup %5562  ;;  %v3962_v50 = vmul.f32 %v5561_v49, %v7800_v8  ;;  %v3977_v55 = vadd.f32 %v3961_v57, %v7384_v19 }
 0xdbe   :  { %v5565_v33 = vpop.eup %5564  ;;  %5584 = vrcp.f32 %v3921_v23  ;;  %v3922_v10 = vadd.f32 1.0, %v5563_v6 }
 0xdbf   :  { %v5567_v46 = vpop.eup %5566  ;;  %v3963_v3 = vmul.f32 %v5565_v33, %v7804_v39  ;;  %5586 = vrcp.f32 %v3920_v41  ;;  %v3978_v13 = vadd.f32 %v3962_v50, %v7404_v47 }
 0xdc0   :  { %v5569_v11 = vpop.eup %5568  ;;  %5588 = vrcp.f32 %v3922_v10  ;;  %v3923_v48 = vadd.f32 1.0, %v5567_v46 }
 0xdc1   :  { %v5571_v43 = vpop.eup %5570  ;;  %v3979_v34 = vadd.f32 %v3963_v3, %v7394_v37  ;;  %v3992_v39 = vpack.c.bf16 %v3978_v13, %v3976_v12  ;;  %v3964_v19 = vmul.f32 %v5569_v11, %v7808_v14 }
 0xdc2   :  { %v5573_v8 = vpop.eup %5572  ;;  %5590 = vrcp.f32 %v3923_v48  ;;  %v3924_v28 = vadd.f32 1.0, %v5571_v43 }
 0xdc3   :  { %v5575_v21 = vpop.eup %5574  ;;  %v3993_v36 = vpack.c.bf16 %v3979_v34, %v3977_v55  ;;  %v3965_v47 = vmul.f32 %v5573_v8, %v7812_v45 }
 0xdc4   :  { %v5577_v22 = vpop.eup %5576  ;;  %v3925_v44 = vadd.f32 1.0, %v5575_v21 }
 0xdc5   :  { %v5579_v0 = vpop.eup %5578  ;;  %v3966_v40 = vmul.f32 %v5577_v22, %v7816_v31  ;;  %4236 = vmatprep.mubr.bf16.mxu1 %v3993_v36  ;;  %v3981_v26 = vadd.f32 %v3965_v47, %v7428_v2  ;;  %v3980_v31 = vadd.f32 %v3964_v19, %v7438_v42 }
 0xdc6   :  { %v5581_v7 = vpop.eup %5580  ;;  %5592 = vrcp.f32 %v3925_v44  ;;  %v3926_v37 = vadd.f32 1.0, %v5579_v0  ;;  %4237 = vmatmul.mubr.bf16.vlgmr.msra.gmra.mxu1 %v3992_v39 }
 0xdc7   :  { %v5583_v58 = vpop.eup %5582  ;;  %v3967_v15 = vmul.f32 %v5581_v7, %v7820_v61  ;;  %5594 = vrcp.f32 %v3924_v28  ;;  %v3982_v4 = vadd.f32 %v3966_v40, %v7460_v63 }
 0xdc8   :  { %5596 = vrcp.f32 %v3926_v37  ;;  %v3927_v38 = vadd.f32 1.0, %v5583_v58 }
 0xdc9   :  { %v3983_v45 = vadd.f32 %v3967_v15, %v7457_v25  ;;  %v3994_v41 = vpack.c.bf16 %v3982_v4, %v3980_v31 }
 0xdca   :  { %5598 = vrcp.f32 %v3927_v38 }
 0xdcb   :  { %v5585_v30 = vpop.eup %5584  ;;  %v3995_v14 = vpack.c.bf16 %v3983_v45, %v3981_v26 }
 0xdcc   :  { %v5587_v53 = vpop.eup %5586  ;;  %v3969_v61 = vmul.f32 %v5585_v30, %v7828_v17 }
 0xdcd   :  { %v5589_v49 = vpop.eup %5588  ;;  %4246 = vmatprep.mubr.bf16.mxu1 %v3995_v14  ;;  %v3968_v6 = vmul.f32 %v5587_v53, %v7824_v60 }
 0xdce   :  { %v3970_v23 = vmul.f32 %v5589_v49, %v7832_v16  ;;  %4247 = vmatmul.mubr.bf16.gmra.mxu1 %v3994_v41  ;;  %v3985_v42 = vadd.f32 %v3969_v61, %v7467_v1 }
 0xdcf   :  { %v5591_v63 = vpop.eup %5590  ;;  %v3984_v33 = vadd.f32 %v3968_v6, %v7471_v62 }
 0xdd0   :  { %v3971_v2 = vmul.f32 %v5591_v63, %v7836_v35  ;;  %v3986_v25 = vadd.f32 %v3970_v23, %v7481_v24 }
 0xdd2   :  { %v3987_v57 = vadd.f32 %v3971_v2, %v7477_v5  ;;  %v3996_v46 = vpack.c.bf16 %v3986_v25, %v3984_v33 }
 0xdd3   :  { %v5593_v50 = vpop.eup %5592 }
 0xdd4   :  { %v5595_v27 = vpop.eup %5594  ;;  %v3997_v10 = vpack.c.bf16 %v3987_v57, %v3985_v42  ;;  %v3973_v16 = vmul.f32 %v5593_v50, %v7844_v9  ;;  %v4032_v9 = vld [vmem:[%s7908_s10] sm:$0x3]  ;;  %s5799_s10 = smov [#allocation10]  }
 0xdd5   :  { %v5597_v17 = vpop.eup %5596  ;;  %v3972_v35 = vmul.f32 %v5595_v27, %v7840_v52  ;;  %v4037_v52 = vrot.slane %v4032_v9, %v8052_v56  ;;  %s4298_s21 = sshll.u32 %s5799_s10, 4  ;;  %s4299_s21 = int_to_ptr.vmem [resolvable:$true] %s4298_s21 }
 0xdd6   :  { %v3974_v3 = vmul.f32 %v5597_v17, %v7848_v59  ;;  %4256 = vmatprep.mubr.bf16.mxu1 %v3997_v10  ;;  %v3989_v24 = vadd.f32 %v3973_v16, %v7487_v54  ;;  %v4041_v59 = vrot.slane %v4032_v9, %v8053_v18  ;;  %s5760_s24 = scalar_lea.vmem %s4299_s21, 2048  ;;  %p5765_p7 = scmp.lt.s32.totalorder %s4299_s21, %s4299_s21 }
 0xdd7   :  { %v5599_v60 = vpop.eup %5598  ;;  %4257 = vmatmul.mubr.bf16.gmra.mxu1 %v3996_v46  ;;  %v3988_v11 = vadd.f32 %v3972_v35, %v7491_v29  ;;  %p5761_p6 = scmp.ne.s32.totalorder %s4299_s21, %s5760_s24  ;;  %p5766_p8 = scmp.lt.s32.totalorder %s5760_s24, %s5760_s24 }
 0xdd8   :  { %v3975_v1 = vmul.f32 %v5599_v60, %v7852_v32  ;;  %v3990_v5 = vadd.f32 %v3974_v3, %v7500_v20 }
 0xdd9   :  { %p5767_p9 = por %p5766_p8, %p5765_p7 }
 0xdda   :  { %v3991_v62 = vadd.f32 %v3975_v1, %v7497_v51  ;;  %v3998_v48 = vpack.c.bf16 %v3990_v5, %v3988_v11 }
 0xddb   :  { %p5768_p10 = pnand %p5767_p9, %p5761_p6 }
 0xddc   :  { %v3999_v13 = vpack.c.bf16 %v3991_v62, %v3989_v24 }
 0xdde   :  { %4266 = vmatprep.mubr.bf16.mxu1 %v3999_v13 }
 0xddf   :  { %4267 = vmatmul.mubr.bf16.gmra.mxu1 %v3998_v48 }
 0xe86   :  { %v4238_v32 = vpop.f32.mrf.mxu1 }
 0xe87   :  { %v4239_v20 = vadd.f32 %v4238_v32, %v4037_v52 }
 0xe88   :  { %v4240_v43 = vpop.f32.mrf.mxu1 }
 0xe89   :  { %4277 = vst [vmem:[#allocation10] sm:$0xff] %v4239_v20  ;;  %v4241_v54 = vadd.f32 %v4240_v43, %v4041_v59 }
 0xe8a   :  { %v4242_v51 = vpop.f32.mrf.mxu1 }
 0xe8b   :  { %4278 = vst [vmem:[#allocation10 + $0x8] sm:$0xff] %v4241_v54  ;;  %v4243_v29 = vadd.f32 %v4242_v51, %v4037_v52 }
 0xe8c   :  { %v4244_v55 = vpop.f32.mrf.mxu1 }
 0xe8d   :  { %4279 = vst [vmem:[#allocation10 + $0x10] sm:$0xff] %v4243_v29  ;;  %v4245_v34 = vadd.f32 %v4244_v55, %v4041_v59 }
 0xe8e   :  { %v4248_v8 = vpop.f32.mrf.mxu1 }
 0xe8f   :  { %4280 = vst [vmem:[#allocation10 + $0x18] sm:$0xff] %v4245_v34  ;;  %v4249_v12 = vadd.f32 %v4248_v8, %v4037_v52 }
 0xe90   :  { %v4250_v21 = vpop.f32.mrf.mxu1 }
 0xe91   :  { %4281 = vst [vmem:[#allocation10 + $0x20] sm:$0xff] %v4249_v12  ;;  %v4251_v28 = vadd.f32 %v4250_v21, %v4041_v59 }
 0xe92   :  { %v4252_v56 = vpop.f32.mrf.mxu1 }
 0xe93   :  { %4282 = vst [vmem:[#allocation10 + $0x28] sm:$0xff] %v4251_v28  ;;  %v4253_v18 = vadd.f32 %v4252_v56, %v4037_v52 }
 0xe94   :  { %v4254_v36 = vpop.f32.mrf.mxu1 }
 0xe95   :  { %4283 = vst [vmem:[#allocation10 + $0x30] sm:$0xff] %v4253_v18  ;;  %v4255_v22 = vadd.f32 %v4254_v36, %v4041_v59 }
 0xe97   :  { %4284 = vst [vmem:[#allocation10 + $0x38] sm:$0xff] %v4255_v22  ;;  %v4258_v39 = vpop.f32.mrf.mxu1 }
 0xe98   :  { %v4259_v44 = vadd.f32 %v4258_v39, %v4037_v52 }
 0xe99   :  { %v4260_v0 = vpop.f32.mrf.mxu1 }
 0xe9a   :  { %4285 = vst [vmem:[#allocation10 + $0x40] sm:$0xff] %v4259_v44  ;;  %v4261_v47 = vadd.f32 %v4260_v0, %v4041_v59 }
 0xe9b   :  { %v4262_v40 = vpop.f32.mrf.mxu1 }
 0xe9c   :  { %4286 = vst [vmem:[#allocation10 + $0x48] sm:$0xff] %v4261_v47  ;;  %v4263_v7 = vadd.f32 %v4262_v40, %v4037_v52 }
 0xe9d   :  { %v4264_v19 = vpop.f32.mrf.mxu1 }
 0xe9e   :  { %4287 = vst [vmem:[#allocation10 + $0x50] sm:$0xff] %v4263_v7  ;;  %v4265_v37 = vadd.f32 %v4264_v19, %v4041_v59 }
 0xe9f   :  { %v4268_v58 = vpop.f32.mrf.mxu1 }
 0xea0   :  { %4288 = vst [vmem:[#allocation10 + $0x58] sm:$0xff] %v4265_v37  ;;  %v4269_v15 = vadd.f32 %v4268_v58, %v4037_v52 }
 0xea1   :  { %v4270_v4 = vpop.f32.mrf.mxu1 }
 0xea2   :  { %4289 = vst [vmem:[#allocation10 + $0x60] sm:$0xff] %v4269_v15  ;;  %v4271_v38 = vadd.f32 %v4270_v4, %v4041_v59 }
 0xea3   :  { %v4272_v26 = vpop.f32.mrf.mxu1 }
 0xea4   :  { %4290 = vst [vmem:[#allocation10 + $0x68] sm:$0xff] %v4271_v38  ;;  %v4273_v45 = vadd.f32 %v4272_v26, %v4037_v52 }
 0xea5   :  { %v4274_v31 = vpop.f32.mrf.mxu1 }
 0xea6   :  { %4291 = vst [vmem:[#allocation10 + $0x70] sm:$0xff] %v4273_v45  ;;  %v4275_v30 = vadd.f32 %v4274_v31, %v4041_v59 }
 0xea8   :  { %4292 = vst [vmem:[#allocation10 + $0x78] sm:$0xff] %v4275_v30 }
 0xea9   :  { %5771 = shalt.err (!%p5768_p10)
}
 0xeaa   :  { %4304 = dma.vmem_to_hbm [thread:$0]  %s4299_s21, 2048, %s7909_s11, [#allocation4], %s5792_s27, %s5792_s27, %s5793_s28  }
 0xeab   :  { %5786 = dma.done.wait [#allocation4], 2048  }
 0xeac   :  { %5787 = vsyncadd [#allocation4], 4294965248 }
 0xead   :  { %4308 = vsyncpa [#allocation3], 1 }
 0xeae   :  { %4309 = vsyncpa [#allocation6], 1 }
 0xeaf   :  { %4310 = vsyncpa [#allocation9], 1 }
 0xeb0   :  { %4311 = vsyncpa [#allocation4], 1 }

</bundles_post_ra>
